<compile_context>
chip_gen: v6e
topology: v6e:2x2x1
jax: 0.10.0
libtpu: 0.0.40
codegen_flags: <defaults>
</compile_context>

<pallas_src>
import functools

import jax
import jax.numpy as jnp
from jax.experimental import pallas as pl
from jax.experimental.pallas import tpu as pltpu


def _round_up(x, m):
    return (x + m - 1) // m * m


def _cdiv(a, b):
    return (a + b - 1) // b


def _device_kind():
    try:
        return jax.devices()[0].device_kind.lower()
    except Exception:
        return ""


def _guess_num_tensorcores():
    """Best-effort TensorCore count per device (megacore v4/v5p, v7x)."""
    kind = _device_kind()
    if any(tag in kind for tag in ("v7", "v4", "v5p")):
        return 2
    return 1


def _default_compute_dtype(x_dtype):
    """bf16 MXU operands on v5e (f32 accumulation); input dtype elsewhere."""
    kind = _device_kind()
    is_v5e = ("v5e" in kind) or ("v5 lite" in kind) or ("v5lite" in kind)
    if is_v5e and jnp.dtype(x_dtype) == jnp.dtype(jnp.float32):
        return jnp.dtype(jnp.bfloat16)
    return jnp.dtype(x_dtype)


def _resident_block_spec(block_shape, index_map):
    """BlockSpec for a grid-invariant input: request single buffering."""
    buffered = getattr(pl, "Buffered", None)
    if buffered is not None:
        try:
            return pl.BlockSpec(block_shape, index_map,
                                pipeline_mode=buffered(1))
        except TypeError:
            pass  # older API without pipeline_mode: fall back to default
    return pl.BlockSpec(block_shape, index_map)


# ----------------------------- Pallas kernel ------------------------------- #
def _conv_taps_kernel(ph_ref, w_ref, b_ref, o_ref, acc_ref, *, tap_offsets,
                      tile_m):
    """One M-tile: out = conv3x3/s2(x) + b, as 9 accumulated MXU matmuls.

    ph_ref : (4*S, Cp)     flattened stride-2 phase slab (whole, VMEM-resident)
    w_ref  : (9, Cp, Cop)  per-tap weights
    b_ref  : (1, Cop)      bias (f32)
    o_ref  : (tile_m, Cop) output rows for this grid step
    acc_ref: (tile_m, Cop) f32 VMEM accumulator scratch
    """
    m0 = pl.multiple_of(pl.program_id(0) * tile_m, 8)
    for t, off in enumerate(tap_offsets):              # static 9-way unroll
        lhs = ph_ref[pl.ds(m0 + off, tile_m), :]
        dot_t = jnp.dot(lhs, w_ref[t], preferred_element_type=jnp.float32)
        if t == 0:
            acc_ref[...] = dot_t                        # no separate zero pass
        else:
            acc_ref[...] += dot_t
    o_ref[...] = (acc_ref[...] + b_ref[...]).astype(o_ref.dtype)


# --------------------------------- Glue ------------------------------------ #
def conv3x3_s2_p1(x_nhwc, w_oihw, bias, *, apply_relu=False,
                  compute_dtype=None, tile_m_max=512):
    """3x3 / stride-2 / pad-1 conv (optionally on relu(x)) via a Pallas kernel.

    The FPN top blocks see the smallest pyramid level, so the whole phase slab
    comfortably fits VMEM on v5e/v6e/v7x (single-buffered).
    """
    N, H, W, C = x_nhwc.shape
    Cout = w_oihw.shape[0]
    assert w_oihw.shape == (Cout, C, 3, 3)
    cdt = (jnp.dtype(compute_dtype) if compute_dtype is not None
           else _default_compute_dtype(x_nhwc.dtype))
    out_dtype = x_nhwc.dtype

    if apply_relu:
        # ReLU hoisted out of the kernel: fuses into the XLA pad/space-to-depth
        # pass below (relu(pad(x)) == pad(relu(x)), so semantics are exact).
        x_nhwc = jnp.maximum(x_nhwc, 0)

    Ho, Wo = (H + 1) // 2, (W + 1) // 2              # conv output extents
    Hh = Ho + 2                                      # phase-grid rows (+halo)
    Wh = Wo + 1                                      # phase-grid cols (+halo)
    # Sublane-align the phase row pitch only when the padded-compute growth is
    # small (<= 12.5%); aligns the (kh//2)=1 tap offsets.
    Wh_aligned = _round_up(Wh, 8)
    if Wh_aligned - Wh <= Wh // 8:
        Wh = Wh_aligned
    Cp, Cop = _round_up(C, 128), _round_up(Cout, 128)  # lane-dense channels

    # ---- stride-2 phase split (space-to-depth), zero-padded.  ~1x traffic.
    xp = jnp.pad(x_nhwc, ((0, 0), (1, 2 * Hh - 1 - H), (1, 2 * Wh - 1 - W),
                          (0, Cp - C)))
    ph = xp.reshape(N, Hh, 2, Wh, 2, Cp).transpose(2, 4, 0, 1, 3, 5)
    M_total = N * Hh * Wh                            # output rows incl. halo

    # ---- grid sizing: 1 step on single-TC chips, >= 2 steps/core otherwise.
    num_cores = _guess_num_tensorcores()
    if num_cores > 1:
        target_steps = max(2 * num_cores, _cdiv(M_total, tile_m_max))
    else:
        target_steps = max(1, _cdiv(M_total, tile_m_max))
    tile_m = min(tile_m_max, _round_up(_cdiv(M_total, target_steps), 8))
    grid_m = _cdiv(M_total, tile_m)
    M_pad = grid_m * tile_m
    # Over-read invariant: S >= M_pad + max intra-phase tap offset (Wh + 1).
    S = _round_up(M_pad + Wh + 1, 8)

    ph = ph.reshape(2, 2, M_total, Cp)
    ph = jnp.pad(ph, ((0, 0), (0, 0), (0, S - M_total), (0, 0)))
    ph = ph.reshape(4 * S, Cp).astype(cdt)

    # ---- weights (O, I, 3, 3) -> (9, Cp, Cop); bias -> (1, Cop) f32
    wt = jnp.transpose(w_oihw, (2, 3, 1, 0))         # (kh, kw, cin, cout)
    wt = jnp.pad(wt, ((0, 0), (0, 0), (0, Cp - C), (0, Cop - Cout)))
    wt = wt.reshape(9, Cp, Cop).astype(cdt)
    bt = jnp.pad(bias, (0, Cop - Cout)).reshape(1, Cop).astype(jnp.float32)

    # tap (kh, kw) -> phase (kh%2, kw%2), row offset (kh//2)*Wh + kw//2
    tap_offsets = tuple(
        (2 * (kh % 2) + (kw % 2)) * S + (kh // 2) * Wh + (kw // 2)
        for kh in range(3) for kw in range(3))

    itm = jnp.dtype(cdt).itemsize
    out_itm = jnp.dtype(out_dtype).itemsize
    in_bytes = 4 * S * Cp * itm + 9 * Cp * Cop * itm + Cop * 4
    resident = (in_bytes                               # single-buffered inputs
                + 2 * tile_m * Cop * out_itm           # double-buffered output
                + tile_m * Cop * 4)                    # f32 accumulator scratch
    # Headroom assumes worst-case 2x input buffering (if Buffered(1) is not
    # honoured) plus Mosaic temps; capped at the v7x-safe 64 MiB.
    vmem_limit = int(min(max(resident + in_bytes + (4 << 20), 32 << 20),
                         64 << 20))

    cost = pl.CostEstimate(
        flops=2 * M_pad * Cp * Cop * 9,
        transcendentals=0,
        bytes_accessed=in_bytes + M_pad * Cop * out_itm)

    kernel = functools.partial(_conv_taps_kernel, tap_offsets=tap_offsets,
                               tile_m=tile_m)
    out = pl.pallas_call(
        kernel,
        out_shape=jax.ShapeDtypeStruct((M_pad, Cop), out_dtype),
        grid=(grid_m,),
        in_specs=[
            _resident_block_spec((4 * S, Cp), lambda i: (0, 0)),     # phases
            _resident_block_spec((9, Cp, Cop), lambda i: (0, 0, 0)), # weights
            _resident_block_spec((1, Cop), lambda i: (0, 0)),        # bias
        ],
        out_specs=pl.BlockSpec((tile_m, Cop), lambda i: (i, 0)),
        scratch_shapes=[pltpu.VMEM((tile_m, Cop), jnp.float32)],
        compiler_params=pltpu.CompilerParams(
            dimension_semantics=("parallel",),
            vmem_limit_bytes=vmem_limit),
        cost_estimate=cost,
    )(ph, wt, bt)

    # drop padded tail rows, halo rows/cols and padded channels
    out = out[:M_total].reshape(N, Hh, Wh, Cop)[:, :Ho, :Wo, :Cout]
    return out


def fpn_top_blocks_nhwc(x_nhwc, params, *, compute_dtype=None):
    """NHWC (channels-last, TPU-native) entry point."""
    p6 = conv3x3_s2_p1(x_nhwc, params["p6_w"], params["p6_b"],
                       apply_relu=False, compute_dtype=compute_dtype)
    p7 = conv3x3_s2_p1(p6, params["p7_w"], params["p7_b"],
                       apply_relu=True, compute_dtype=compute_dtype)
    return [p6, p7]


def fpn_top_blocks(x_nchw, params, *, compute_dtype=None):
    """PyTorch-compatible NCHW interface."""
    x = jnp.transpose(x_nchw, (0, 2, 3, 1))
    p6, p7 = fpn_top_blocks_nhwc(x, params, compute_dtype=compute_dtype)
    return [jnp.transpose(p6, (0, 3, 1, 2)), jnp.transpose(p7, (0, 3, 1, 2))]


# ----------------------------- Param init ---------------------------------- #
def init_params(key, out_channels):
    """Deterministic synthetic init mimicking Conv2d shapes (O, I, 3, 3)."""
    k1, k2, k3, k4 = jax.random.split(key, 4)
    fan_in = out_channels * 3 * 3
    bound = 1.0 / jnp.sqrt(fan_in)
    shape_w = (out_channels, out_channels, 3, 3)
    return {
        "p6_w": jax.random.uniform(k1, shape_w, jnp.float32, -bound, bound),
        "p6_b": jax.random.uniform(k2, (out_channels,), jnp.float32, -bound, bound),
        "p7_w": jax.random.uniform(k3, shape_w, jnp.float32, -bound, bound),
        "p7_b": jax.random.uniform(k4, (out_channels,), jnp.float32, -bound, bound),
    }


# ------------------------------ Reference ----------------------------------- #
def _ref_conv_nchw(x, w, b):
    y = jax.lax.conv_general_dilated(
        x, w, window_strides=(2, 2), padding=((1, 1), (1, 1)),
        dimension_numbers=("NCHW", "OIHW", "NCHW"))
    return y + b.reshape(1, -1, 1, 1)


def _ref_fpn_top_blocks(x, params):
    p6 = _ref_conv_nchw(x, params["p6_w"], params["p6_b"])
    p7 = _ref_conv_nchw(jnp.maximum(p6, 0.0), params["p7_w"], params["p7_b"])
    return [p6, p7]


# --------------------------------- Main ------------------------------------- #
if __name__ == "__main__":
    key = jax.random.PRNGKey(0)
    kx, kp = jax.random.split(key)

    out_channels = 8
    x = jax.random.normal(kx, (2, out_channels, 16, 16), dtype=jnp.float32)
    params = init_params(kp, out_channels)

    refs = _ref_fpn_top_blocks(x, params)

    # Explicit fp32 operands: tight check against the XLA conv reference.
    fwd_f32 = jax.jit(functools.partial(fpn_top_blocks,
                                        compute_dtype=jnp.float32))
    outs = [jax.block_until_ready(o) for o in fwd_f32(x, params)]
    assert outs[0].shape == (2, out_channels, 8, 8), outs[0].shape
    assert outs[1].shape == (2, out_channels, 4, 4), outs[1].shape
    for got, ref in zip(outs, refs):
        assert jnp.allclose(got, ref, atol=1e-4, rtol=1e-4), (
            float(jnp.max(jnp.abs(got - ref))))

    # Default path (bf16 operands on v5e, input dtype elsewhere): loose check.
    outs_def = [jax.block_until_ready(o)
                for o in jax.jit(fpn_top_blocks)(x, params)]
    for got, ref in zip(outs_def, refs):
        assert jnp.allclose(got, ref, atol=5e-2, rtol=5e-2), (
            float(jnp.max(jnp.abs(got - ref))))

    # bf16 MXU operands, f32 accumulation (v5e/v6e/v7x fast path).
    fwd_bf16 = jax.jit(functools.partial(fpn_top_blocks,
                                         compute_dtype=jnp.bfloat16))
    outs_bf16 = [jax.block_until_ready(o) for o in fwd_bf16(x, params)]
    for got, ref in zip(outs_bf16, refs):
        assert jnp.allclose(got, ref, atol=5e-2, rtol=5e-2), (
            float(jnp.max(jnp.abs(got - ref))))

    print("KERNEL_OK")
</pallas_src>

<mosaic_0001>
module attributes {stable_mosaic.version = 11 : i64} {
  func.func @_conv_taps_kernel(%arg0: i32, %arg1: memref<800x128xf32, #tpu.memory_space<vmem>>, %arg2: memref<9x128x128xf32, #tpu.memory_space<vmem>>, %arg3: memref<1x128xf32, #tpu.memory_space<vmem>>, %arg4: memref<184x128xf32, #tpu.memory_space<vmem>>, %arg5: memref<184x128xf32, #tpu.memory_space<vmem>>) attributes {dimension_semantics = [#tpu.dimension_semantics<parallel>], iteration_bounds = array<i64: 1>, scalar_prefetch = 0 : i64, scratch_operands = 1 : i64, tpu.core_type = #tpu.core_type<tc>, window_params = [{pipeline_mode = #tpu.pipeline_mode<synchronous>, transform_indices = @transform_0, window_bounds = array<i64: 800, 128>}, {pipeline_mode = #tpu.pipeline_mode<synchronous>, transform_indices = @transform_1, window_bounds = array<i64: 9, 128, 128>}, {pipeline_mode = #tpu.pipeline_mode<synchronous>, transform_indices = @transform_2, window_bounds = array<i64: 1, 128>}, {transform_indices = @transform_3, window_bounds = array<i64: 184, 128>}]} {
    %c184_i32 = arith.constant 184 : i32
    %0 = arith.muli %arg0, %c184_i32 : i32
    %1 = tpu.assume_multiple %0, 8 : i32
    %c0_i32 = arith.constant 0 : i32
    %2 = arith.addi %1, %c0_i32 : i32
    %3 = arith.index_cast %2 : i32 to index
    %c0 = arith.constant 0 : index
    %4 = vector.load %arg1[%3, %c0] : memref<800x128xf32, #tpu.memory_space<vmem>>, vector<184x128xf32>
    %c0_0 = arith.constant 0 : index
    %c0_1 = arith.constant 0 : index
    %c0_2 = arith.constant 0 : index
    %5 = vector.load %arg2[%c0_0, %c0_1, %c0_2] : memref<9x128x128xf32, #tpu.memory_space<vmem>>, vector<1x128x128xf32>
    %6 = vector.shape_cast %5 : vector<1x128x128xf32> to vector<128x128xf32>
    %cst = arith.constant dense<0.000000e+00> : vector<184x128xf32>
    %7 = tpu.matmul %4, %6, %cst {dimension_numbers = #tpu.dot_dimension_numbers<[1], [0], [0], [1], [0, 0, 1, 1], [], []>} : vector<184x128xf32>, vector<128x128xf32>, vector<184x128xf32> -> vector<184x128xf32>
    %c0_3 = arith.constant 0 : index
    %c0_4 = arith.constant 0 : index
    %8 = vector.load %arg5[%c0_3, %c0_4] : memref<184x128xf32, #tpu.memory_space<vmem>>, vector<184x128xf32>
    tpu.vector_store %arg5[%c0_3, %c0_4], %7 {strides = array<i32>} : memref<184x128xf32, #tpu.memory_space<vmem>>, vector<184x128xf32>,
    %c200_i32 = arith.constant 200 : i32
    %9 = arith.addi %1, %c200_i32 : i32
    %10 = arith.index_cast %9 : i32 to index
    %c0_5 = arith.constant 0 : index
    %11 = vector.load %arg1[%10, %c0_5] : memref<800x128xf32, #tpu.memory_space<vmem>>, vector<184x128xf32>
    %c1 = arith.constant 1 : index
    %c0_6 = arith.constant 0 : index
    %c0_7 = arith.constant 0 : index
    %12 = vector.load %arg2[%c1, %c0_6, %c0_7] : memref<9x128x128xf32, #tpu.memory_space<vmem>>, vector<1x128x128xf32>
    %13 = vector.shape_cast %12 : vector<1x128x128xf32> to vector<128x128xf32>
    %cst_8 = arith.constant dense<0.000000e+00> : vector<184x128xf32>
    %14 = tpu.matmul %11, %13, %cst_8 {dimension_numbers = #tpu.dot_dimension_numbers<[1], [0], [0], [1], [0, 0, 1, 1], [], []>} : vector<184x128xf32>, vector<128x128xf32>, vector<184x128xf32> -> vector<184x128xf32>
    %c0_9 = arith.constant 0 : index
    %c0_10 = arith.constant 0 : index
    %15 = vector.load %arg5[%c0_9, %c0_10] : memref<184x128xf32, #tpu.memory_space<vmem>>, vector<184x128xf32>
    %16 = arith.addf %15, %14 : vector<184x128xf32>
    %c0_11 = arith.constant 0 : index
    %c0_12 = arith.constant 0 : index
    %17 = vector.load %arg5[%c0_11, %c0_12] : memref<184x128xf32, #tpu.memory_space<vmem>>, vector<184x128xf32>
    tpu.vector_store %arg5[%c0_11, %c0_12], %16 {strides = array<i32>} : memref<184x128xf32, #tpu.memory_space<vmem>>, vector<184x128xf32>,
    %c1_i32 = arith.constant 1 : i32
    %18 = arith.addi %1, %c1_i32 : i32
    %19 = arith.index_cast %18 : i32 to index
    %c0_13 = arith.constant 0 : index
    %20 = vector.load %arg1[%19, %c0_13] : memref<800x128xf32, #tpu.memory_space<vmem>>, vector<184x128xf32>
    %c2 = arith.constant 2 : index
    %c0_14 = arith.constant 0 : index
    %c0_15 = arith.constant 0 : index
    %21 = vector.load %arg2[%c2, %c0_14, %c0_15] : memref<9x128x128xf32, #tpu.memory_space<vmem>>, vector<1x128x128xf32>
    %22 = vector.shape_cast %21 : vector<1x128x128xf32> to vector<128x128xf32>
    %cst_16 = arith.constant dense<0.000000e+00> : vector<184x128xf32>
    %23 = tpu.matmul %20, %22, %cst_16 {dimension_numbers = #tpu.dot_dimension_numbers<[1], [0], [0], [1], [0, 0, 1, 1], [], []>} : vector<184x128xf32>, vector<128x128xf32>, vector<184x128xf32> -> vector<184x128xf32>
    %c0_17 = arith.constant 0 : index
    %c0_18 = arith.constant 0 : index
    %24 = vector.load %arg5[%c0_17, %c0_18] : memref<184x128xf32, #tpu.memory_space<vmem>>, vector<184x128xf32>
    %25 = arith.addf %24, %23 : vector<184x128xf32>
    %c0_19 = arith.constant 0 : index
    %c0_20 = arith.constant 0 : index
    %26 = vector.load %arg5[%c0_19, %c0_20] : memref<184x128xf32, #tpu.memory_space<vmem>>, vector<184x128xf32>
    tpu.vector_store %arg5[%c0_19, %c0_20], %25 {strides = array<i32>} : memref<184x128xf32, #tpu.memory_space<vmem>>, vector<184x128xf32>,
    %c400_i32 = arith.constant 400 : i32
    %27 = arith.addi %1, %c400_i32 : i32
    %28 = arith.index_cast %27 : i32 to index
    %c0_21 = arith.constant 0 : index
    %29 = vector.load %arg1[%28, %c0_21] : memref<800x128xf32, #tpu.memory_space<vmem>>, vector<184x128xf32>
    %c3 = arith.constant 3 : index
    %c0_22 = arith.constant 0 : index
    %c0_23 = arith.constant 0 : index
    %30 = vector.load %arg2[%c3, %c0_22, %c0_23] : memref<9x128x128xf32, #tpu.memory_space<vmem>>, vector<1x128x128xf32>
    %31 = vector.shape_cast %30 : vector<1x128x128xf32> to vector<128x128xf32>
    %cst_24 = arith.constant dense<0.000000e+00> : vector<184x128xf32>
    %32 = tpu.matmul %29, %31, %cst_24 {dimension_numbers = #tpu.dot_dimension_numbers<[1], [0], [0], [1], [0, 0, 1, 1], [], []>} : vector<184x128xf32>, vector<128x128xf32>, vector<184x128xf32> -> vector<184x128xf32>
    %c0_25 = arith.constant 0 : index
    %c0_26 = arith.constant 0 : index
    %33 = vector.load %arg5[%c0_25, %c0_26] : memref<184x128xf32, #tpu.memory_space<vmem>>, vector<184x128xf32>
    %34 = arith.addf %33, %32 : vector<184x128xf32>
    %c0_27 = arith.constant 0 : index
    %c0_28 = arith.constant 0 : index
    %35 = vector.load %arg5[%c0_27, %c0_28] : memref<184x128xf32, #tpu.memory_space<vmem>>, vector<184x128xf32>
    tpu.vector_store %arg5[%c0_27, %c0_28], %34 {strides = array<i32>} : memref<184x128xf32, #tpu.memory_space<vmem>>, vector<184x128xf32>,
    %c600_i32 = arith.constant 600 : i32
    %36 = arith.addi %1, %c600_i32 : i32
    %37 = arith.index_cast %36 : i32 to index
    %c0_29 = arith.constant 0 : index
    %38 = vector.load %arg1[%37, %c0_29] : memref<800x128xf32, #tpu.memory_space<vmem>>, vector<184x128xf32>
    %c4 = arith.constant 4 : index
    %c0_30 = arith.constant 0 : index
    %c0_31 = arith.constant 0 : index
    %39 = vector.load %arg2[%c4, %c0_30, %c0_31] : memref<9x128x128xf32, #tpu.memory_space<vmem>>, vector<1x128x128xf32>
    %40 = vector.shape_cast %39 : vector<1x128x128xf32> to vector<128x128xf32>
    %cst_32 = arith.constant dense<0.000000e+00> : vector<184x128xf32>
    %41 = tpu.matmul %38, %40, %cst_32 {dimension_numbers = #tpu.dot_dimension_numbers<[1], [0], [0], [1], [0, 0, 1, 1], [], []>} : vector<184x128xf32>, vector<128x128xf32>, vector<184x128xf32> -> vector<184x128xf32>
    %c0_33 = arith.constant 0 : index
    %c0_34 = arith.constant 0 : index
    %42 = vector.load %arg5[%c0_33, %c0_34] : memref<184x128xf32, #tpu.memory_space<vmem>>, vector<184x128xf32>
    %43 = arith.addf %42, %41 : vector<184x128xf32>
    %c0_35 = arith.constant 0 : index
    %c0_36 = arith.constant 0 : index
    %44 = vector.load %arg5[%c0_35, %c0_36] : memref<184x128xf32, #tpu.memory_space<vmem>>, vector<184x128xf32>
    tpu.vector_store %arg5[%c0_35, %c0_36], %43 {strides = array<i32>} : memref<184x128xf32, #tpu.memory_space<vmem>>, vector<184x128xf32>,
    %c401_i32 = arith.constant 401 : i32
    %45 = arith.addi %1, %c401_i32 : i32
    %46 = arith.index_cast %45 : i32 to index
    %c0_37 = arith.constant 0 : index
    %47 = vector.load %arg1[%46, %c0_37] : memref<800x128xf32, #tpu.memory_space<vmem>>, vector<184x128xf32>
    %c5 = arith.constant 5 : index
    %c0_38 = arith.constant 0 : index
    %c0_39 = arith.constant 0 : index
    %48 = vector.load %arg2[%c5, %c0_38, %c0_39] : memref<9x128x128xf32, #tpu.memory_space<vmem>>, vector<1x128x128xf32>
    %49 = vector.shape_cast %48 : vector<1x128x128xf32> to vector<128x128xf32>
    %cst_40 = arith.constant dense<0.000000e+00> : vector<184x128xf32>
    %50 = tpu.matmul %47, %49, %cst_40 {dimension_numbers = #tpu.dot_dimension_numbers<[1], [0], [0], [1], [0, 0, 1, 1], [], []>} : vector<184x128xf32>, vector<128x128xf32>, vector<184x128xf32> -> vector<184x128xf32>
    %c0_41 = arith.constant 0 : index
    %c0_42 = arith.constant 0 : index
    %51 = vector.load %arg5[%c0_41, %c0_42] : memref<184x128xf32, #tpu.memory_space<vmem>>, vector<184x128xf32>
    %52 = arith.addf %51, %50 : vector<184x128xf32>
    %c0_43 = arith.constant 0 : index
    %c0_44 = arith.constant 0 : index
    %53 = vector.load %arg5[%c0_43, %c0_44] : memref<184x128xf32, #tpu.memory_space<vmem>>, vector<184x128xf32>
    tpu.vector_store %arg5[%c0_43, %c0_44], %52 {strides = array<i32>} : memref<184x128xf32, #tpu.memory_space<vmem>>, vector<184x128xf32>,
    %c9_i32 = arith.constant 9 : i32
    %54 = arith.addi %1, %c9_i32 : i32
    %55 = arith.index_cast %54 : i32 to index
    %c0_45 = arith.constant 0 : index
    %56 = vector.load %arg1[%55, %c0_45] : memref<800x128xf32, #tpu.memory_space<vmem>>, vector<184x128xf32>
    %c6 = arith.constant 6 : index
    %c0_46 = arith.constant 0 : index
    %c0_47 = arith.constant 0 : index
    %57 = vector.load %arg2[%c6, %c0_46, %c0_47] : memref<9x128x128xf32, #tpu.memory_space<vmem>>, vector<1x128x128xf32>
    %58 = vector.shape_cast %57 : vector<1x128x128xf32> to vector<128x128xf32>
    %cst_48 = arith.constant dense<0.000000e+00> : vector<184x128xf32>
    %59 = tpu.matmul %56, %58, %cst_48 {dimension_numbers = #tpu.dot_dimension_numbers<[1], [0], [0], [1], [0, 0, 1, 1], [], []>} : vector<184x128xf32>, vector<128x128xf32>, vector<184x128xf32> -> vector<184x128xf32>
    %c0_49 = arith.constant 0 : index
    %c0_50 = arith.constant 0 : index
    %60 = vector.load %arg5[%c0_49, %c0_50] : memref<184x128xf32, #tpu.memory_space<vmem>>, vector<184x128xf32>
    %61 = arith.addf %60, %59 : vector<184x128xf32>
    %c0_51 = arith.constant 0 : index
    %c0_52 = arith.constant 0 : index
    %62 = vector.load %arg5[%c0_51, %c0_52] : memref<184x128xf32, #tpu.memory_space<vmem>>, vector<184x128xf32>
    tpu.vector_store %arg5[%c0_51, %c0_52], %61 {strides = array<i32>} : memref<184x128xf32, #tpu.memory_space<vmem>>, vector<184x128xf32>,
    %c209_i32 = arith.constant 209 : i32
    %63 = arith.addi %1, %c209_i32 : i32
    %64 = arith.index_cast %63 : i32 to index
    %c0_53 = arith.constant 0 : index
    %65 = vector.load %arg1[%64, %c0_53] : memref<800x128xf32, #tpu.memory_space<vmem>>, vector<184x128xf32>
    %c7 = arith.constant 7 : index
    %c0_54 = arith.constant 0 : index
    %c0_55 = arith.constant 0 : index
    %66 = vector.load %arg2[%c7, %c0_54, %c0_55] : memref<9x128x128xf32, #tpu.memory_space<vmem>>, vector<1x128x128xf32>
    %67 = vector.shape_cast %66 : vector<1x128x128xf32> to vector<128x128xf32>
    %cst_56 = arith.constant dense<0.000000e+00> : vector<184x128xf32>
    %68 = tpu.matmul %65, %67, %cst_56 {dimension_numbers = #tpu.dot_dimension_numbers<[1], [0], [0], [1], [0, 0, 1, 1], [], []>} : vector<184x128xf32>, vector<128x128xf32>, vector<184x128xf32> -> vector<184x128xf32>
    %c0_57 = arith.constant 0 : index
    %c0_58 = arith.constant 0 : index
    %69 = vector.load %arg5[%c0_57, %c0_58] : memref<184x128xf32, #tpu.memory_space<vmem>>, vector<184x128xf32>
    %70 = arith.addf %69, %68 : vector<184x128xf32>
    %c0_59 = arith.constant 0 : index
    %c0_60 = arith.constant 0 : index
    %71 = vector.load %arg5[%c0_59, %c0_60] : memref<184x128xf32, #tpu.memory_space<vmem>>, vector<184x128xf32>
    tpu.vector_store %arg5[%c0_59, %c0_60], %70 {strides = array<i32>} : memref<184x128xf32, #tpu.memory_space<vmem>>, vector<184x128xf32>,
    %c10_i32 = arith.constant 10 : i32
    %72 = arith.addi %1, %c10_i32 : i32
    %73 = arith.index_cast %72 : i32 to index
    %c0_61 = arith.constant 0 : index
    %74 = vector.load %arg1[%73, %c0_61] : memref<800x128xf32, #tpu.memory_space<vmem>>, vector<184x128xf32>
    %c8 = arith.constant 8 : index
    %c0_62 = arith.constant 0 : index
    %c0_63 = arith.constant 0 : index
    %75 = vector.load %arg2[%c8, %c0_62, %c0_63] : memref<9x128x128xf32, #tpu.memory_space<vmem>>, vector<1x128x128xf32>
    %76 = vector.shape_cast %75 : vector<1x128x128xf32> to vector<128x128xf32>
    %cst_64 = arith.constant dense<0.000000e+00> : vector<184x128xf32>
    %77 = tpu.matmul %74, %76, %cst_64 {dimension_numbers = #tpu.dot_dimension_numbers<[1], [0], [0], [1], [0, 0, 1, 1], [], []>} : vector<184x128xf32>, vector<128x128xf32>, vector<184x128xf32> -> vector<184x128xf32>
    %c0_65 = arith.constant 0 : index
    %c0_66 = arith.constant 0 : index
    %78 = vector.load %arg5[%c0_65, %c0_66] : memref<184x128xf32, #tpu.memory_space<vmem>>, vector<184x128xf32>
    %79 = arith.addf %78, %77 : vector<184x128xf32>
    %c0_67 = arith.constant 0 : index
    %c0_68 = arith.constant 0 : index
    %80 = vector.load %arg5[%c0_67, %c0_68] : memref<184x128xf32, #tpu.memory_space<vmem>>, vector<184x128xf32>
    tpu.vector_store %arg5[%c0_67, %c0_68], %79 {strides = array<i32>} : memref<184x128xf32, #tpu.memory_space<vmem>>, vector<184x128xf32>,
    %c0_69 = arith.constant 0 : index
    %c0_70 = arith.constant 0 : index
    %81 = vector.load %arg5[%c0_69, %c0_70] : memref<184x128xf32, #tpu.memory_space<vmem>>, vector<184x128xf32>
    %c0_71 = arith.constant 0 : index
    %c0_72 = arith.constant 0 : index
    %82 = vector.load %arg3[%c0_71, %c0_72] : memref<1x128xf32, #tpu.memory_space<vmem>>, vector<1x128xf32>
    %83 = vector.broadcast %82 : vector<1x128xf32> to vector<184x128xf32>
    %84 = arith.addf %81, %83 : vector<184x128xf32>
    %c0_73 = arith.constant 0 : index
    %c0_74 = arith.constant 0 : index
    %85 = vector.load %arg4[%c0_73, %c0_74] : memref<184x128xf32, #tpu.memory_space<vmem>>, vector<184x128xf32>
    tpu.vector_store %arg4[%c0_73, %c0_74], %84 {strides = array<i32>} : memref<184x128xf32, #tpu.memory_space<vmem>>, vector<184x128xf32>,
    return
  }
  func.func @transform_0(%arg0: i32) -> (i32, i32) {
    %c0_i32 = arith.constant 0 : i32
    %c0_i32_0 = arith.constant 0 : i32
    %c0_i32_1 = arith.constant 0 : i32
    return %c0_i32, %c0_i32_0 : i32, i32
  }
  func.func @transform_1(%arg0: i32) -> (i32, i32, i32) {
    %c0_i32 = arith.constant 0 : i32
    %c0_i32_0 = arith.constant 0 : i32
    %c0_i32_1 = arith.constant 0 : i32
    %c0_i32_2 = arith.constant 0 : i32
    return %c0_i32, %c0_i32_0, %c0_i32_1 : i32, i32, i32
  }
  func.func @transform_2(%arg0: i32) -> (i32, i32) {
    %c0_i32 = arith.constant 0 : i32
    %c0_i32_0 = arith.constant 0 : i32
    %c0_i32_1 = arith.constant 0 : i32
    return %c0_i32, %c0_i32_0 : i32, i32
  }
  func.func @transform_3(%arg0: i32) -> (i32, i32) {
    %c0_i32 = arith.constant 0 : i32
    %c0_i32_0 = arith.constant 0 : i32
    return %arg0, %c0_i32 : i32, i32
  }
}

module attributes {stable_mosaic.version = 11 : i64} {
  func.func @_conv_taps_kernel(%arg0: i32, %arg1: memref<288x128xf32, #tpu.memory_space<vmem>>, %arg2: memref<9x128x128xf32, #tpu.memory_space<vmem>>, %arg3: memref<1x128xf32, #tpu.memory_space<vmem>>, %arg4: memref<64x128xf32, #tpu.memory_space<vmem>>, %arg5: memref<64x128xf32, #tpu.memory_space<vmem>>) attributes {dimension_semantics = [#tpu.dimension_semantics<parallel>], iteration_bounds = array<i64: 1>, scalar_prefetch = 0 : i64, scratch_operands = 1 : i64, tpu.core_type = #tpu.core_type<tc>, window_params = [{pipeline_mode = #tpu.pipeline_mode<synchronous>, transform_indices = @transform_0, window_bounds = array<i64: 288, 128>}, {pipeline_mode = #tpu.pipeline_mode<synchronous>, transform_indices = @transform_1, window_bounds = array<i64: 9, 128, 128>}, {pipeline_mode = #tpu.pipeline_mode<synchronous>, transform_indices = @transform_2, window_bounds = array<i64: 1, 128>}, {transform_indices = @transform_3, window_bounds = array<i64: 64, 128>}]} {
    %c64_i32 = arith.constant 64 : i32
    %0 = arith.muli %arg0, %c64_i32 : i32
    %1 = tpu.assume_multiple %0, 8 : i32
    %c0_i32 = arith.constant 0 : i32
    %2 = arith.addi %1, %c0_i32 : i32
    %3 = arith.index_cast %2 : i32 to index
    %c0 = arith.constant 0 : index
    %4 = vector.load %arg1[%3, %c0] : memref<288x128xf32, #tpu.memory_space<vmem>>, vector<64x128xf32>
    %c0_0 = arith.constant 0 : index
    %c0_1 = arith.constant 0 : index
    %c0_2 = arith.constant 0 : index
    %5 = vector.load %arg2[%c0_0, %c0_1, %c0_2] : memref<9x128x128xf32, #tpu.memory_space<vmem>>, vector<1x128x128xf32>
    %6 = vector.shape_cast %5 : vector<1x128x128xf32> to vector<128x128xf32>
    %cst = arith.constant dense<0.000000e+00> : vector<64x128xf32>
    %7 = tpu.matmul %4, %6, %cst {dimension_numbers = #tpu.dot_dimension_numbers<[1], [0], [0], [1], [0, 0, 1, 1], [], []>} : vector<64x128xf32>, vector<128x128xf32>, vector<64x128xf32> -> vector<64x128xf32>
    %c0_3 = arith.constant 0 : index
    %c0_4 = arith.constant 0 : index
    %8 = vector.load %arg5[%c0_3, %c0_4] : memref<64x128xf32, #tpu.memory_space<vmem>>, vector<64x128xf32>
    tpu.vector_store %arg5[%c0_3, %c0_4], %7 {strides = array<i32>} : memref<64x128xf32, #tpu.memory_space<vmem>>, vector<64x128xf32>,
    %c72_i32 = arith.constant 72 : i32
    %9 = arith.addi %1, %c72_i32 : i32
    %10 = arith.index_cast %9 : i32 to index
    %c0_5 = arith.constant 0 : index
    %11 = vector.load %arg1[%10, %c0_5] : memref<288x128xf32, #tpu.memory_space<vmem>>, vector<64x128xf32>
    %c1 = arith.constant 1 : index
    %c0_6 = arith.constant 0 : index
    %c0_7 = arith.constant 0 : index
    %12 = vector.load %arg2[%c1, %c0_6, %c0_7] : memref<9x128x128xf32, #tpu.memory_space<vmem>>, vector<1x128x128xf32>
    %13 = vector.shape_cast %12 : vector<1x128x128xf32> to vector<128x128xf32>
    %cst_8 = arith.constant dense<0.000000e+00> : vector<64x128xf32>
    %14 = tpu.matmul %11, %13, %cst_8 {dimension_numbers = #tpu.dot_dimension_numbers<[1], [0], [0], [1], [0, 0, 1, 1], [], []>} : vector<64x128xf32>, vector<128x128xf32>, vector<64x128xf32> -> vector<64x128xf32>
    %c0_9 = arith.constant 0 : index
    %c0_10 = arith.constant 0 : index
    %15 = vector.load %arg5[%c0_9, %c0_10] : memref<64x128xf32, #tpu.memory_space<vmem>>, vector<64x128xf32>
    %16 = arith.addf %15, %14 : vector<64x128xf32>
    %c0_11 = arith.constant 0 : index
    %c0_12 = arith.constant 0 : index
    %17 = vector.load %arg5[%c0_11, %c0_12] : memref<64x128xf32, #tpu.memory_space<vmem>>, vector<64x128xf32>
    tpu.vector_store %arg5[%c0_11, %c0_12], %16 {strides = array<i32>} : memref<64x128xf32, #tpu.memory_space<vmem>>, vector<64x128xf32>,
    %c1_i32 = arith.constant 1 : i32
    %18 = arith.addi %1, %c1_i32 : i32
    %19 = arith.index_cast %18 : i32 to index
    %c0_13 = arith.constant 0 : index
    %20 = vector.load %arg1[%19, %c0_13] : memref<288x128xf32, #tpu.memory_space<vmem>>, vector<64x128xf32>
    %c2 = arith.constant 2 : index
    %c0_14 = arith.constant 0 : index
    %c0_15 = arith.constant 0 : index
    %21 = vector.load %arg2[%c2, %c0_14, %c0_15] : memref<9x128x128xf32, #tpu.memory_space<vmem>>, vector<1x128x128xf32>
    %22 = vector.shape_cast %21 : vector<1x128x128xf32> to vector<128x128xf32>
    %cst_16 = arith.constant dense<0.000000e+00> : vector<64x128xf32>
    %23 = tpu.matmul %20, %22, %cst_16 {dimension_numbers = #tpu.dot_dimension_numbers<[1], [0], [0], [1], [0, 0, 1, 1], [], []>} : vector<64x128xf32>, vector<128x128xf32>, vector<64x128xf32> -> vector<64x128xf32>
    %c0_17 = arith.constant 0 : index
    %c0_18 = arith.constant 0 : index
    %24 = vector.load %arg5[%c0_17, %c0_18] : memref<64x128xf32, #tpu.memory_space<vmem>>, vector<64x128xf32>
    %25 = arith.addf %24, %23 : vector<64x128xf32>
    %c0_19 = arith.constant 0 : index
    %c0_20 = arith.constant 0 : index
    %26 = vector.load %arg5[%c0_19, %c0_20] : memref<64x128xf32, #tpu.memory_space<vmem>>, vector<64x128xf32>
    tpu.vector_store %arg5[%c0_19, %c0_20], %25 {strides = array<i32>} : memref<64x128xf32, #tpu.memory_space<vmem>>, vector<64x128xf32>,
    %c144_i32 = arith.constant 144 : i32
    %27 = arith.addi %1, %c144_i32 : i32
    %28 = arith.index_cast %27 : i32 to index
    %c0_21 = arith.constant 0 : index
    %29 = vector.load %arg1[%28, %c0_21] : memref<288x128xf32, #tpu.memory_space<vmem>>, vector<64x128xf32>
    %c3 = arith.constant 3 : index
    %c0_22 = arith.constant 0 : index
    %c0_23 = arith.constant 0 : index
    %30 = vector.load %arg2[%c3, %c0_22, %c0_23] : memref<9x128x128xf32, #tpu.memory_space<vmem>>, vector<1x128x128xf32>
    %31 = vector.shape_cast %30 : vector<1x128x128xf32> to vector<128x128xf32>
    %cst_24 = arith.constant dense<0.000000e+00> : vector<64x128xf32>
    %32 = tpu.matmul %29, %31, %cst_24 {dimension_numbers = #tpu.dot_dimension_numbers<[1], [0], [0], [1], [0, 0, 1, 1], [], []>} : vector<64x128xf32>, vector<128x128xf32>, vector<64x128xf32> -> vector<64x128xf32>
    %c0_25 = arith.constant 0 : index
    %c0_26 = arith.constant 0 : index
    %33 = vector.load %arg5[%c0_25, %c0_26] : memref<64x128xf32, #tpu.memory_space<vmem>>, vector<64x128xf32>
    %34 = arith.addf %33, %32 : vector<64x128xf32>
    %c0_27 = arith.constant 0 : index
    %c0_28 = arith.constant 0 : index
    %35 = vector.load %arg5[%c0_27, %c0_28] : memref<64x128xf32, #tpu.memory_space<vmem>>, vector<64x128xf32>
    tpu.vector_store %arg5[%c0_27, %c0_28], %34 {strides = array<i32>} : memref<64x128xf32, #tpu.memory_space<vmem>>, vector<64x128xf32>,
    %c216_i32 = arith.constant 216 : i32
    %36 = arith.addi %1, %c216_i32 : i32
    %37 = arith.index_cast %36 : i32 to index
    %c0_29 = arith.constant 0 : index
    %38 = vector.load %arg1[%37, %c0_29] : memref<288x128xf32, #tpu.memory_space<vmem>>, vector<64x128xf32>
    %c4 = arith.constant 4 : index
    %c0_30 = arith.constant 0 : index
    %c0_31 = arith.constant 0 : index
    %39 = vector.load %arg2[%c4, %c0_30, %c0_31] : memref<9x128x128xf32, #tpu.memory_space<vmem>>, vector<1x128x128xf32>
    %40 = vector.shape_cast %39 : vector<1x128x128xf32> to vector<128x128xf32>
    %cst_32 = arith.constant dense<0.000000e+00> : vector<64x128xf32>
    %41 = tpu.matmul %38, %40, %cst_32 {dimension_numbers = #tpu.dot_dimension_numbers<[1], [0], [0], [1], [0, 0, 1, 1], [], []>} : vector<64x128xf32>, vector<128x128xf32>, vector<64x128xf32> -> vector<64x128xf32>
    %c0_33 = arith.constant 0 : index
    %c0_34 = arith.constant 0 : index
    %42 = vector.load %arg5[%c0_33, %c0_34] : memref<64x128xf32, #tpu.memory_space<vmem>>, vector<64x128xf32>
    %43 = arith.addf %42, %41 : vector<64x128xf32>
    %c0_35 = arith.constant 0 : index
    %c0_36 = arith.constant 0 : index
    %44 = vector.load %arg5[%c0_35, %c0_36] : memref<64x128xf32, #tpu.memory_space<vmem>>, vector<64x128xf32>
    tpu.vector_store %arg5[%c0_35, %c0_36], %43 {strides = array<i32>} : memref<64x128xf32, #tpu.memory_space<vmem>>, vector<64x128xf32>,
    %c145_i32 = arith.constant 145 : i32
    %45 = arith.addi %1, %c145_i32 : i32
    %46 = arith.index_cast %45 : i32 to index
    %c0_37 = arith.constant 0 : index
    %47 = vector.load %arg1[%46, %c0_37] : memref<288x128xf32, #tpu.memory_space<vmem>>, vector<64x128xf32>
    %c5 = arith.constant 5 : index
    %c0_38 = arith.constant 0 : index
    %c0_39 = arith.constant 0 : index
    %48 = vector.load %arg2[%c5, %c0_38, %c0_39] : memref<9x128x128xf32, #tpu.memory_space<vmem>>, vector<1x128x128xf32>
    %49 = vector.shape_cast %48 : vector<1x128x128xf32> to vector<128x128xf32>
    %cst_40 = arith.constant dense<0.000000e+00> : vector<64x128xf32>
    %50 = tpu.matmul %47, %49, %cst_40 {dimension_numbers = #tpu.dot_dimension_numbers<[1], [0], [0], [1], [0, 0, 1, 1], [], []>} : vector<64x128xf32>, vector<128x128xf32>, vector<64x128xf32> -> vector<64x128xf32>
    %c0_41 = arith.constant 0 : index
    %c0_42 = arith.constant 0 : index
    %51 = vector.load %arg5[%c0_41, %c0_42] : memref<64x128xf32, #tpu.memory_space<vmem>>, vector<64x128xf32>
    %52 = arith.addf %51, %50 : vector<64x128xf32>
    %c0_43 = arith.constant 0 : index
    %c0_44 = arith.constant 0 : index
    %53 = vector.load %arg5[%c0_43, %c0_44] : memref<64x128xf32, #tpu.memory_space<vmem>>, vector<64x128xf32>
    tpu.vector_store %arg5[%c0_43, %c0_44], %52 {strides = array<i32>} : memref<64x128xf32, #tpu.memory_space<vmem>>, vector<64x128xf32>,
    %c5_i32 = arith.constant 5 : i32
    %54 = arith.addi %1, %c5_i32 : i32
    %55 = arith.index_cast %54 : i32 to index
    %c0_45 = arith.constant 0 : index
    %56 = vector.load %arg1[%55, %c0_45] : memref<288x128xf32, #tpu.memory_space<vmem>>, vector<64x128xf32>
    %c6 = arith.constant 6 : index
    %c0_46 = arith.constant 0 : index
    %c0_47 = arith.constant 0 : index
    %57 = vector.load %arg2[%c6, %c0_46, %c0_47] : memref<9x128x128xf32, #tpu.memory_space<vmem>>, vector<1x128x128xf32>
    %58 = vector.shape_cast %57 : vector<1x128x128xf32> to vector<128x128xf32>
    %cst_48 = arith.constant dense<0.000000e+00> : vector<64x128xf32>
    %59 = tpu.matmul %56, %58, %cst_48 {dimension_numbers = #tpu.dot_dimension_numbers<[1], [0], [0], [1], [0, 0, 1, 1], [], []>} : vector<64x128xf32>, vector<128x128xf32>, vector<64x128xf32> -> vector<64x128xf32>
    %c0_49 = arith.constant 0 : index
    %c0_50 = arith.constant 0 : index
    %60 = vector.load %arg5[%c0_49, %c0_50] : memref<64x128xf32, #tpu.memory_space<vmem>>, vector<64x128xf32>
    %61 = arith.addf %60, %59 : vector<64x128xf32>
    %c0_51 = arith.constant 0 : index
    %c0_52 = arith.constant 0 : index
    %62 = vector.load %arg5[%c0_51, %c0_52] : memref<64x128xf32, #tpu.memory_space<vmem>>, vector<64x128xf32>
    tpu.vector_store %arg5[%c0_51, %c0_52], %61 {strides = array<i32>} : memref<64x128xf32, #tpu.memory_space<vmem>>, vector<64x128xf32>,
    %c77_i32 = arith.constant 77 : i32
    %63 = arith.addi %1, %c77_i32 : i32
    %64 = arith.index_cast %63 : i32 to index
    %c0_53 = arith.constant 0 : index
    %65 = vector.load %arg1[%64, %c0_53] : memref<288x128xf32, #tpu.memory_space<vmem>>, vector<64x128xf32>
    %c7 = arith.constant 7 : index
    %c0_54 = arith.constant 0 : index
    %c0_55 = arith.constant 0 : index
    %66 = vector.load %arg2[%c7, %c0_54, %c0_55] : memref<9x128x128xf32, #tpu.memory_space<vmem>>, vector<1x128x128xf32>
    %67 = vector.shape_cast %66 : vector<1x128x128xf32> to vector<128x128xf32>
    %cst_56 = arith.constant dense<0.000000e+00> : vector<64x128xf32>
    %68 = tpu.matmul %65, %67, %cst_56 {dimension_numbers = #tpu.dot_dimension_numbers<[1], [0], [0], [1], [0, 0, 1, 1], [], []>} : vector<64x128xf32>, vector<128x128xf32>, vector<64x128xf32> -> vector<64x128xf32>
    %c0_57 = arith.constant 0 : index
    %c0_58 = arith.constant 0 : index
    %69 = vector.load %arg5[%c0_57, %c0_58] : memref<64x128xf32, #tpu.memory_space<vmem>>, vector<64x128xf32>
    %70 = arith.addf %69, %68 : vector<64x128xf32>
    %c0_59 = arith.constant 0 : index
    %c0_60 = arith.constant 0 : index
    %71 = vector.load %arg5[%c0_59, %c0_60] : memref<64x128xf32, #tpu.memory_space<vmem>>, vector<64x128xf32>
    tpu.vector_store %arg5[%c0_59, %c0_60], %70 {strides = array<i32>} : memref<64x128xf32, #tpu.memory_space<vmem>>, vector<64x128xf32>,
    %c6_i32 = arith.constant 6 : i32
    %72 = arith.addi %1, %c6_i32 : i32
    %73 = arith.index_cast %72 : i32 to index
    %c0_61 = arith.constant 0 : index
    %74 = vector.load %arg1[%73, %c0_61] : memref<288x128xf32, #tpu.memory_space<vmem>>, vector<64x128xf32>
    %c8 = arith.constant 8 : index
    %c0_62 = arith.constant 0 : index
    %c0_63 = arith.constant 0 : index
    %75 = vector.load %arg2[%c8, %c0_62, %c0_63] : memref<9x128x128xf32, #tpu.memory_space<vmem>>, vector<1x128x128xf32>
    %76 = vector.shape_cast %75 : vector<1x128x128xf32> to vector<128x128xf32>
    %cst_64 = arith.constant dense<0.000000e+00> : vector<64x128xf32>
    %77 = tpu.matmul %74, %76, %cst_64 {dimension_numbers = #tpu.dot_dimension_numbers<[1], [0], [0], [1], [0, 0, 1, 1], [], []>} : vector<64x128xf32>, vector<128x128xf32>, vector<64x128xf32> -> vector<64x128xf32>
    %c0_65 = arith.constant 0 : index
    %c0_66 = arith.constant 0 : index
    %78 = vector.load %arg5[%c0_65, %c0_66] : memref<64x128xf32, #tpu.memory_space<vmem>>, vector<64x128xf32>
    %79 = arith.addf %78, %77 : vector<64x128xf32>
    %c0_67 = arith.constant 0 : index
    %c0_68 = arith.constant 0 : index
    %80 = vector.load %arg5[%c0_67, %c0_68] : memref<64x128xf32, #tpu.memory_space<vmem>>, vector<64x128xf32>
    tpu.vector_store %arg5[%c0_67, %c0_68], %79 {strides = array<i32>} : memref<64x128xf32, #tpu.memory_space<vmem>>, vector<64x128xf32>,
    %c0_69 = arith.constant 0 : index
    %c0_70 = arith.constant 0 : index
    %81 = vector.load %arg5[%c0_69, %c0_70] : memref<64x128xf32, #tpu.memory_space<vmem>>, vector<64x128xf32>
    %c0_71 = arith.constant 0 : index
    %c0_72 = arith.constant 0 : index
    %82 = vector.load %arg3[%c0_71, %c0_72] : memref<1x128xf32, #tpu.memory_space<vmem>>, vector<1x128xf32>
    %83 = vector.broadcast %82 : vector<1x128xf32> to vector<64x128xf32>
    %84 = arith.addf %81, %83 : vector<64x128xf32>
    %c0_73 = arith.constant 0 : index
    %c0_74 = arith.constant 0 : index
    %85 = vector.load %arg4[%c0_73, %c0_74] : memref<64x128xf32, #tpu.memory_space<vmem>>, vector<64x128xf32>
    tpu.vector_store %arg4[%c0_73, %c0_74], %84 {strides = array<i32>} : memref<64x128xf32, #tpu.memory_space<vmem>>, vector<64x128xf32>,
    return
  }
  func.func @transform_0(%arg0: i32) -> (i32, i32) {
    %c0_i32 = arith.constant 0 : i32
    %c0_i32_0 = arith.constant 0 : i32
    %c0_i32_1 = arith.constant 0 : i32
    return %c0_i32, %c0_i32_0 : i32, i32
  }
  func.func @transform_1(%arg0: i32) -> (i32, i32, i32) {
    %c0_i32 = arith.constant 0 : i32
    %c0_i32_0 = arith.constant 0 : i32
    %c0_i32_1 = arith.constant 0 : i32
    %c0_i32_2 = arith.constant 0 : i32
    return %c0_i32, %c0_i32_0, %c0_i32_1 : i32, i32, i32
  }
  func.func @transform_2(%arg0: i32) -> (i32, i32) {
    %c0_i32 = arith.constant 0 : i32
    %c0_i32_0 = arith.constant 0 : i32
    %c0_i32_1 = arith.constant 0 : i32
    return %c0_i32, %c0_i32_0 : i32, i32
  }
  func.func @transform_3(%arg0: i32) -> (i32, i32) {
    %c0_i32 = arith.constant 0 : i32
    %c0_i32_0 = arith.constant 0 : i32
    return %arg0, %c0_i32 : i32, i32
  }
}

</mosaic_0001>

<bundles_post_ra>
// kernel: fpn_top_blocks.3
= control target key start
LH: loop header
LB: loop body
LE: loop exit
PB: predicated region body
PF: predicated region fallthrough
CT: control target
= control target key end

     0   :  { %s2994_s1 = inlined_call_operand.vmem [shape: f32[9,128,128], index: 1, kind: input, shape index: {}]   ;;  %s2995_s0 = inlined_call_operand.vmem [shape: f32[288,128], index: 0, kind: input, shape index: {}]   ;;  %s2996_s2 = inlined_call_operand.vmem [shape: f32[1,128], index: 2, kind: input, shape index: {}]   ;;  %s2997_s3 = inlined_call_operand.vmem [shape: f32[64,128], index: 3, kind: output, shape index: {}]  }
   0x1   :  { %v39_v0 = vld [vmem:[%s2994_s1 + $0x78] sm:$0xff]  ;;  %v38_v2 = vld [vmem:[%s2994_s1 + $0x70] sm:$0xff]  ;;  %v37_v4 = vld [vmem:[%s2994_s1 + $0x68] sm:$0xff] }
   0x2   :  { %v1467_v1 = vld [vmem:[%s2994_s1 + $0xf8] sm:$0xff]  ;;  %1853 = vmatprep.subr.mxu0 %v39_v0  ;;  %v1466_v3 = vld [vmem:[%s2994_s1 + $0xf0] sm:$0xff]  ;;  %v1465_v5 = vld [vmem:[%s2994_s1 + $0xe8] sm:$0xff] }
   0x3   :  { %1897 = vmatprep.subr.mxu1 %v1467_v1  ;;  %1854 = vmatpush3.msra.mxu0 %v39_v0  ;;  %v36_v6 = vld [vmem:[%s2994_s1 + $0x60] sm:$0xff]  ;;  %v35_v8 = vld [vmem:[%s2994_s1 + $0x58] sm:$0xff]  ;;  %v34_v10 = vld [vmem:[%s2994_s1 + $0x50] sm:$0xff] }
   0x4   :  { %1898 = vmatpush3.msra.mxu1 %v1467_v1  ;;  %1855 = vmatprep.subr.mxu0 %v38_v2  ;;  %v1464_v7 = vld [vmem:[%s2994_s1 + $0xe0] sm:$0xff]  ;;  %v1463_v9 = vld [vmem:[%s2994_s1 + $0xd8] sm:$0xff]  ;;  %v1462_v11 = vld [vmem:[%s2994_s1 + $0xd0] sm:$0xff] }
   0x5   :  { %1899 = vmatprep.subr.mxu1 %v1466_v3  ;;  %1856 = vmatpush3.msra.mxu0 %v38_v2  ;;  %v33_v12 = vld [vmem:[%s2994_s1 + $0x48] sm:$0xff]  ;;  %v32_v14 = vld [vmem:[%s2994_s1 + $0x40] sm:$0xff]  ;;  %v31_v16 = vld [vmem:[%s2994_s1 + $0x38] sm:$0xff] }
   0x6   :  { %1900 = vmatpush3.msra.mxu1 %v1466_v3  ;;  %1857 = vmatprep.subr.mxu0 %v37_v4  ;;  %v1461_v13 = vld [vmem:[%s2994_s1 + $0xc8] sm:$0xff]  ;;  %v1460_v15 = vld [vmem:[%s2994_s1 + $0xc0] sm:$0xff]  ;;  %v1459_v17 = vld [vmem:[%s2994_s1 + $0xb8] sm:$0xff] }
   0x7   :  { %1901 = vmatprep.subr.mxu1 %v1465_v5  ;;  %1858 = vmatpush3.msra.mxu0 %v37_v4  ;;  %v30_v18 = vld [vmem:[%s2994_s1 + $0x30] sm:$0xff]  ;;  %v29_v20 = vld [vmem:[%s2994_s1 + $0x28] sm:$0xff]  ;;  %v28_v22 = vld [vmem:[%s2994_s1 + $0x20] sm:$0xff] }
   0x8   :  { %1902 = vmatpush3.msra.mxu1 %v1465_v5  ;;  %1859 = vmatprep.subr.mxu0 %v36_v6  ;;  %v1458_v19 = vld [vmem:[%s2994_s1 + $0xb0] sm:$0xff]  ;;  %v1457_v21 = vld [vmem:[%s2994_s1 + $0xa8] sm:$0xff]  ;;  %v1456_v23 = vld [vmem:[%s2994_s1 + $0xa0] sm:$0xff] }
   0x9   :  { %1903 = vmatprep.subr.mxu1 %v1464_v7  ;;  %1860 = vmatpush3.msra.mxu0 %v36_v6  ;;  %v27_v24 = vld [vmem:[%s2994_s1 + $0x18] sm:$0xff]  ;;  %v26_v26 = vld [vmem:[%s2994_s1 + $0x10] sm:$0xff]  ;;  %v25_v28 = vld [vmem:[%s2994_s1 + $0x8] sm:$0xff] }
   0xa   :  { %1904 = vmatpush3.msra.mxu1 %v1464_v7  ;;  %1861 = vmatprep.subr.mxu0 %v35_v8  ;;  %v1455_v25 = vld [vmem:[%s2994_s1 + $0x98] sm:$0xff]  ;;  %v1454_v27 = vld [vmem:[%s2994_s1 + $0x90] sm:$0xff]  ;;  %v1453_v29 = vld [vmem:[%s2994_s1 + $0x88] sm:$0xff] }
   0xb   :  { %1905 = vmatprep.subr.mxu1 %v1463_v9  ;;  %1862 = vmatpush3.msra.mxu0 %v35_v8  ;;  %v24_v30 = vld [vmem:[%s2994_s1] sm:$0xff]  ;;  %v1444_v33 = vld [vmem:[%s2995_s0 + $0x48] sm:$0xff]  ;;  %v1445_v35 = vld [vmem:[%s2995_s0 + $0x50] sm:$0xff] }
   0xc   :  { %1906 = vmatpush3.msra.mxu1 %v1463_v9  ;;  %1863 = vmatprep.subr.mxu0 %v34_v10  ;;  %v1452_v31 = vld [vmem:[%s2994_s1 + $0x80] sm:$0xff]  ;;  %v17_v34 = vld [vmem:[%s2995_s0 + $0x8] sm:$0xff]  ;;  %v1491_v36 = vld [vmem:[%s2994_s1 + $0x178] sm:$0xff] }
   0xd   :  { %1907 = vmatprep.subr.mxu1 %v1462_v11  ;;  %1864 = vmatpush3.msra.mxu0 %v34_v10  ;;  %v16_v32 = vld [vmem:[%s2995_s0] sm:$0xff]  ;;  %v1515_v37 = vld [vmem:[%s2994_s1 + $0x1f8] sm:$0xff]  ;;  %v1490_v38 = vld [vmem:[%s2994_s1 + $0x170] sm:$0xff] }
   0xe   :  { %1908 = vmatpush3.msra.mxu1 %v1462_v11  ;;  %1865 = vmatprep.subr.mxu0 %v33_v12  ;;  %v1514_v39 = vld [vmem:[%s2994_s1 + $0x1f0] sm:$0xff]  ;;  %v1489_v40 = vld [vmem:[%s2994_s1 + $0x168] sm:$0xff]  ;;  %v1488_v42 = vld [vmem:[%s2994_s1 + $0x160] sm:$0xff] }
   0xf   :  { %1909 = vmatprep.subr.mxu1 %v1461_v13  ;;  %1866 = vmatpush3.msra.mxu0 %v33_v12  ;;  %v1513_v41 = vld [vmem:[%s2994_s1 + $0x1e8] sm:$0xff]  ;;  %v1512_v43 = vld [vmem:[%s2994_s1 + $0x1e0] sm:$0xff]  ;;  %v1487_v44 = vld [vmem:[%s2994_s1 + $0x158] sm:$0xff] }
  0x10   :  { %1910 = vmatpush3.msra.mxu1 %v1461_v13  ;;  %1867 = vmatprep.subr.mxu0 %v32_v14  ;;  %v1511_v45 = vld [vmem:[%s2994_s1 + $0x1d8] sm:$0xff]  ;;  %v1486_v46 = vld [vmem:[%s2994_s1 + $0x150] sm:$0xff]  ;;  %v1485_v48 = vld [vmem:[%s2994_s1 + $0x148] sm:$0xff] }
  0x11   :  { %1911 = vmatprep.subr.mxu1 %v1460_v15  ;;  %1868 = vmatpush3.msra.mxu0 %v32_v14  ;;  %v1510_v47 = vld [vmem:[%s2994_s1 + $0x1d0] sm:$0xff]  ;;  %v1509_v49 = vld [vmem:[%s2994_s1 + $0x1c8] sm:$0xff]  ;;  %v1484_v50 = vld [vmem:[%s2994_s1 + $0x140] sm:$0xff] }
  0x12   :  { %1912 = vmatpush3.msra.mxu1 %v1460_v15  ;;  %1869 = vmatprep.subr.mxu0 %v31_v16  ;;  %v1508_v51 = vld [vmem:[%s2994_s1 + $0x1c0] sm:$0xff]  ;;  %v1483_v52 = vld [vmem:[%s2994_s1 + $0x138] sm:$0xff]  ;;  %v18_v54 = vld [vmem:[%s2995_s0 + $0x10] sm:$0xff] }
  0x13   :  { %1913 = vmatprep.subr.mxu1 %v1459_v17  ;;  %1870 = vmatpush3.msra.mxu0 %v31_v16  ;;  %v1507_v53 = vld [vmem:[%s2994_s1 + $0x1b8] sm:$0xff]  ;;  %v1482_v56 = vld [vmem:[%s2994_s1 + $0x130] sm:$0xff]  ;;  %v1447_v59 = vld [vmem:[%s2995_s0 + $0x60] sm:$0xff] }
  0x14   :  { %1914 = vmatpush3.msra.mxu1 %v1459_v17  ;;  %1871 = vmatprep.subr.mxu0 %v30_v18  ;;  %v1446_v55 = vld [vmem:[%s2995_s0 + $0x58] sm:$0xff]  ;;  %v1506_v57 = vld [vmem:[%s2994_s1 + $0x1b0] sm:$0xff]  ;;  %v1481_v60 = vld [vmem:[%s2994_s1 + $0x128] sm:$0xff] }
  0x15   :  { %1915 = vmatprep.subr.mxu1 %v1458_v19  ;;  %1872 = vmatpush3.msra.mxu0 %v30_v18  ;;  %v19_v58 = vld [vmem:[%s2995_s0 + $0x18] sm:$0xff]  ;;  %v1505_v61 = vld [vmem:[%s2994_s1 + $0x1a8] sm:$0xff]  ;;  %v20_v62 = vld [vmem:[%s2995_s0 + $0x20] sm:$0xff] }
  0x16   :  { %1916 = vmatpush3.msra.mxu1 %v1458_v19  ;;  %1873 = vmatprep.subr.mxu0 %v29_v20  ;;  %v1448_v63 = vld [vmem:[%s2995_s0 + $0x68] sm:$0xff]  ;;  %v1480_v0 = vld [vmem:[%s2994_s1 + $0x120] sm:$0xff]  ;;  %v1449_v3 = vld [vmem:[%s2995_s0 + $0x70] sm:$0xff] }
  0x17   :  { %1917 = vmatprep.subr.mxu1 %v1457_v21  ;;  %1874 = vmatpush3.msra.mxu0 %v29_v20  ;;  %v1504_v1 = vld [vmem:[%s2994_s1 + $0x1a0] sm:$0xff]  ;;  %v21_v2 = vld [vmem:[%s2995_s0 + $0x28] sm:$0xff]  ;;  %v1479_v4 = vld [vmem:[%s2994_s1 + $0x118] sm:$0xff] }
  0x18   :  { %1918 = vmatpush3.msra.mxu1 %v1457_v21  ;;  %1875 = vmatprep.subr.mxu0 %v28_v22  ;;  %v1503_v5 = vld [vmem:[%s2994_s1 + $0x198] sm:$0xff]  ;;  %v22_v6 = vld [vmem:[%s2995_s0 + $0x30] sm:$0xff]  ;;  %v1451_v11 = vld [vmem:[%s2995_s0 + $0x80] sm:$0xff] }
  0x19   :  { %1919 = vmatprep.subr.mxu1 %v1456_v23  ;;  %1876 = vmatpush3.msra.mxu0 %v28_v22  ;;  %v1450_v7 = vld [vmem:[%s2995_s0 + $0x78] sm:$0xff]  ;;  %v1478_v8 = vld [vmem:[%s2994_s1 + $0x110] sm:$0xff]  ;;  %v1477_v12 = vld [vmem:[%s2994_s1 + $0x108] sm:$0xff] }
  0x1a   :  { %1920 = vmatpush3.msra.mxu1 %v1456_v23  ;;  %1877 = vmatprep.subr.mxu0 %v27_v24  ;;  %v1502_v9 = vld [vmem:[%s2994_s1 + $0x190] sm:$0xff]  ;;  %v23_v10 = vld [vmem:[%s2995_s0 + $0x38] sm:$0xff]  ;;  %v1501_v13 = vld [vmem:[%s2994_s1 + $0x188] sm:$0xff] }
  0x1b   :  { %1921 = vmatprep.subr.mxu1 %v1455_v25  ;;  %1878 = vmatpush3.msra.mxu0 %v27_v24  ;;  %v1476_v14 = vld [vmem:[%s2994_s1 + $0x100] sm:$0xff]  ;;  %v1492_v17 = vld [vmem:[%s2995_s0 + $0x90] sm:$0xff]  ;;  %v1493_v19 = vld [vmem:[%s2995_s0 + $0x98] sm:$0xff] }
  0x1c   :  { %1922 = vmatpush3.msra.mxu1 %v1455_v25  ;;  %1879 = vmatprep.subr.mxu0 %v26_v26  ;;  %v1500_v15 = vld [vmem:[%s2994_s1 + $0x180] sm:$0xff]  ;;  %v1469_v18 = vld [vmem:[%s2995_s0 + $0x9] sm:$0xff]  ;;  %v1539_v20 = vld [vmem:[%s2994_s1 + $0x278] sm:$0xff] }
  0x1d   :  { %1923 = vmatprep.subr.mxu1 %v1454_v27  ;;  %1880 = vmatpush3.msra.mxu0 %v26_v26  ;;  %v1468_v16 = vld [vmem:[%s2995_s0 + $0x1] sm:$0xff]  ;;  %v1563_v21 = vld [vmem:[%s2994_s1 + $0x2f8] sm:$0xff]  ;;  %v1538_v22 = vld [vmem:[%s2994_s1 + $0x270] sm:$0xff] }
  0x1e   :  { %1924 = vmatpush3.msra.mxu1 %v1454_v27  ;;  %1881 = vmatprep.subr.mxu0 %v25_v28  ;;  %v1562_v23 = vld [vmem:[%s2994_s1 + $0x2f0] sm:$0xff]  ;;  %v1471_v25 = vld [vmem:[%s2995_s0 + $0x19] sm:$0xff]  ;;  %v1537_v26 = vld [vmem:[%s2994_s1 + $0x268] sm:$0xff] }
  0x1f   :  { %1925 = vmatprep.subr.mxu1 %v1453_v29  ;;  %1882 = vmatpush3.msra.mxu0 %v25_v28  ;;  %v1470_v24 = vld [vmem:[%s2995_s0 + $0x11] sm:$0xff]  ;;  %v1561_v27 = vld [vmem:[%s2994_s1 + $0x2e8] sm:$0xff]  ;;  %v1494_v28 = vld [vmem:[%s2995_s0 + $0xa0] sm:$0xff] }
  0x20   :  { %1926 = vmatpush3.msra.mxu1 %v1453_v29  ;;  %1883 = vmatprep.subr.mxu0 %v24_v30  ;;  %v1536_v29 = vld [vmem:[%s2994_s1 + $0x260] sm:$0xff] }
  0x21   :  { %1927 = vmatprep.subr.mxu1 %v1452_v31  ;;  %1884 = vmatpush3.msra.mxu0 %v24_v30  ;;  %v1495_v30 = vld [vmem:[%s2995_s0 + $0xa8] sm:$0xff] }
  0x22   :  { %1885 = vmatprep.mubr.f32.mxu0 %v16_v32  ;;  %1928 = vmatpush3.msra.mxu1 %v1452_v31  ;;  %v1560_v31 = vld [vmem:[%s2994_s1 + $0x2e0] sm:$0xff] }
  0x23   :  { %1929 = vmatprep.mubr.f32.mxu1 %v1444_v33  ;;  %1886 = vmatmul.mubr.f32.vlgmr.msra.gmra.mxu0 %v17_v34  ;;  %v1472_v32 = vld [vmem:[%s2995_s0 + $0x21] sm:$0xff]  ;;  %v1473_v33 = vld [vmem:[%s2995_s0 + $0x29] sm:$0xff]  ;;  %v1535_v34 = vld [vmem:[%s2994_s1 + $0x258] sm:$0xff] }
  0x24   :  { %1930 = vmatmul.mubr.f32.vlgmr.msra.gmra.mxu1 %v1445_v35  ;;  %1941 = vmatprep.subr.mxu0 %v1491_v36  ;;  %v1559_v35 = vld [vmem:[%s2994_s1 + $0x2d8] sm:$0xff] }
  0x25   :  { %1985 = vmatprep.subr.mxu1 %v1515_v37  ;;  %1942 = vmatpush3.msra.mxu0 %v1491_v36  ;;  %v1496_v36 = vld [vmem:[%s2995_s0 + $0xb0] sm:$0xff] }
  0x26   :  { %1986 = vmatpush3.msra.mxu1 %v1515_v37  ;;  %1943 = vmatprep.subr.mxu0 %v1490_v38  ;;  %v1534_v37 = vld [vmem:[%s2994_s1 + $0x250] sm:$0xff] }
  0x27   :  { %1987 = vmatprep.subr.mxu1 %v1514_v39  ;;  %1944 = vmatpush3.msra.mxu0 %v1490_v38  ;;  %v1497_v38 = vld [vmem:[%s2995_s0 + $0xb8] sm:$0xff] }
  0x28   :  { %1988 = vmatpush3.msra.mxu1 %v1514_v39  ;;  %1945 = vmatprep.subr.mxu0 %v1489_v40  ;;  %v1558_v39 = vld [vmem:[%s2994_s1 + $0x2d0] sm:$0xff] }
  0x29   :  { %1989 = vmatprep.subr.mxu1 %v1513_v41  ;;  %1946 = vmatpush3.msra.mxu0 %v1489_v40  ;;  %v1474_v40 = vld [vmem:[%s2995_s0 + $0x31] sm:$0xff] }
  0x2a   :  { %1990 = vmatpush3.msra.mxu1 %v1513_v41  ;;  %1947 = vmatprep.subr.mxu0 %v1488_v42  ;;  %v1475_v41 = vld [vmem:[%s2995_s0 + $0x39] sm:$0xff] }
  0x2b   :  { %1991 = vmatprep.subr.mxu1 %v1512_v43  ;;  %1948 = vmatpush3.msra.mxu0 %v1488_v42  ;;  %v1533_v42 = vld [vmem:[%s2994_s1 + $0x248] sm:$0xff] }
  0x2c   :  { %1992 = vmatpush3.msra.mxu1 %v1512_v43  ;;  %1949 = vmatprep.subr.mxu0 %v1487_v44  ;;  %v1557_v43 = vld [vmem:[%s2994_s1 + $0x2c8] sm:$0xff] }
  0x2d   :  { %1993 = vmatprep.subr.mxu1 %v1511_v45  ;;  %1950 = vmatpush3.msra.mxu0 %v1487_v44  ;;  %v1498_v44 = vld [vmem:[%s2995_s0 + $0xc0] sm:$0xff] }
  0x2e   :  { %1994 = vmatpush3.msra.mxu1 %v1511_v45  ;;  %1951 = vmatprep.subr.mxu0 %v1486_v46  ;;  %v1532_v45 = vld [vmem:[%s2994_s1 + $0x240] sm:$0xff] }
  0x2f   :  { %1995 = vmatprep.subr.mxu1 %v1510_v47  ;;  %1952 = vmatpush3.msra.mxu0 %v1486_v46  ;;  %v1499_v46 = vld [vmem:[%s2995_s0 + $0xc8] sm:$0xff] }
  0x30   :  { %1996 = vmatpush3.msra.mxu1 %v1510_v47  ;;  %1953 = vmatprep.subr.mxu0 %v1485_v48  ;;  %v1556_v47 = vld [vmem:[%s2994_s1 + $0x2c0] sm:$0xff] }
  0x31   :  { %1997 = vmatprep.subr.mxu1 %v1509_v49  ;;  %1954 = vmatpush3.msra.mxu0 %v1485_v48  ;;  %v1531_v48 = vld [vmem:[%s2994_s1 + $0x238] sm:$0xff] }
  0x32   :  { %1998 = vmatpush3.msra.mxu1 %v1509_v49  ;;  %1955 = vmatprep.subr.mxu0 %v1484_v50  ;;  %v1555_v49 = vld [vmem:[%s2994_s1 + $0x2b8] sm:$0xff] }
  0x33   :  { %1999 = vmatprep.subr.mxu1 %v1508_v51  ;;  %1956 = vmatpush3.msra.mxu0 %v1484_v50  ;;  %v1530_v50 = vld [vmem:[%s2994_s1 + $0x230] sm:$0xff] }
  0x34   :  { %2000 = vmatpush3.msra.mxu1 %v1508_v51  ;;  %1957 = vmatprep.subr.mxu0 %v1483_v52  ;;  %v1554_v51 = vld [vmem:[%s2994_s1 + $0x2b0] sm:$0xff] }
  0x35   :  { %2001 = vmatprep.subr.mxu1 %v1507_v53  ;;  %1958 = vmatpush3.msra.mxu0 %v1483_v52  ;;  %v1529_v52 = vld [vmem:[%s2994_s1 + $0x228] sm:$0xff] }
  0x36   :  { %2002 = vmatpush3.msra.mxu1 %v1507_v53  ;;  %1888 = vmatprep.mubr.f32.mxu0 %v18_v54  ;;  %v1553_v53 = vld [vmem:[%s2994_s1 + $0x2a8] sm:$0xff]  ;;  %v1528_v54 = vld [vmem:[%s2994_s1 + $0x220] sm:$0xff] }
  0x37   :  { %1932 = vmatprep.mubr.f32.mxu1 %v1446_v55  ;;  %1959 = vmatprep.subr.mxu0 %v1482_v56  ;;  %v1552_v55 = vld [vmem:[%s2994_s1 + $0x2a0] sm:$0xff] }
  0x38   :  { %2003 = vmatprep.subr.mxu1 %v1506_v57  ;;  %1889 = vmatmul.mubr.f32.gmra.mxu0 %v19_v58  ;;  %v1526_v58 = vld [vmem:[%s2994_s1 + $0x210] sm:$0xff] }
  0x39   :  { %1933 = vmatmul.mubr.f32.gmra.mxu1 %v1447_v59  ;;  %1960 = vmatpush3.msra.mxu0 %v1482_v56  ;;  %v1527_v56 = vld [vmem:[%s2994_s1 + $0x218] sm:$0xff]  ;;  %v1550_v59 = vld [vmem:[%s2994_s1 + $0x290] sm:$0xff] }
  0x3a   :  { %2004 = vmatpush3.msra.mxu1 %v1506_v57  ;;  %1961 = vmatprep.subr.mxu0 %v1481_v60  ;;  %v1551_v57 = vld [vmem:[%s2994_s1 + $0x298] sm:$0xff] }
  0x3b   :  { %2005 = vmatprep.subr.mxu1 %v1505_v61  ;;  %1962 = vmatpush3.msra.mxu0 %v1481_v60  ;;  %v1525_v60 = vld [vmem:[%s2994_s1 + $0x208] sm:$0xff] }
  0x3c   :  { %2006 = vmatpush3.msra.mxu1 %v1505_v61  ;;  %1891 = vmatprep.mubr.f32.mxu0 %v20_v62  ;;  %v1549_v61 = vld [vmem:[%s2994_s1 + $0x288] sm:$0xff]  ;;  %v1524_v62 = vld [vmem:[%s2994_s1 + $0x200] sm:$0xff] }
  0x3d   :  { %1935 = vmatprep.mubr.f32.mxu1 %v1448_v63  ;;  %1963 = vmatprep.subr.mxu0 %v1480_v0  ;;  %v1548_v63 = vld [vmem:[%s2994_s1 + $0x280] sm:$0xff] }
  0x3e   :  { %2007 = vmatprep.subr.mxu1 %v1504_v1  ;;  %1892 = vmatmul.mubr.f32.gmra.mxu0 %v21_v2  ;;  %v1517_v2 = vld [vmem:[%s2995_s0 + $0xe0] sm:$0xff] }
  0x3f   :  { %1936 = vmatmul.mubr.f32.gmra.mxu1 %v1449_v3  ;;  %1964 = vmatpush3.msra.mxu0 %v1480_v0  ;;  %v1516_v0 = vld [vmem:[%s2995_s0 + $0xd8] sm:$0xff] }
  0x40   :  { %2008 = vmatpush3.msra.mxu1 %v1504_v1  ;;  %1965 = vmatprep.subr.mxu0 %v1479_v4  ;;  %v1540_v1 = vld [vmem:[%s2995_s0 + $0x91] sm:$0xff]  ;;  %v1541_v3 = vld [vmem:[%s2995_s0 + $0x99] sm:$0xff] }
  0x41   :  { %2009 = vmatprep.subr.mxu1 %v1503_v5  ;;  %1966 = vmatpush3.msra.mxu0 %v1479_v4  ;;  %v1587_v4 = vld [vmem:[%s2994_s1 + $0x378] sm:$0xff] }
  0x42   :  { %2010 = vmatpush3.msra.mxu1 %v1503_v5  ;;  %1894 = vmatprep.mubr.f32.mxu0 %v22_v6  ;;  %v1611_v5 = vld [vmem:[%s2994_s1 + $0x3f8] sm:$0xff]  ;;  %v1586_v6 = vld [vmem:[%s2994_s1 + $0x370] sm:$0xff] }
  0x43   :  { %1938 = vmatprep.mubr.f32.mxu1 %v1450_v7  ;;  %1967 = vmatprep.subr.mxu0 %v1478_v8  ;;  %v1610_v7 = vld [vmem:[%s2994_s1 + $0x3f0] sm:$0xff] }
  0x44   :  { %2011 = vmatprep.subr.mxu1 %v1502_v9  ;;  %1895 = vmatmul.mubr.f32.gmra.mxu0 %v23_v10  ;;  %v1585_v10 = vld [vmem:[%s2994_s1 + $0x368] sm:$0xff] }
  0x45   :  { %1939 = vmatmul.mubr.f32.gmra.mxu1 %v1451_v11  ;;  %1968 = vmatpush3.msra.mxu0 %v1478_v8  ;;  %v1518_v8 = vld [vmem:[%s2995_s0 + $0xe8] sm:$0xff] }
  0x46   :  { %2012 = vmatpush3.msra.mxu1 %v1502_v9  ;;  %1969 = vmatprep.subr.mxu0 %v1477_v12  ;;  %v1519_v9 = vld [vmem:[%s2995_s0 + $0xf0] sm:$0xff]  ;;  %v1609_v11 = vld [vmem:[%s2994_s1 + $0x3e8] sm:$0xff] }
  0x47   :  { %2013 = vmatprep.subr.mxu1 %v1501_v13  ;;  %1970 = vmatpush3.msra.mxu0 %v1477_v12  ;;  %v1542_v12 = vld [vmem:[%s2995_s0 + $0xa1] sm:$0xff] }
  0x48   :  { %2014 = vmatpush3.msra.mxu1 %v1501_v13  ;;  %1971 = vmatprep.subr.mxu0 %v1476_v14  ;;  %v1584_v13 = vld [vmem:[%s2994_s1 + $0x360] sm:$0xff] }
  0x49   :  { %2015 = vmatprep.subr.mxu1 %v1500_v15  ;;  %1972 = vmatpush3.msra.mxu0 %v1476_v14  ;;  %v1543_v14 = vld [vmem:[%s2995_s0 + $0xa9] sm:$0xff] }
  0x4a   :  { %1973 = vmatprep.mubr.f32.mxu0 %v1468_v16  ;;  %2016 = vmatpush3.msra.mxu1 %v1500_v15  ;;  %v1608_v15 = vld [vmem:[%s2994_s1 + $0x3e0] sm:$0xff]  ;;  %v1520_v16 = vld [vmem:[%s2995_s0 + $0xf8] sm:$0xff] }
  0x4b   :  { %2017 = vmatprep.mubr.f32.mxu1 %v1492_v17  ;;  %1974 = vmatmul.mubr.f32.vlgmr.msra.gmra.mxu0 %v1469_v18  ;;  %v1521_v17 = vld [vmem:[%s2995_s0 + $0x100] sm:$0xff]  ;;  %v1583_v18 = vld [vmem:[%s2994_s1 + $0x358] sm:$0xff] }
  0x4c   :  { %2018 = vmatmul.mubr.f32.vlgmr.msra.gmra.mxu1 %v1493_v19  ;;  %2029 = vmatprep.subr.mxu0 %v1539_v20  ;;  %v1607_v19 = vld [vmem:[%s2994_s1 + $0x3d8] sm:$0xff] }
  0x4d   :  { %2073 = vmatprep.subr.mxu1 %v1563_v21  ;;  %2030 = vmatpush3.msra.mxu0 %v1539_v20  ;;  %v1544_v20 = vld [vmem:[%s2995_s0 + $0xb1] sm:$0xff] }
  0x4e   :  { %2074 = vmatpush3.msra.mxu1 %v1563_v21  ;;  %2031 = vmatprep.subr.mxu0 %v1538_v22  ;;  %v1582_v21 = vld [vmem:[%s2994_s1 + $0x350] sm:$0xff] }
  0x4f   :  { %2075 = vmatprep.subr.mxu1 %v1562_v23  ;;  %1976 = vmatprep.mubr.f32.mxu0 %v1470_v24  ;;  %v1522_v24 = vld [vmem:[%s2995_s0 + $0x108] sm:$0xff] }
  0x50   :  { %2032 = vmatpush3.msra.mxu0 %v1538_v22  ;;  %2076 = vmatpush3.msra.mxu1 %v1562_v23  ;;  %v1545_v22 = vld [vmem:[%s2995_s0 + $0xb9] sm:$0xff]  ;;  %v1606_v23 = vld [vmem:[%s2994_s1 + $0x3d0] sm:$0xff] }
  0x51   :  { %1977 = vmatmul.mubr.f32.gmra.mxu0 %v1471_v25  ;;  %2033 = vmatprep.subr.mxu0 %v1537_v26  ;;  %v1523_v25 = vld [vmem:[%s2995_s0 + $0x110] sm:$0xff] }
  0x52   :  { %2077 = vmatprep.subr.mxu1 %v1561_v27  ;;  %2020 = vmatprep.mubr.f32.mxu1 %v1494_v28  ;;  %v1546_v28 = vld [vmem:[%s2995_s0 + $0xc1] sm:$0xff] }
  0x53   :  { %2034 = vmatpush3.msra.mxu0 %v1537_v26  ;;  %2078 = vmatpush3.msra.mxu1 %v1561_v27  ;;  %v1581_v26 = vld [vmem:[%s2994_s1 + $0x348] sm:$0xff] }
  0x54   :  { %2035 = vmatprep.subr.mxu0 %v1536_v29  ;;  %2021 = vmatmul.mubr.f32.gmra.mxu1 %v1495_v30  ;;  %v1605_v27 = vld [vmem:[%s2994_s1 + $0x3c8] sm:$0xff] }
  0x55   :  { %2079 = vmatprep.subr.mxu1 %v1560_v31  ;;  %1979 = vmatprep.mubr.f32.mxu0 %v1472_v32  ;;  %v1547_v30 = vld [vmem:[%s2995_s0 + $0xc9] sm:$0xff]  ;;  %v1579_v32 = vld [vmem:[%s2994_s1 + $0x338] sm:$0xff] }
  0x56   :  { %2036 = vmatpush3.msra.mxu0 %v1536_v29  ;;  %2080 = vmatpush3.msra.mxu1 %v1560_v31  ;;  %v1580_v29 = vld [vmem:[%s2994_s1 + $0x340] sm:$0xff] }
  0x57   :  { %1980 = vmatmul.mubr.f32.gmra.mxu0 %v1473_v33  ;;  %2037 = vmatprep.subr.mxu0 %v1535_v34  ;;  %v1604_v31 = vld [vmem:[%s2994_s1 + $0x3c0] sm:$0xff]  ;;  %v1603_v33 = vld [vmem:[%s2994_s1 + $0x3b8] sm:$0xff] }
  0x58   :  { %2081 = vmatprep.subr.mxu1 %v1559_v35  ;;  %2023 = vmatprep.mubr.f32.mxu1 %v1496_v36  ;;  %v1577_v36 = vld [vmem:[%s2994_s1 + $0x328] sm:$0xff] }
  0x59   :  { %2038 = vmatpush3.msra.mxu0 %v1535_v34  ;;  %2082 = vmatpush3.msra.mxu1 %v1559_v35  ;;  %v1578_v34 = vld [vmem:[%s2994_s1 + $0x330] sm:$0xff] }
  0x5a   :  { %2039 = vmatprep.subr.mxu0 %v1534_v37  ;;  %2024 = vmatmul.mubr.f32.gmra.mxu1 %v1497_v38  ;;  %v1602_v35 = vld [vmem:[%s2994_s1 + $0x3b0] sm:$0xff]  ;;  %v1576_v38 = vld [vmem:[%s2994_s1 + $0x320] sm:$0xff] }
  0x5b   :  { %2083 = vmatprep.subr.mxu1 %v1558_v39  ;;  %1982 = vmatprep.mubr.f32.mxu0 %v1474_v40  ;;  %v1575_v40 = vld [vmem:[%s2994_s1 + $0x318] sm:$0xff] }
  0x5c   :  { %2040 = vmatpush3.msra.mxu0 %v1534_v37  ;;  %2084 = vmatpush3.msra.mxu1 %v1558_v39  ;;  %v1601_v37 = vld [vmem:[%s2994_s1 + $0x3a8] sm:$0xff]  ;;  %v1600_v39 = vld [vmem:[%s2994_s1 + $0x3a0] sm:$0xff] }
  0x5d   :  { %1983 = vmatmul.mubr.f32.gmra.mxu0 %v1475_v41  ;;  %2041 = vmatprep.subr.mxu0 %v1533_v42  ;;  %v1599_v41 = vld [vmem:[%s2994_s1 + $0x398] sm:$0xff] }
  0x5e   :  { %2085 = vmatprep.subr.mxu1 %v1557_v43  ;;  %2026 = vmatprep.mubr.f32.mxu1 %v1498_v44  ;;  %v1573_v44 = vld [vmem:[%s2994_s1 + $0x308] sm:$0xff] }
  0x5f   :  { %2042 = vmatpush3.msra.mxu0 %v1533_v42  ;;  %2086 = vmatpush3.msra.mxu1 %v1557_v43  ;;  %v1574_v42 = vld [vmem:[%s2994_s1 + $0x310] sm:$0xff] }
  0x60   :  { %2043 = vmatprep.subr.mxu0 %v1532_v45  ;;  %2027 = vmatmul.mubr.f32.gmra.mxu1 %v1499_v46  ;;  %v1598_v43 = vld [vmem:[%s2994_s1 + $0x390] sm:$0xff]  ;;  %v1572_v46 = vld [vmem:[%s2994_s1 + $0x300] sm:$0xff] }
  0x61   :  { %2087 = vmatprep.subr.mxu1 %v1556_v47  ;;  %2044 = vmatpush3.msra.mxu0 %v1532_v45  ;;  %v1597_v45 = vld [vmem:[%s2994_s1 + $0x388] sm:$0xff] }
  0x62   :  { %2088 = vmatpush3.msra.mxu1 %v1556_v47  ;;  %2045 = vmatprep.subr.mxu0 %v1531_v48  ;;  %v1596_v47 = vld [vmem:[%s2994_s1 + $0x380] sm:$0xff] }
  0x63   :  { %2089 = vmatprep.subr.mxu1 %v1555_v49  ;;  %2046 = vmatpush3.msra.mxu0 %v1531_v48  ;;  %v1564_v48 = vld [vmem:[%s2995_s0 + $0x5] sm:$0xff] }
  0x64   :  { %2090 = vmatpush3.msra.mxu1 %v1555_v49  ;;  %2047 = vmatprep.subr.mxu0 %v1530_v50  ;;  %v1588_v49 = vld [vmem:[%s2995_s0 + $0x4d] sm:$0xff] }
  0x65   :  { %2091 = vmatprep.subr.mxu1 %v1554_v51  ;;  %2048 = vmatpush3.msra.mxu0 %v1530_v50  ;;  %v1565_v50 = vld [vmem:[%s2995_s0 + $0xd] sm:$0xff] }
  0x66   :  { %2092 = vmatpush3.msra.mxu1 %v1554_v51  ;;  %2049 = vmatprep.subr.mxu0 %v1529_v52  ;;  %v1589_v51 = vld [vmem:[%s2995_s0 + $0x55] sm:$0xff] }
  0x67   :  { %2093 = vmatprep.subr.mxu1 %v1553_v53  ;;  %2050 = vmatpush3.msra.mxu0 %v1529_v52  ;;  %v1635_v52 = vld [vmem:[%s2994_s1 + $0x478] sm:$0xff] }
  0x68   :  { %2094 = vmatpush3.msra.mxu1 %v1553_v53  ;;  %2051 = vmatprep.subr.mxu0 %v1528_v54  ;;  %v1634_v53 = vld [vmem:[%s2994_s1 + $0x470] sm:$0xff] }
  0x69   :  { %2095 = vmatprep.subr.mxu1 %v1552_v55  ;;  %2052 = vmatpush3.msra.mxu0 %v1528_v54  ;;  %v1566_v54 = vld [vmem:[%s2995_s0 + $0x15] sm:$0xff] }
  0x6a   :  { %2096 = vmatpush3.msra.mxu1 %v1552_v55  ;;  %2053 = vmatprep.subr.mxu0 %v1527_v56  ;;  %v1567_v55 = vld [vmem:[%s2995_s0 + $0x1d] sm:$0xff] }
  0x6b   :  { %2097 = vmatprep.subr.mxu1 %v1551_v57  ;;  %2054 = vmatpush3.msra.mxu0 %v1527_v56  ;;  %v1633_v56 = vld [vmem:[%s2994_s1 + $0x468] sm:$0xff] }
  0x6c   :  { %2098 = vmatpush3.msra.mxu1 %v1551_v57  ;;  %2055 = vmatprep.subr.mxu0 %v1526_v58  ;;  %v1590_v57 = vld [vmem:[%s2995_s0 + $0x5d] sm:$0xff] }
  0x6d   :  { %2099 = vmatprep.subr.mxu1 %v1550_v59  ;;  %2056 = vmatpush3.msra.mxu0 %v1526_v58  ;;  %v1632_v58 = vld [vmem:[%s2994_s1 + $0x460] sm:$0xff] }
  0x6e   :  { %2100 = vmatpush3.msra.mxu1 %v1550_v59  ;;  %2057 = vmatprep.subr.mxu0 %v1525_v60  ;;  %v1591_v59 = vld [vmem:[%s2995_s0 + $0x65] sm:$0xff] }
  0x6f   :  { %2101 = vmatprep.subr.mxu1 %v1549_v61  ;;  %2058 = vmatpush3.msra.mxu0 %v1525_v60  ;;  %v1568_v60 = vld [vmem:[%s2995_s0 + $0x25] sm:$0xff] }
  0x70   :  { %2102 = vmatpush3.msra.mxu1 %v1549_v61  ;;  %2059 = vmatprep.subr.mxu0 %v1524_v62  ;;  %v1569_v61 = vld [vmem:[%s2995_s0 + $0x2d] sm:$0xff] }
  0x71   :  { %2103 = vmatprep.subr.mxu1 %v1548_v63  ;;  %2060 = vmatpush3.msra.mxu0 %v1524_v62  ;;  %v1631_v62 = vld [vmem:[%s2994_s1 + $0x458] sm:$0xff] }
  0x72   :  { %2061 = vmatprep.mubr.f32.mxu0 %v1516_v0  ;;  %2104 = vmatpush3.msra.mxu1 %v1548_v63  ;;  %v1592_v63 = vld [vmem:[%s2995_s0 + $0x6d] sm:$0xff] }
  0x73   :  { %2105 = vmatprep.mubr.f32.mxu1 %v1540_v1  ;;  %2062 = vmatmul.mubr.f32.vlgmr.msra.gmra.mxu0 %v1517_v2  ;;  %v1630_v0 = vld [vmem:[%s2994_s1 + $0x450] sm:$0xff] }
  0x74   :  { %2106 = vmatmul.mubr.f32.vlgmr.msra.gmra.mxu1 %v1541_v3  ;;  %2117 = vmatprep.subr.mxu0 %v1587_v4  ;;  %v1593_v1 = vld [vmem:[%s2995_s0 + $0x75] sm:$0xff]  ;;  %v1571_v3 = vld [vmem:[%s2995_s0 + $0x3d] sm:$0xff] }
  0x75   :  { %2161 = vmatprep.subr.mxu1 %v1611_v5  ;;  %2118 = vmatpush3.msra.mxu0 %v1587_v4  ;;  %v1570_v2 = vld [vmem:[%s2995_s0 + $0x35] sm:$0xff]  ;;  %v1629_v4 = vld [vmem:[%s2994_s1 + $0x448] sm:$0xff] }
  0x76   :  { %2162 = vmatpush3.msra.mxu1 %v1611_v5  ;;  %2119 = vmatprep.subr.mxu0 %v1586_v6  ;;  %v1594_v5 = vld [vmem:[%s2995_s0 + $0x7d] sm:$0xff] }
  0x77   :  { %2163 = vmatprep.subr.mxu1 %v1610_v7  ;;  %2064 = vmatprep.mubr.f32.mxu0 %v1518_v8  ;;  %v1627_v8 = vld [vmem:[%s2994_s1 + $0x438] sm:$0xff] }
  0x78   :  { %2120 = vmatpush3.msra.mxu0 %v1586_v6  ;;  %2164 = vmatpush3.msra.mxu1 %v1610_v7  ;;  %v1628_v6 = vld [vmem:[%s2994_s1 + $0x440] sm:$0xff] }
  0x79   :  { %2065 = vmatmul.mubr.f32.gmra.mxu0 %v1519_v9  ;;  %2121 = vmatprep.subr.mxu0 %v1585_v10  ;;  %v1595_v7 = vld [vmem:[%s2995_s0 + $0x85] sm:$0xff]  ;;  %v1626_v9 = vld [vmem:[%s2994_s1 + $0x430] sm:$0xff] }
  0x7a   :  { %2165 = vmatprep.subr.mxu1 %v1609_v11  ;;  %2108 = vmatprep.mubr.f32.mxu1 %v1542_v12  ;;  %v1623_v12 = vld [vmem:[%s2994_s1 + $0x418] sm:$0xff] }
  0x7b   :  { %2122 = vmatpush3.msra.mxu0 %v1585_v10  ;;  %2166 = vmatpush3.msra.mxu1 %v1609_v11  ;;  %v1625_v10 = vld [vmem:[%s2994_s1 + $0x428] sm:$0xff]  ;;  %v1624_v11 = vld [vmem:[%s2994_s1 + $0x420] sm:$0xff] }
  0x7c   :  { %2123 = vmatprep.subr.mxu0 %v1584_v13  ;;  %2109 = vmatmul.mubr.f32.gmra.mxu1 %v1543_v14  ;;  %v1621_v14 = vld [vmem:[%s2994_s1 + $0x408] sm:$0xff] }
  0x7d   :  { %2167 = vmatprep.subr.mxu1 %v1608_v15  ;;  %2067 = vmatprep.mubr.f32.mxu0 %v1520_v16  ;;  %v1612_v16 = vld [vmem:[%s2995_s0 + $0x6] sm:$0xff] }
  0x7e   :  { %2124 = vmatpush3.msra.mxu0 %v1584_v13  ;;  %2168 = vmatpush3.msra.mxu1 %v1608_v15  ;;  %v1622_v13 = vld [vmem:[%s2994_s1 + $0x410] sm:$0xff]  ;;  %v1620_v15 = vld [vmem:[%s2994_s1 + $0x400] sm:$0xff] }
  0x7f   :  { %2068 = vmatmul.mubr.f32.gmra.mxu0 %v1521_v17  ;;  %2125 = vmatprep.subr.mxu0 %v1583_v18  ;;  %v1616_v17 = vld [vmem:[%s2995_s0 + $0x26] sm:$0xff] }
  0x80   :  { %2169 = vmatprep.subr.mxu1 %v1607_v19  ;;  %2111 = vmatprep.mubr.f32.mxu1 %v1544_v20  ;;  %v1614_v20 = vld [vmem:[%s2995_s0 + $0x16] sm:$0xff] }
  0x81   :  { %2126 = vmatpush3.msra.mxu0 %v1583_v18  ;;  %2170 = vmatpush3.msra.mxu1 %v1607_v19  ;;  %v1613_v18 = vld [vmem:[%s2995_s0 + $0xe] sm:$0xff] }
  0x82   :  { %2127 = vmatprep.subr.mxu0 %v1582_v21  ;;  %2112 = vmatmul.mubr.f32.gmra.mxu1 %v1545_v22  ;;  %v1617_v19 = vld [vmem:[%s2995_s0 + $0x2e] sm:$0xff]  ;;  %v1615_v22 = vld [vmem:[%s2995_s0 + $0x1e] sm:$0xff] }
  0x83   :  { %2171 = vmatprep.subr.mxu1 %v1606_v23  ;;  %2070 = vmatprep.mubr.f32.mxu0 %v1522_v24 }
  0x84   :  { %2128 = vmatpush3.msra.mxu0 %v1582_v21  ;;  %2172 = vmatpush3.msra.mxu1 %v1606_v23  ;;  %v1618_v21 = vld [vmem:[%s2995_s0 + $0x36] sm:$0xff]  ;;  %v1619_v23 = vld [vmem:[%s2995_s0 + $0x3e] sm:$0xff] }
  0x85   :  { %2071 = vmatmul.mubr.f32.gmra.mxu0 %v1523_v25  ;;  %2129 = vmatprep.subr.mxu0 %v1581_v26 }
  0x86   :  { %2173 = vmatprep.subr.mxu1 %v1605_v27  ;;  %2114 = vmatprep.mubr.f32.mxu1 %v1546_v28 }
  0x87   :  { %2130 = vmatpush3.msra.mxu0 %v1581_v26  ;;  %2174 = vmatpush3.msra.mxu1 %v1605_v27 }
  0x88   :  { %2131 = vmatprep.subr.mxu0 %v1580_v29  ;;  %2115 = vmatmul.mubr.f32.gmra.mxu1 %v1547_v30 }
  0x89   :  { %2175 = vmatprep.subr.mxu1 %v1604_v31  ;;  %2132 = vmatpush3.msra.mxu0 %v1580_v29 }
  0x8a   :  { %2176 = vmatpush3.msra.mxu1 %v1604_v31  ;;  %2133 = vmatprep.subr.mxu0 %v1579_v32 }
  0x8b   :  { %2177 = vmatprep.subr.mxu1 %v1603_v33  ;;  %2134 = vmatpush3.msra.mxu0 %v1579_v32 }
  0x8c   :  { %2178 = vmatpush3.msra.mxu1 %v1603_v33  ;;  %2135 = vmatprep.subr.mxu0 %v1578_v34 }
  0x8d   :  { %2179 = vmatprep.subr.mxu1 %v1602_v35  ;;  %2136 = vmatpush3.msra.mxu0 %v1578_v34 }
  0x8e   :  { %2180 = vmatpush3.msra.mxu1 %v1602_v35  ;;  %2137 = vmatprep.subr.mxu0 %v1577_v36 }
  0x8f   :  { %2181 = vmatprep.subr.mxu1 %v1601_v37  ;;  %2138 = vmatpush3.msra.mxu0 %v1577_v36 }
  0x90   :  { %2182 = vmatpush3.msra.mxu1 %v1601_v37  ;;  %2139 = vmatprep.subr.mxu0 %v1576_v38 }
  0x91   :  { %2183 = vmatprep.subr.mxu1 %v1600_v39  ;;  %2140 = vmatpush3.msra.mxu0 %v1576_v38 }
  0x92   :  { %2184 = vmatpush3.msra.mxu1 %v1600_v39  ;;  %2141 = vmatprep.subr.mxu0 %v1575_v40 }
  0x93   :  { %2185 = vmatprep.subr.mxu1 %v1599_v41  ;;  %2142 = vmatpush3.msra.mxu0 %v1575_v40 }
  0x94   :  { %2186 = vmatpush3.msra.mxu1 %v1599_v41  ;;  %2143 = vmatprep.subr.mxu0 %v1574_v42 }
  0x95   :  { %2187 = vmatprep.subr.mxu1 %v1598_v43  ;;  %2144 = vmatpush3.msra.mxu0 %v1574_v42 }
  0x96   :  { %2188 = vmatpush3.msra.mxu1 %v1598_v43  ;;  %2145 = vmatprep.subr.mxu0 %v1573_v44 }
  0x97   :  { %2189 = vmatprep.subr.mxu1 %v1597_v45  ;;  %2146 = vmatpush3.msra.mxu0 %v1573_v44 }
  0x98   :  { %2190 = vmatpush3.msra.mxu1 %v1597_v45  ;;  %2147 = vmatprep.subr.mxu0 %v1572_v46 }
  0x99   :  { %2191 = vmatprep.subr.mxu1 %v1596_v47  ;;  %2148 = vmatpush3.msra.mxu0 %v1572_v46 }
  0x9a   :  { %2149 = vmatprep.mubr.f32.mxu0 %v1564_v48  ;;  %2192 = vmatpush3.msra.mxu1 %v1596_v47 }
  0x9b   :  { %2193 = vmatprep.mubr.f32.mxu1 %v1588_v49  ;;  %2150 = vmatmul.mubr.f32.vlgmr.msra.gmra.mxu0 %v1565_v50 }
  0x9c   :  { %2194 = vmatmul.mubr.f32.vlgmr.msra.gmra.mxu1 %v1589_v51  ;;  %2205 = vmatprep.subr.mxu0 %v1635_v52 }
  0x9d   :  { %2249 = vmatprep.subr.mxu1 %v1635_v52  ;;  %2206 = vmatpush3.msra.mxu0 %v1635_v52 }
  0x9e   :  { %2265 = vmatpush3.msra.mxu1 %v1635_v52  ;;  %2207 = vmatprep.subr.mxu0 %v1634_v53 }
  0x9f   :  { %2250 = vmatprep.subr.mxu1 %v1634_v53  ;;  %2152 = vmatprep.mubr.f32.mxu0 %v1566_v54 }
  0xa0   :  { %2208 = vmatpush3.msra.mxu0 %v1634_v53  ;;  %2266 = vmatpush3.msra.mxu1 %v1634_v53 }
  0xa1   :  { %2153 = vmatmul.mubr.f32.gmra.mxu0 %v1567_v55  ;;  %2209 = vmatprep.subr.mxu0 %v1633_v56 }
  0xa2   :  { %2251 = vmatprep.subr.mxu1 %v1633_v56  ;;  %2196 = vmatprep.mubr.f32.mxu1 %v1590_v57 }
  0xa3   :  { %2210 = vmatpush3.msra.mxu0 %v1633_v56  ;;  %2267 = vmatpush3.msra.mxu1 %v1633_v56 }
  0xa4   :  { %2211 = vmatprep.subr.mxu0 %v1632_v58  ;;  %2197 = vmatmul.mubr.f32.gmra.mxu1 %v1591_v59 }
  0xa5   :  { %2252 = vmatprep.subr.mxu1 %v1632_v58  ;;  %2155 = vmatprep.mubr.f32.mxu0 %v1568_v60 }
  0xa6   :  { %2212 = vmatpush3.msra.mxu0 %v1632_v58  ;;  %2268 = vmatpush3.msra.mxu1 %v1632_v58 }
  0xa7   :  { %2156 = vmatmul.mubr.f32.gmra.mxu0 %v1569_v61  ;;  %2213 = vmatprep.subr.mxu0 %v1631_v62 }
  0xa8   :  { %2253 = vmatprep.subr.mxu1 %v1631_v62  ;;  %2199 = vmatprep.mubr.f32.mxu1 %v1592_v63 }
  0xa9   :  { %2214 = vmatpush3.msra.mxu0 %v1631_v62  ;;  %2269 = vmatpush3.msra.mxu1 %v1631_v62 }
  0xaa   :  { %2215 = vmatprep.subr.mxu0 %v1630_v0  ;;  %2200 = vmatmul.mubr.f32.gmra.mxu1 %v1593_v1 }
  0xab   :  { %2254 = vmatprep.subr.mxu1 %v1630_v0  ;;  %2158 = vmatprep.mubr.f32.mxu0 %v1570_v2 }
  0xac   :  { %2216 = vmatpush3.msra.mxu0 %v1630_v0  ;;  %2270 = vmatpush3.msra.mxu1 %v1630_v0 }
  0xad   :  { %2159 = vmatmul.mubr.f32.gmra.mxu0 %v1571_v3  ;;  %2217 = vmatprep.subr.mxu0 %v1629_v4 }
  0xae   :  { %2255 = vmatprep.subr.mxu1 %v1629_v4  ;;  %2202 = vmatprep.mubr.f32.mxu1 %v1594_v5 }
  0xaf   :  { %2218 = vmatpush3.msra.mxu0 %v1629_v4  ;;  %2271 = vmatpush3.msra.mxu1 %v1629_v4 }
  0xb0   :  { %2219 = vmatprep.subr.mxu0 %v1628_v6  ;;  %2203 = vmatmul.mubr.f32.gmra.mxu1 %v1595_v7 }
  0xb1   :  { %2256 = vmatprep.subr.mxu1 %v1628_v6  ;;  %2220 = vmatpush3.msra.mxu0 %v1628_v6 }
  0xb2   :  { %2272 = vmatpush3.msra.mxu1 %v1628_v6  ;;  %2221 = vmatprep.subr.mxu0 %v1627_v8 }
  0xb3   :  { %2257 = vmatprep.subr.mxu1 %v1627_v8  ;;  %2222 = vmatpush3.msra.mxu0 %v1627_v8 }
  0xb4   :  { %2273 = vmatpush3.msra.mxu1 %v1627_v8  ;;  %2223 = vmatprep.subr.mxu0 %v1626_v9 }
  0xb5   :  { %2258 = vmatprep.subr.mxu1 %v1626_v9  ;;  %2224 = vmatpush3.msra.mxu0 %v1626_v9 }
  0xb6   :  { %2274 = vmatpush3.msra.mxu1 %v1626_v9  ;;  %2225 = vmatprep.subr.mxu0 %v1625_v10 }
  0xb7   :  { %2259 = vmatprep.subr.mxu1 %v1625_v10  ;;  %2226 = vmatpush3.msra.mxu0 %v1625_v10 }
  0xb8   :  { %2275 = vmatpush3.msra.mxu1 %v1625_v10  ;;  %2227 = vmatprep.subr.mxu0 %v1624_v11 }
  0xb9   :  { %2260 = vmatprep.subr.mxu1 %v1624_v11  ;;  %2228 = vmatpush3.msra.mxu0 %v1624_v11 }
  0xba   :  { %2276 = vmatpush3.msra.mxu1 %v1624_v11  ;;  %2229 = vmatprep.subr.mxu0 %v1623_v12 }
  0xbb   :  { %2261 = vmatprep.subr.mxu1 %v1623_v12  ;;  %2230 = vmatpush3.msra.mxu0 %v1623_v12 }
  0xbc   :  { %2277 = vmatpush3.msra.mxu1 %v1623_v12  ;;  %2231 = vmatprep.subr.mxu0 %v1622_v13 }
  0xbd   :  { %2262 = vmatprep.subr.mxu1 %v1622_v13  ;;  %2232 = vmatpush3.msra.mxu0 %v1622_v13 }
  0xbe   :  { %2278 = vmatpush3.msra.mxu1 %v1622_v13  ;;  %2233 = vmatprep.subr.mxu0 %v1621_v14 }
  0xbf   :  { %2263 = vmatprep.subr.mxu1 %v1621_v14  ;;  %2234 = vmatpush3.msra.mxu0 %v1621_v14 }
  0xc0   :  { %2279 = vmatpush3.msra.mxu1 %v1621_v14  ;;  %2235 = vmatprep.subr.mxu0 %v1620_v15 }
  0xc1   :  { %2264 = vmatprep.subr.mxu1 %v1620_v15  ;;  %2236 = vmatpush3.msra.mxu0 %v1620_v15 }
  0xc2   :  { %2280 = vmatpush3.msra.mxu1 %v1620_v15  ;;  %2237 = vmatprep.mubr.f32.mxu0 %v1612_v16 }
  0xc3   :  { %2243 = vmatprep.mubr.f32.mxu1 %v1616_v17  ;;  %2238 = vmatmul.mubr.f32.vlgmr.msra.gmra.mxu0 %v1613_v18 }
  0xc4   :  { %2244 = vmatmul.mubr.f32.vlgmr.msra.gmra.mxu1 %v1617_v19  ;;  %2240 = vmatprep.mubr.f32.mxu0 %v1614_v20 }
  0xc5   :  { %2246 = vmatprep.mubr.f32.mxu1 %v1618_v21 }
  0xc7   :  { %2241 = vmatmul.mubr.f32.gmra.mxu0 %v1615_v22 }
  0xc8   :  { %2247 = vmatmul.mubr.f32.gmra.mxu1 %v1619_v23 }
  0xe3   :  { %v1887_v24 = vpop.f32.mrf.mxu0 }
  0xe4   :  { %v1931_v27 = vpop.f32.mrf.mxu1 }
  0xe5   :  { %v106_v25 = vpop.f32.mrf.mxu0  ;;  %v294_v14 = vadd.f32 %v1931_v27, %v1887_v24 }
  0xe6   :  { %v246_v29 = vpop.f32.mrf.mxu1 }
  0xe7   :  { %v293_v18 = vadd.f32 %v246_v29, %v106_v25 }
  0xf8   :  { %v1890_v26 = vpop.f32.mrf.mxu0 }
  0xf9   :  { %v1934_v30 = vpop.f32.mrf.mxu1 }
  0xfa   :  { %v2949_v28 = vpop.f32.mrf.mxu0  ;;  %v296_v22 = vadd.f32 %v1934_v30, %v1890_v26 }
  0xfb   :  { %2998 = vst [vmem:[#allocation3_spill] sm:$0xff] %v2949_v28  ;;  %v256_v32 = vpop.f32.mrf.mxu1 }
  0xfe   :  { %v1893_v31 = vpop.f32.mrf.mxu0 }
  0xff   :  { %v1937_v34 = vpop.f32.mrf.mxu1 }
 0x100   :  { %v126_v33 = vpop.f32.mrf.mxu0  ;;  %v298_v15 = vadd.f32 %v1937_v34, %v1893_v31 }
 0x101   :  { %v266_v36 = vpop.f32.mrf.mxu1 }
 0x102   :  { %v297_v19 = vadd.f32 %v266_v36, %v126_v33 }
 0x104   :  { %v1896_v35 = vpop.f32.mrf.mxu0 }
 0x105   :  { %v1940_v38 = vpop.f32.mrf.mxu1 }
 0x106   :  { %v136_v37 = vpop.f32.mrf.mxu0  ;;  %v300_v23 = vadd.f32 %v1940_v38, %v1896_v35 }
 0x107   :  { %v276_v40 = vpop.f32.mrf.mxu1 }
 0x108   :  { %v299_v24 = vadd.f32 %v276_v40, %v136_v37 }
 0x10b   :  { %v1975_v39 = vpop.f32.mrf.mxu0 }
 0x10c   :  { %v2019_v42 = vpop.f32.mrf.mxu1  ;;  %v450_v20 = vadd.f32 %v1975_v39, %v294_v14 }
 0x10d   :  { %v402_v41 = vpop.f32.mrf.mxu0 }
 0x10e   :  { %v558_v44 = vpop.f32.mrf.mxu1 }
 0x111   :  { %v1978_v43 = vpop.f32.mrf.mxu0 }
 0x112   :  { %v452_v27 = vadd.f32 %v1978_v43, %v296_v22 }
 0x113   :  { %v412_v45 = vpop.f32.mrf.mxu0 }
 0x114   :  { %v2022_v46 = vpop.f32.mrf.mxu1 }
 0x115   :  { %v608_v26 = vadd.f32 %v2022_v46, %v452_v27 }
 0x116   :  { %v568_v48 = vpop.f32.mrf.mxu1 }
 0x117   :  { %v1981_v47 = vpop.f32.mrf.mxu0 }
 0x118   :  { %v454_v21 = vadd.f32 %v1981_v47, %v298_v15 }
 0x119   :  { %v422_v49 = vpop.f32.mrf.mxu0 }
 0x11a   :  { %v2025_v50 = vpop.f32.mrf.mxu1 }
 0x11b   :  { %v610_v25 = vadd.f32 %v2025_v50, %v454_v21 }
 0x11c   :  { %v578_v52 = vpop.f32.mrf.mxu1 }
 0x11d   :  { %v1984_v51 = vpop.f32.mrf.mxu0 }
 0x11e   :  { %v456_v31 = vadd.f32 %v1984_v51, %v300_v23 }
 0x11f   :  { %v432_v53 = vpop.f32.mrf.mxu0 }
 0x120   :  { %v2028_v54 = vpop.f32.mrf.mxu1  ;;  %v455_v33 = vadd.f32 %v432_v53, %v299_v24 }
 0x121   :  { %v612_v30 = vadd.f32 %v2028_v54, %v456_v31 }
 0x122   :  { %v588_v56 = vpop.f32.mrf.mxu1 }
 0x133   :  { %v2063_v55 = vpop.f32.mrf.mxu0 }
 0x134   :  { %v2107_v58 = vpop.f32.mrf.mxu1 }
 0x135   :  { %v714_v57 = vpop.f32.mrf.mxu0 }
 0x136   :  { %v870_v60 = vpop.f32.mrf.mxu1 }
 0x139   :  { %v2066_v59 = vpop.f32.mrf.mxu0 }
 0x13a   :  { %v764_v37 = vadd.f32 %v2066_v59, %v608_v26 }
 0x13b   :  { %v724_v62 = vpop.f32.mrf.mxu0 }
 0x13c   :  { %v2951_v61 = vpop.f32.mrf.mxu1 }
 0x13d   :  { %2999 = vst [vmem:[#allocation4_spill] sm:$0xff] %v2951_v61  ;;  %v453_v61 = vadd.f32 %v422_v49, %v297_v19 }
 0x13e   :  { %v2953_v63 = vpop.f32.mrf.mxu1 }
 0x13f   :  { %3000 = vst [vmem:[#allocation5_spill] sm:$0xff] %v2953_v63  ;;  %v2069_v0 = vpop.f32.mrf.mxu0  ;;  %v449_v63 = vadd.f32 %v402_v41, %v293_v18  ;;  %v609_v14 = vadd.f32 %v578_v52, %v453_v61 }
 0x140   :  { %v766_v15 = vadd.f32 %v2069_v0, %v610_v25 }
 0x141   :  { %v734_v2 = vpop.f32.mrf.mxu0  ;;  %v605_v36 = vadd.f32 %v558_v44, %v449_v63 }
 0x142   :  { %v2113_v1 = vpop.f32.mrf.mxu1  ;;  %v765_v41 = vadd.f32 %v734_v2, %v609_v14 }
 0x143   :  { %v761_v38 = vadd.f32 %v714_v57, %v605_v36  ;;  %v922_v51 = vadd.f32 %v2113_v1, %v766_v15 }
 0x144   :  { %v890_v3 = vpop.f32.mrf.mxu1  ;;  %v3005_v63 = vld [vmem:[#allocation4_spill] sm:$0xff] }
 0x145   :  { %v2072_v4 = vpop.f32.mrf.mxu0  ;;  %v917_v44 = vadd.f32 %v870_v60, %v761_v38  ;;  %v921_v52 = vadd.f32 %v890_v3, %v765_v41  ;;  %v920_v46 = vadd.f32 %v3005_v63, %v764_v37 }
 0x146   :  { %v768_v40 = vadd.f32 %v2072_v4, %v612_v30 }
 0x147   :  { %v744_v6 = vpop.f32.mrf.mxu0 }
 0x148   :  { %v2116_v5 = vpop.f32.mrf.mxu1 }
 0x149   :  { %v924_v54 = vadd.f32 %v2116_v5, %v768_v40 }
 0x14a   :  { %v900_v8 = vpop.f32.mrf.mxu1 }
 0x15b   :  { %v2151_v7 = vpop.f32.mrf.mxu0 }
 0x15c   :  { %v2195_v9 = vpop.f32.mrf.mxu1 }
 0x15d   :  { %v1026_v10 = vpop.f32.mrf.mxu0 }
 0x15e   :  { %v2955_v11 = vpop.f32.mrf.mxu1  ;;  %v1073_v0 = vadd.f32 %v1026_v10, %v917_v44 }
 0x15f   :  { %3001 = vst [vmem:[#allocation6_spill] sm:$0xff] %v2955_v11  ;;  %v3004_v11 = vld [vmem:[#allocation3_spill] sm:$0xff] }
 0x161   :  { %v2154_v12 = vpop.f32.mrf.mxu0 }
 0x162   :  { %v1076_v4 = vadd.f32 %v2154_v12, %v920_v46 }
 0x163   :  { %v1036_v16 = vpop.f32.mrf.mxu0 }
 0x164   :  { %v2957_v13 = vpop.f32.mrf.mxu1 }
 0x165   :  { %3002 = vst [vmem:[#allocation7_spill] sm:$0xff] %v2957_v13  ;;  %v295_v13 = vadd.f32 %v256_v32, %v3004_v11  ;;  %v611_v32 = vadd.f32 %v588_v56, %v455_v33 }
 0x166   :  { %v2959_v17 = vpop.f32.mrf.mxu1  ;;  %v3007_v5 = vld [vmem:[#allocation6_spill] sm:$0xff] }
 0x167   :  { %3003 = vst [vmem:[#allocation8_spill] sm:$0xff] %v2959_v17  ;;  %v2157_v28 = vpop.f32.mrf.mxu0  ;;  %v606_v17 = vadd.f32 %v2019_v42, %v450_v20  ;;  %v451_v29 = vadd.f32 %v412_v45, %v295_v13  ;;  %v767_v45 = vadd.f32 %v744_v6, %v611_v32 }
 0x168   :  { %v1078_v61 = vadd.f32 %v2157_v28, %v922_v51  ;;  %v1636_v28 = vld [vmem:[%s2996_s2] ss:$0 sm:$0xff] }
 0x169   :  { %v762_v39 = vadd.f32 %v2063_v55, %v606_v17  ;;  %v1046_v47 = vpop.f32.mrf.mxu0  ;;  %v607_v49 = vadd.f32 %v568_v48, %v451_v29  ;;  %v3006_v48 = vld [vmem:[#allocation5_spill] sm:$0xff]  ;;  %v923_v59 = vadd.f32 %v900_v8, %v767_v45 }
 0x16a   :  { %v2201_v34 = vpop.f32.mrf.mxu1  ;;  %v1077_v57 = vadd.f32 %v1046_v47, %v921_v52 }
 0x16b   :  { %v918_v43 = vadd.f32 %v2107_v58, %v762_v39  ;;  %v763_v50 = vadd.f32 %v724_v62, %v607_v49  ;;  %v1234_v62 = vadd.f32 %v2201_v34, %v1078_v61 }
 0x16c   :  { %v1202_v35 = vpop.f32.mrf.mxu1  ;;  %v3008_v19 = vld [vmem:[#allocation7_spill] sm:$0xff] }
 0x16d   :  { %v2160_v42 = vpop.f32.mrf.mxu0  ;;  %v1074_v55 = vadd.f32 %v2151_v7, %v918_v43  ;;  %v919_v56 = vadd.f32 %v3006_v48, %v763_v50  ;;  %v1229_v7 = vadd.f32 %v3007_v5, %v1073_v0  ;;  %v1233_v10 = vadd.f32 %v1202_v35, %v1077_v57 }
 0x16e   :  { %v1080_v58 = vadd.f32 %v2160_v42, %v924_v54  ;;  %v1232_v8 = vadd.f32 %v3008_v19, %v1076_v4  ;;  %v3009_v24 = vld [vmem:[#allocation8_spill] sm:$0xff] }
 0x16f   :  { %v1056_v2 = vpop.f32.mrf.mxu0  ;;  %v1230_v11 = vadd.f32 %v2195_v9, %v1074_v55  ;;  %v1075_v6 = vadd.f32 %v1036_v16, %v919_v56 }
 0x170   :  { %v2204_v53 = vpop.f32.mrf.mxu1  ;;  %v1079_v13 = vadd.f32 %v1056_v2, %v923_v59 }
 0x171   :  { %v1236_v12 = vadd.f32 %v2204_v53, %v1080_v58  ;;  %v1231_v27 = vadd.f32 %v3009_v24, %v1075_v6 }
 0x172   :  { %v1212_v1 = vpop.f32.mrf.mxu1 }
 0x173   :  { %v1235_v31 = vadd.f32 %v1212_v1, %v1079_v13 }
 0x183   :  { %v2239_v60 = vpop.f32.mrf.mxu0 }
 0x184   :  { %v2245_v3 = vpop.f32.mrf.mxu1  ;;  %v1386_v17 = vadd.f32 %v2239_v60, %v1230_v11 }
 0x185   :  { %v1390_v18 = vadd.f32 %v2245_v3, %v1234_v62  ;;  %v1338_v20 = vpop.f32.mrf.mxu0 }
 0x186   :  { %v1358_v21 = vpop.f32.mrf.mxu1  ;;  %v1417_v9 = vadd.f32 %v1636_v28, %v1386_v17  ;;  %v1385_v16 = vadd.f32 %v1338_v20, %v1229_v7 }
 0x187   :  { %v1421_v22 = vadd.f32 %v1636_v28, %v1390_v18  ;;  %v1389_v23 = vadd.f32 %v1358_v21, %v1233_v10  ;;  %v2242_v34 = vpop.f32.mrf.mxu0 }
 0x188   :  { %v2248_v25 = vpop.f32.mrf.mxu1  ;;  %1425 = vst [vmem:[%s2997_s3 + $0x8] sm:$0xff] %v1417_v9  ;;  %v1416_v29 = vadd.f32 %v1636_v28, %v1385_v16  ;;  %v1388_v36 = vadd.f32 %v2242_v34, %v1232_v8 }
 0x189   :  { %1429 = vst [vmem:[%s2997_s3 + $0x28] sm:$0xff] %v1421_v22  ;;  %v1420_v33 = vadd.f32 %v1636_v28, %v1389_v23  ;;  %v1392_v14 = vadd.f32 %v2248_v25, %v1236_v12  ;;  %v1348_v39 = vpop.f32.mrf.mxu0 }
 0x18a   :  { %v1368_v15 = vpop.f32.mrf.mxu1  ;;  %1424 = vst [vmem:[%s2997_s3] sm:$0xff] %v1416_v29  ;;  %v1419_v47 = vadd.f32 %v1636_v28, %v1388_v36  ;;  %v1387_v30 = vadd.f32 %v1348_v39, %v1231_v27 }
 0x18b   :  { %1428 = vst [vmem:[%s2997_s3 + $0x20] sm:$0xff] %v1420_v33  ;;  %v1423_v26 = vadd.f32 %v1636_v28, %v1392_v14  ;;  %v1391_v35 = vadd.f32 %v1368_v15, %v1235_v31 }
 0x18c   :  { %1427 = vst [vmem:[%s2997_s3 + $0x18] sm:$0xff] %v1419_v47  ;;  %v1418_v38 = vadd.f32 %v1636_v28, %v1387_v30 }
 0x18d   :  { %1431 = vst [vmem:[%s2997_s3 + $0x38] sm:$0xff] %v1423_v26  ;;  %v1422_v41 = vadd.f32 %v1636_v28, %v1391_v35 }
 0x18e   :  { %1426 = vst [vmem:[%s2997_s3 + $0x10] sm:$0xff] %v1418_v38 }
 0x18f   :  { %1430 = vst [vmem:[%s2997_s3 + $0x30] sm:$0xff] %v1422_v41 }

// kernel: fpn_top_blocks.2
= control target key start
LH: loop header
LB: loop body
LE: loop exit
PB: predicated region body
PF: predicated region fallthrough
CT: control target
= control target key end

     0   :  { %v4282_v0 = vmov 0.0   ;;  %vm4283_vm0 = vmmov 0   ;;  %s6306_s1 = inlined_call_operand.vmem [shape: f32[9,128,128], index: 1, kind: input, shape index: {}]   ;;  %s6307_s0 = inlined_call_operand.vmem [shape: f32[800,128], index: 0, kind: input, shape index: {}]   ;;  %s6308_s2 = inlined_call_operand.vmem [shape: f32[1,128], index: 2, kind: input, shape index: {}]   ;;  %s6309_s3 = inlined_call_operand.vmem [shape: f32[184,128], index: 3, kind: output, shape index: {}]  }
   0x1   :  { %3338 = vmatprep.subr.mxu0 %v4282_v0  ;;  %4247 = vmatprep.subr.mxu1 %v4282_v0  ;;  %v54_v1 = vld [vmem:[%s6306_s1 + $0x78] sm:$0xff]  ;;  %v53_v2 = vld [vmem:[%s6306_s1 + $0x70] sm:$0xff]  ;;  %v52_v3 = vld [vmem:[%s6306_s1 + $0x68] sm:$0xff] }
   0x2   :  { %3339 = vmatpush3.msra.mxu0 %v54_v1  ;;  %4263 = vmatpush3.msra.mxu1 %v54_v1  ;;  %v51_v4 = vld [vmem:[%s6306_s1 + $0x60] sm:$0xff]  ;;  %v50_v5 = vld [vmem:[%s6306_s1 + $0x58] sm:$0xff]  ;;  %v49_v6 = vld [vmem:[%s6306_s1 + $0x50] sm:$0xff] }
   0x3   :  { %3340 = vmatprep.subr.mxu0 %v4282_v0  ;;  %4248 = vmatprep.subr.mxu1 %v4282_v0  ;;  %v48_v7 = vld [vmem:[%s6306_s1 + $0x48] sm:$0xff]  ;;  %v47_v8 = vld [vmem:[%s6306_s1 + $0x40] sm:$0xff]  ;;  %v46_v9 = vld [vmem:[%s6306_s1 + $0x38] sm:$0xff] }
   0x4   :  { %3341 = vmatpush3.msra.mxu0 %v53_v2  ;;  %4264 = vmatpush3.msra.mxu1 %v53_v2  ;;  %v45_v10 = vld [vmem:[%s6306_s1 + $0x30] sm:$0xff]  ;;  %v44_v11 = vld [vmem:[%s6306_s1 + $0x28] sm:$0xff]  ;;  %v43_v12 = vld [vmem:[%s6306_s1 + $0x20] sm:$0xff] }
   0x5   :  { %3342 = vmatprep.subr.mxu0 %v4282_v0  ;;  %4249 = vmatprep.subr.mxu1 %v4282_v0  ;;  %v42_v13 = vld [vmem:[%s6306_s1 + $0x18] sm:$0xff]  ;;  %v41_v14 = vld [vmem:[%s6306_s1 + $0x10] sm:$0xff]  ;;  %v40_v15 = vld [vmem:[%s6306_s1 + $0x8] sm:$0xff] }
   0x6   :  { %3343 = vmatpush3.msra.mxu0 %v52_v3  ;;  %4265 = vmatpush3.msra.mxu1 %v52_v3  ;;  %v39_v16 = vld [vmem:[%s6306_s1] sm:$0xff]  ;;  %v2751_v19 = vld [vmem:[%s6306_s1 + $0x178] sm:$0xff]  ;;  %v17_v21 = vld [vmem:[%s6307_s0 + $0x8] sm:$0xff] }
   0x7   :  { %3344 = vmatprep.subr.mxu0 %v4282_v0  ;;  %4250 = vmatprep.subr.mxu1 %v4282_v0  ;;  %v16_v17 = vld [vmem:[%s6307_s0] sm:$0xff]  ;;  %v2712_v20 = vld [vmem:[%s6306_s1 + $0xf8] sm:$0xff]  ;;  %v29_v22 = vld [vmem:[%s6307_s0 + $0x68] sm:$0xff] }
   0x8   :  { %3345 = vmatpush3.msra.mxu0 %v51_v4  ;;  %4266 = vmatpush3.msra.mxu1 %v51_v4  ;;  %v28_v18 = vld [vmem:[%s6307_s0 + $0x60] sm:$0xff]  ;;  %v2750_v23 = vld [vmem:[%s6306_s1 + $0x170] sm:$0xff]  ;;  %v2749_v25 = vld [vmem:[%s6306_s1 + $0x168] sm:$0xff] }
   0x9   :  { %3346 = vmatprep.subr.mxu0 %v4282_v0  ;;  %4251 = vmatprep.subr.mxu1 %v4282_v0  ;;  %v2711_v24 = vld [vmem:[%s6306_s1 + $0xf0] sm:$0xff]  ;;  %v2710_v28 = vld [vmem:[%s6306_s1 + $0xe8] sm:$0xff]  ;;  %v2748_v29 = vld [vmem:[%s6306_s1 + $0x160] sm:$0xff] }
   0xa   :  { %3347 = vmatpush3.msra.mxu0 %v50_v5  ;;  %4267 = vmatpush3.msra.mxu1 %v50_v5  ;;  %v18_v26 = vld [vmem:[%s6307_s0 + $0x10] sm:$0xff]  ;;  %v19_v30 = vld [vmem:[%s6307_s0 + $0x18] sm:$0xff]  ;;  %v2709_v32 = vld [vmem:[%s6306_s1 + $0xe0] sm:$0xff] }
   0xb   :  { %3348 = vmatprep.subr.mxu0 %v4282_v0  ;;  %4252 = vmatprep.subr.mxu1 %v4282_v0  ;;  %v30_v27 = vld [vmem:[%s6307_s0 + $0x70] sm:$0xff]  ;;  %v31_v31 = vld [vmem:[%s6307_s0 + $0x78] sm:$0xff]  ;;  %v20_v35 = vld [vmem:[%s6307_s0 + $0x20] sm:$0xff] }
   0xc   :  { %3349 = vmatpush3.msra.mxu0 %v49_v6  ;;  %4268 = vmatpush3.msra.mxu1 %v49_v6  ;;  %v2747_v33 = vld [vmem:[%s6306_s1 + $0x158] sm:$0xff]  ;;  %v32_v36 = vld [vmem:[%s6307_s0 + $0x80] sm:$0xff]  ;;  %v2746_v37 = vld [vmem:[%s6306_s1 + $0x150] sm:$0xff] }
   0xd   :  { %3350 = vmatprep.subr.mxu0 %v4282_v0  ;;  %4253 = vmatprep.subr.mxu1 %v4282_v0  ;;  %v2708_v34 = vld [vmem:[%s6306_s1 + $0xd8] sm:$0xff]  ;;  %v2707_v38 = vld [vmem:[%s6306_s1 + $0xd0] sm:$0xff]  ;;  %v2745_v39 = vld [vmem:[%s6306_s1 + $0x148] sm:$0xff] }
   0xe   :  { %3351 = vmatpush3.msra.mxu0 %v48_v7  ;;  %4269 = vmatpush3.msra.mxu1 %v48_v7  ;;  %v33_v40 = vld [vmem:[%s6307_s0 + $0x88] sm:$0xff]  ;;  %v2744_v43 = vld [vmem:[%s6306_s1 + $0x140] sm:$0xff]  ;;  %v22_v45 = vld [vmem:[%s6307_s0 + $0x30] sm:$0xff] }
   0xf   :  { %3352 = vmatprep.subr.mxu0 %v4282_v0  ;;  %4254 = vmatprep.subr.mxu1 %v4282_v0  ;;  %v21_v41 = vld [vmem:[%s6307_s0 + $0x28] sm:$0xff]  ;;  %v2705_v44 = vld [vmem:[%s6306_s1 + $0xc0] sm:$0xff]  ;;  %v34_v46 = vld [vmem:[%s6307_s0 + $0x90] sm:$0xff] }
  0x10   :  { %3353 = vmatpush3.msra.mxu0 %v47_v8  ;;  %4270 = vmatpush3.msra.mxu1 %v47_v8  ;;  %v2706_v42 = vld [vmem:[%s6306_s1 + $0xc8] sm:$0xff]  ;;  %v2704_v47 = vld [vmem:[%s6306_s1 + $0xb8] sm:$0xff]  ;;  %v2703_v51 = vld [vmem:[%s6306_s1 + $0xb0] sm:$0xff] }
  0x11   :  { %3354 = vmatprep.subr.mxu0 %v4282_v0  ;;  %4255 = vmatprep.subr.mxu1 %v4282_v0  ;;  %v2743_v48 = vld [vmem:[%s6306_s1 + $0x138] sm:$0xff]  ;;  %v2742_v52 = vld [vmem:[%s6306_s1 + $0x130] sm:$0xff]  ;;  %v2702_v53 = vld [vmem:[%s6306_s1 + $0xa8] sm:$0xff] }
  0x12   :  { %3355 = vmatpush3.msra.mxu0 %v46_v9  ;;  %4271 = vmatpush3.msra.mxu1 %v46_v9  ;;  %v23_v49 = vld [vmem:[%s6307_s0 + $0x38] sm:$0xff]  ;;  %v2741_v54 = vld [vmem:[%s6306_s1 + $0x128] sm:$0xff]  ;;  %v24_v55 = vld [vmem:[%s6307_s0 + $0x40] sm:$0xff] }
  0x13   :  { %3356 = vmatprep.subr.mxu0 %v4282_v0  ;;  %4256 = vmatprep.subr.mxu1 %v4282_v0  ;;  %v35_v50 = vld [vmem:[%s6307_s0 + $0x98] sm:$0xff]  ;;  %v36_v56 = vld [vmem:[%s6307_s0 + $0xa0] sm:$0xff]  ;;  %v25_v59 = vld [vmem:[%s6307_s0 + $0x48] sm:$0xff] }
  0x14   :  { %3357 = vmatpush3.msra.mxu0 %v45_v10  ;;  %4272 = vmatpush3.msra.mxu1 %v45_v10  ;;  %v2701_v57 = vld [vmem:[%s6306_s1 + $0xa0] sm:$0xff]  ;;  %v37_v60 = vld [vmem:[%s6307_s0 + $0xa8] sm:$0xff]  ;;  %v2700_v61 = vld [vmem:[%s6306_s1 + $0x98] sm:$0xff] }
  0x15   :  { %3358 = vmatprep.subr.mxu0 %v4282_v0  ;;  %4257 = vmatprep.subr.mxu1 %v4282_v0  ;;  %v2740_v58 = vld [vmem:[%s6306_s1 + $0x120] sm:$0xff]  ;;  %v2739_v62 = vld [vmem:[%s6306_s1 + $0x118] sm:$0xff]  ;;  %v2699_v63 = vld [vmem:[%s6306_s1 + $0x90] sm:$0xff] }
  0x16   :  { %3359 = vmatpush3.msra.mxu0 %v44_v11  ;;  %4273 = vmatpush3.msra.mxu1 %v44_v11  ;;  %v26_v1 = vld [vmem:[%s6307_s0 + $0x50] sm:$0xff]  ;;  %v2698_v4 = vld [vmem:[%s6306_s1 + $0x88] sm:$0xff]  ;;  %v2697_v5 = vld [vmem:[%s6306_s1 + $0x80] sm:$0xff] }
  0x17   :  { %3360 = vmatprep.subr.mxu0 %v4282_v0  ;;  %4258 = vmatprep.subr.mxu1 %v4282_v0  ;;  %v38_v2 = vld [vmem:[%s6307_s0 + $0xb0] sm:$0xff]  ;;  %v2737_v6 = vld [vmem:[%s6306_s1 + $0x108] sm:$0xff]  ;;  %v27_v7 = vld [vmem:[%s6307_s0 + $0x58] sm:$0xff] }
  0x18   :  { %3361 = vmatpush3.msra.mxu0 %v43_v12  ;;  %4274 = vmatpush3.msra.mxu1 %v43_v12  ;;  %v2738_v3 = vld [vmem:[%s6306_s1 + $0x110] sm:$0xff]  ;;  %v2674_v8 = vld [vmem:[%s6307_s0 + $0xc8] sm:$0xff]  ;;  %v2736_v9 = vld [vmem:[%s6306_s1 + $0x100] sm:$0xff] }
  0x19   :  { %3362 = vmatprep.subr.mxu0 %v4282_v0  ;;  %4259 = vmatprep.subr.mxu1 %v4282_v0  ;;  %v2790_v10 = vld [vmem:[%s6306_s1 + $0x1f8] sm:$0xff]  ;;  %v2675_v11 = vld [vmem:[%s6307_s0 + $0xd0] sm:$0xff]  ;;  %v2713_v12 = vld [vmem:[%s6307_s0 + $0x1] sm:$0xff] }
  0x1a   :  { %3363 = vmatpush3.msra.mxu0 %v42_v13  ;;  %4275 = vmatpush3.msra.mxu1 %v42_v13  ;;  %v2829_v13 = vld [vmem:[%s6306_s1 + $0x278] sm:$0xff] }
  0x1b   :  { %3364 = vmatprep.subr.mxu0 %v4282_v0  ;;  %4260 = vmatprep.subr.mxu1 %v4282_v0 }
  0x1c   :  { %3365 = vmatpush3.msra.mxu0 %v41_v14  ;;  %4276 = vmatpush3.msra.mxu1 %v41_v14  ;;  %v2676_v14 = vld [vmem:[%s6307_s0 + $0xd8] sm:$0xff] }
  0x1d   :  { %3366 = vmatprep.subr.mxu0 %v4282_v0  ;;  %4261 = vmatprep.subr.mxu1 %v4282_v0 }
  0x1e   :  { %3367 = vmatpush3.msra.mxu0 %v40_v15  ;;  %4277 = vmatpush3.msra.mxu1 %v40_v15  ;;  %v4658_v15 = vld [vmem:[%s6307_s0 + $0x9] sm:$0xff] }
  0x1f   :  { %3368 = vmatprep.subr.mxu0 %v4282_v0  ;;  %4262 = vmatprep.subr.mxu1 %v4282_v0 }
  0x20   :  { %3369 = vmatpush3.msra.mxu0 %v39_v16  ;;  %4278 = vmatpush3.msra.mxu1 %v39_v16  ;;  %v2789_v16 = vld [vmem:[%s6306_s1 + $0x1f0] sm:$0xff] }
  0x21   :  { %3370 = vmatprep.mubr.msk.f32.mxu0 %vm4283_vm0, %v4282_v0  ;;  %3406 = vmatprep.mubr.msk.f32.mxu1 %vm4283_vm0, %v4282_v0 }
  0x22   :  { %3371 = vmatmul.mubr.f32.vlgmr.msra.gmra.mxu0 %v16_v17  ;;  %3407 = vmatmul.mubr.f32.vlgmr.msra.gmra.mxu1 %v28_v18  ;;  %v2828_v17 = vld [vmem:[%s6306_s1 + $0x270] sm:$0xff]  ;;  %v2677_v18 = vld [vmem:[%s6307_s0 + $0xe0] sm:$0xff] }
  0x23   :  { %3540 = vmatprep.subr.mxu0 %v4282_v0  ;;  %3439 = vmatprep.subr.mxu1 %v4282_v0 }
  0x24   :  { %3541 = vmatpush3.msra.mxu0 %v2751_v19  ;;  %3373 = vmatprep.mubr.msk.f32.mxu0 %vm4283_vm0, %v4282_v0  ;;  %v4679_v19 = vld [vmem:[%s6307_s0 + $0x11] sm:$0xff] }
  0x25   :  { %3409 = vmatprep.mubr.msk.f32.mxu1 %vm4283_vm0, %v4282_v0  ;;  %3440 = vmatpush3.msra.mxu1 %v2712_v20  ;;  %v2788_v20 = vld [vmem:[%s6306_s1 + $0x1e8] sm:$0xff] }
  0x26   :  { %3542 = vmatprep.subr.mxu0 %v4282_v0  ;;  %3374 = vmatmul.mubr.f32.gmra.mxu0 %v17_v21  ;;  %v2827_v21 = vld [vmem:[%s6306_s1 + $0x268] sm:$0xff] }
  0x27   :  { %3410 = vmatmul.mubr.f32.gmra.mxu1 %v29_v22  ;;  %3543 = vmatpush3.msra.mxu0 %v2750_v23  ;;  %v2678_v22 = vld [vmem:[%s6307_s0 + $0xe8] sm:$0xff]  ;;  %v2716_v23 = vld [vmem:[%s6307_s0 + $0x19] sm:$0xff] }
  0x28   :  { %3441 = vmatprep.subr.mxu1 %v4282_v0  ;;  %3544 = vmatprep.subr.mxu0 %v4282_v0 }
  0x29   :  { %3442 = vmatpush3.msra.mxu1 %v2711_v24  ;;  %3376 = vmatprep.mubr.msk.f32.mxu0 %vm4283_vm0, %v4282_v0  ;;  %v2787_v24 = vld [vmem:[%s6306_s1 + $0x1e0] sm:$0xff] }
  0x2a   :  { %3412 = vmatprep.mubr.msk.f32.mxu1 %vm4283_vm0, %v4282_v0  ;;  %3545 = vmatpush3.msra.mxu0 %v2749_v25  ;;  %v2826_v25 = vld [vmem:[%s6306_s1 + $0x260] sm:$0xff] }
  0x2b   :  { %3377 = vmatmul.mubr.f32.gmra.mxu0 %v18_v26  ;;  %3413 = vmatmul.mubr.f32.gmra.mxu1 %v30_v27  ;;  %v2679_v26 = vld [vmem:[%s6307_s0 + $0xf0] sm:$0xff]  ;;  %v2717_v27 = vld [vmem:[%s6307_s0 + $0x21] sm:$0xff] }
  0x2c   :  { %3443 = vmatprep.subr.mxu1 %v4282_v0  ;;  %3546 = vmatprep.subr.mxu0 %v4282_v0 }
  0x2d   :  { %3444 = vmatpush3.msra.mxu1 %v2710_v28  ;;  %3547 = vmatpush3.msra.mxu0 %v2748_v29  ;;  %v2786_v28 = vld [vmem:[%s6306_s1 + $0x1d8] sm:$0xff] }
  0x2e   :  { %3379 = vmatprep.mubr.msk.f32.mxu0 %vm4283_vm0, %v4282_v0  ;;  %3415 = vmatprep.mubr.msk.f32.mxu1 %vm4283_vm0, %v4282_v0  ;;  %v2825_v29 = vld [vmem:[%s6306_s1 + $0x258] sm:$0xff] }
  0x2f   :  { %3445 = vmatprep.subr.mxu1 %v4282_v0  ;;  %3380 = vmatmul.mubr.f32.gmra.mxu0 %v19_v30  ;;  %v2680_v30 = vld [vmem:[%s6307_s0 + $0xf8] sm:$0xff] }
  0x30   :  { %3416 = vmatmul.mubr.f32.gmra.mxu1 %v31_v31  ;;  %3548 = vmatprep.subr.mxu0 %v4282_v0  ;;  %v2718_v31 = vld [vmem:[%s6307_s0 + $0x29] sm:$0xff] }
  0x31   :  { %3446 = vmatpush3.msra.mxu1 %v2709_v32  ;;  %3549 = vmatpush3.msra.mxu0 %v2747_v33  ;;  %v2785_v32 = vld [vmem:[%s6306_s1 + $0x1d0] sm:$0xff] }
  0x32   :  { %3447 = vmatprep.subr.mxu1 %v4282_v0  ;;  %3382 = vmatprep.mubr.msk.f32.mxu0 %vm4283_vm0, %v4282_v0  ;;  %v2824_v33 = vld [vmem:[%s6306_s1 + $0x250] sm:$0xff] }
  0x33   :  { %3448 = vmatpush3.msra.mxu1 %v2708_v34  ;;  %3418 = vmatprep.mubr.msk.f32.mxu1 %vm4283_vm0, %v4282_v0  ;;  %v2681_v34 = vld [vmem:[%s6307_s0 + $0x100] sm:$0xff] }
  0x34   :  { %3550 = vmatprep.subr.mxu0 %v4282_v0  ;;  %3383 = vmatmul.mubr.f32.gmra.mxu0 %v20_v35  ;;  %v2719_v35 = vld [vmem:[%s6307_s0 + $0x31] sm:$0xff] }
  0x35   :  { %3419 = vmatmul.mubr.f32.gmra.mxu1 %v32_v36  ;;  %3449 = vmatprep.subr.mxu1 %v4282_v0  ;;  %v2784_v36 = vld [vmem:[%s6306_s1 + $0x1c8] sm:$0xff] }
  0x36   :  { %3551 = vmatpush3.msra.mxu0 %v2746_v37  ;;  %3450 = vmatpush3.msra.mxu1 %v2707_v38  ;;  %v2823_v37 = vld [vmem:[%s6306_s1 + $0x248] sm:$0xff] }
  0x37   :  { %3552 = vmatprep.subr.mxu0 %v4282_v0  ;;  %3385 = vmatprep.mubr.msk.f32.mxu0 %vm4283_vm0, %v4282_v0  ;;  %v2682_v38 = vld [vmem:[%s6307_s0 + $0x108] sm:$0xff] }
  0x38   :  { %3421 = vmatprep.mubr.msk.f32.mxu1 %vm4283_vm0, %v4282_v0  ;;  %3451 = vmatprep.subr.mxu1 %v4282_v0 }
  0x39   :  { %3553 = vmatpush3.msra.mxu0 %v2745_v39  ;;  %3422 = vmatmul.mubr.f32.gmra.mxu1 %v33_v40  ;;  %v2720_v39 = vld [vmem:[%s6307_s0 + $0x39] sm:$0xff] }
  0x3a   :  { %3386 = vmatmul.mubr.f32.gmra.mxu0 %v21_v41  ;;  %3452 = vmatpush3.msra.mxu1 %v2706_v42  ;;  %v2783_v40 = vld [vmem:[%s6306_s1 + $0x1c0] sm:$0xff]  ;;  %v2683_v42 = vld [vmem:[%s6307_s0 + $0x110] sm:$0xff] }
  0x3b   :  { %3554 = vmatprep.subr.mxu0 %v4282_v0  ;;  %3453 = vmatprep.subr.mxu1 %v4282_v0  ;;  %v2822_v41 = vld [vmem:[%s6306_s1 + $0x240] sm:$0xff] }
  0x3c   :  { %3555 = vmatpush3.msra.mxu0 %v2744_v43  ;;  %3388 = vmatprep.mubr.msk.f32.mxu0 %vm4283_vm0, %v4282_v0  ;;  %v2721_v43 = vld [vmem:[%s6307_s0 + $0x41] sm:$0xff] }
  0x3d   :  { %3424 = vmatprep.mubr.msk.f32.mxu1 %vm4283_vm0, %v4282_v0  ;;  %3454 = vmatpush3.msra.mxu1 %v2705_v44  ;;  %v2782_v44 = vld [vmem:[%s6306_s1 + $0x1b8] sm:$0xff] }
  0x3e   :  { %3389 = vmatmul.mubr.f32.gmra.mxu0 %v22_v45  ;;  %3425 = vmatmul.mubr.f32.gmra.mxu1 %v34_v46  ;;  %v2821_v45 = vld [vmem:[%s6306_s1 + $0x238] sm:$0xff] }
  0x3f   :  { %3455 = vmatprep.subr.mxu1 %v4282_v0  ;;  %3556 = vmatprep.subr.mxu0 %v4282_v0  ;;  %v2684_v46 = vld [vmem:[%s6307_s0 + $0x118] sm:$0xff] }
  0x40   :  { %3456 = vmatpush3.msra.mxu1 %v2704_v47  ;;  %3557 = vmatpush3.msra.mxu0 %v2743_v48  ;;  %v2722_v47 = vld [vmem:[%s6307_s0 + $0x49] sm:$0xff] }
  0x41   :  { %3391 = vmatprep.mubr.msk.f32.mxu0 %vm4283_vm0, %v4282_v0  ;;  %3427 = vmatprep.mubr.msk.f32.mxu1 %vm4283_vm0, %v4282_v0  ;;  %v2781_v48 = vld [vmem:[%s6306_s1 + $0x1b0] sm:$0xff] }
  0x42   :  { %3457 = vmatprep.subr.mxu1 %v4282_v0  ;;  %3558 = vmatprep.subr.mxu0 %v4282_v0 }
  0x43   :  { %3392 = vmatmul.mubr.f32.gmra.mxu0 %v23_v49  ;;  %3428 = vmatmul.mubr.f32.gmra.mxu1 %v35_v50  ;;  %v2820_v49 = vld [vmem:[%s6306_s1 + $0x230] sm:$0xff]  ;;  %v2685_v50 = vld [vmem:[%s6307_s0 + $0x120] sm:$0xff] }
  0x44   :  { %3458 = vmatpush3.msra.mxu1 %v2703_v51  ;;  %3559 = vmatpush3.msra.mxu0 %v2742_v52  ;;  %v2723_v51 = vld [vmem:[%s6307_s0 + $0x51] sm:$0xff]  ;;  %v2780_v52 = vld [vmem:[%s6306_s1 + $0x1a8] sm:$0xff] }
  0x45   :  { %3459 = vmatprep.subr.mxu1 %v4282_v0  ;;  %3560 = vmatprep.subr.mxu0 %v4282_v0 }
  0x46   :  { %3394 = vmatprep.mubr.msk.f32.mxu0 %vm4283_vm0, %v4282_v0  ;;  %3430 = vmatprep.mubr.msk.f32.mxu1 %vm4283_vm0, %v4282_v0 }
  0x47   :  { %3460 = vmatpush3.msra.mxu1 %v2702_v53  ;;  %3561 = vmatpush3.msra.mxu0 %v2741_v54  ;;  %v2819_v53 = vld [vmem:[%s6306_s1 + $0x228] sm:$0xff] }
  0x48   :  { %3395 = vmatmul.mubr.f32.gmra.mxu0 %v24_v55  ;;  %3431 = vmatmul.mubr.f32.gmra.mxu1 %v36_v56  ;;  %v2686_v54 = vld [vmem:[%s6307_s0 + $0x128] sm:$0xff]  ;;  %v2724_v55 = vld [vmem:[%s6307_s0 + $0x59] sm:$0xff] }
  0x49   :  { %3461 = vmatprep.subr.mxu1 %v4282_v0  ;;  %3562 = vmatprep.subr.mxu0 %v4282_v0  ;;  %v2779_v56 = vld [vmem:[%s6306_s1 + $0x1a0] sm:$0xff] }
  0x4a   :  { %3462 = vmatpush3.msra.mxu1 %v2701_v57  ;;  %3563 = vmatpush3.msra.mxu0 %v2740_v58  ;;  %v2818_v57 = vld [vmem:[%s6306_s1 + $0x220] sm:$0xff]  ;;  %v2687_v58 = vld [vmem:[%s6307_s0 + $0x130] sm:$0xff] }
  0x4b   :  { %3397 = vmatprep.mubr.msk.f32.mxu0 %vm4283_vm0, %v4282_v0  ;;  %3433 = vmatprep.mubr.msk.f32.mxu1 %vm4283_vm0, %v4282_v0 }
  0x4c   :  { %3463 = vmatprep.subr.mxu1 %v4282_v0  ;;  %3398 = vmatmul.mubr.f32.gmra.mxu0 %v25_v59  ;;  %v2725_v59 = vld [vmem:[%s6307_s0 + $0x61] sm:$0xff] }
  0x4d   :  { %3434 = vmatmul.mubr.f32.gmra.mxu1 %v37_v60  ;;  %3564 = vmatprep.subr.mxu0 %v4282_v0  ;;  %v2778_v60 = vld [vmem:[%s6306_s1 + $0x198] sm:$0xff] }
  0x4e   :  { %3464 = vmatpush3.msra.mxu1 %v2700_v61  ;;  %3565 = vmatpush3.msra.mxu0 %v2739_v62  ;;  %v2817_v61 = vld [vmem:[%s6306_s1 + $0x218] sm:$0xff] }
  0x4f   :  { %3465 = vmatprep.subr.mxu1 %v4282_v0  ;;  %3400 = vmatprep.mubr.msk.f32.mxu0 %vm4283_vm0, %v4282_v0  ;;  %v2688_v62 = vld [vmem:[%s6307_s0 + $0x138] sm:$0xff] }
  0x50   :  { %3436 = vmatprep.mubr.msk.f32.mxu1 %vm4283_vm0, %v4282_v0  ;;  %3466 = vmatpush3.msra.mxu1 %v2699_v63  ;;  %v2726_v63 = vld [vmem:[%s6307_s0 + $0x69] sm:$0xff] }
  0x51   :  { %3566 = vmatprep.subr.mxu0 %v4282_v0  ;;  %3401 = vmatmul.mubr.f32.gmra.mxu0 %v26_v1  ;;  %v2777_v1 = vld [vmem:[%s6306_s1 + $0x190] sm:$0xff] }
  0x52   :  { %3437 = vmatmul.mubr.f32.gmra.mxu1 %v38_v2  ;;  %3467 = vmatprep.subr.mxu1 %v4282_v0  ;;  %v2816_v2 = vld [vmem:[%s6306_s1 + $0x210] sm:$0xff] }
  0x53   :  { %3567 = vmatpush3.msra.mxu0 %v2738_v3  ;;  %3468 = vmatpush3.msra.mxu1 %v2698_v4  ;;  %v2689_v3 = vld [vmem:[%s6307_s0 + $0x140] sm:$0xff]  ;;  %v2727_v4 = vld [vmem:[%s6307_s0 + $0x71] sm:$0xff] }
  0x54   :  { %3469 = vmatprep.subr.mxu1 %v4282_v0  ;;  %3568 = vmatprep.subr.mxu0 %v4282_v0 }
  0x55   :  { %3403 = vmatprep.mubr.msk.f32.mxu0 %vm4283_vm0, %v4282_v0  ;;  %3470 = vmatpush3.msra.mxu1 %v2697_v5  ;;  %v2776_v5 = vld [vmem:[%s6306_s1 + $0x188] sm:$0xff] }
  0x56   :  { %3471 = vmatprep.mubr.msk.f32.mxu1 %vm4283_vm0, %v4282_v0  ;;  %3569 = vmatpush3.msra.mxu0 %v2737_v6  ;;  %v2815_v6 = vld [vmem:[%s6306_s1 + $0x208] sm:$0xff] }
  0x57   :  { %3404 = vmatmul.mubr.f32.gmra.mxu0 %v27_v7  ;;  %3472 = vmatmul.mubr.f32.vlgmr.msra.gmra.mxu1 %v2674_v8  ;;  %v2690_v7 = vld [vmem:[%s6307_s0 + $0x148] sm:$0xff]  ;;  %v2728_v8 = vld [vmem:[%s6307_s0 + $0x79] sm:$0xff] }
  0x58   :  { %3570 = vmatprep.subr.mxu0 %v4282_v0  ;;  %3641 = vmatprep.subr.mxu1 %v4282_v0 }
  0x59   :  { %3571 = vmatpush3.msra.mxu0 %v2736_v9  ;;  %3474 = vmatprep.mubr.msk.f32.mxu1 %vm4283_vm0, %v4282_v0  ;;  %v2775_v9 = vld [vmem:[%s6306_s1 + $0x180] sm:$0xff] }
  0x5a   :  { %3572 = vmatprep.mubr.msk.f32.mxu0 %vm4283_vm0, %v4282_v0  ;;  %3642 = vmatpush3.msra.mxu1 %v2790_v10  ;;  %v2814_v10 = vld [vmem:[%s6306_s1 + $0x200] sm:$0xff] }
  0x5b   :  { %3475 = vmatmul.mubr.f32.gmra.mxu1 %v2675_v11  ;;  %3573 = vmatmul.mubr.f32.vlgmr.msra.gmra.mxu0 %v2713_v12  ;;  %v2691_v11 = vld [vmem:[%s6307_s0 + $0x150] sm:$0xff]  ;;  %v2729_v12 = vld [vmem:[%s6307_s0 + $0x81] sm:$0xff] }
  0x5c   :  { %3742 = vmatprep.subr.mxu0 %v4282_v0  ;;  %3477 = vmatprep.mubr.msk.f32.mxu1 %vm4283_vm0, %v4282_v0 }
  0x5d   :  { %3743 = vmatpush3.msra.mxu0 %v2829_v13  ;;  %3575 = vmatprep.mubr.msk.f32.mxu0 %vm4283_vm0, %v4282_v0  ;;  %v2692_v13 = vld [vmem:[%s6307_s0 + $0x158] sm:$0xff] }
  0x5e   :  { %3643 = vmatprep.subr.mxu1 %v4282_v0  ;;  %3744 = vmatprep.subr.mxu0 %v4282_v0 }
  0x5f   :  { %3478 = vmatmul.mubr.f32.gmra.mxu1 %v2676_v14  ;;  %3576 = vmatmul.mubr.f32.gmra.mxu0 %v4658_v15  ;;  %v2730_v14 = vld [vmem:[%s6307_s0 + $0x89] sm:$0xff] }
  0x60   :  { %3644 = vmatpush3.msra.mxu1 %v2789_v16  ;;  %3480 = vmatprep.mubr.msk.f32.mxu1 %vm4283_vm0, %v4282_v0  ;;  %v2693_v16 = vld [vmem:[%s6307_s0 + $0x160] sm:$0xff] }
  0x61   :  { %3578 = vmatprep.mubr.msk.f32.mxu0 %vm4283_vm0, %v4282_v0  ;;  %3745 = vmatpush3.msra.mxu0 %v2828_v17  ;;  %v2731_v17 = vld [vmem:[%s6307_s0 + $0x91] sm:$0xff] }
  0x62   :  { %3645 = vmatprep.subr.mxu1 %v4282_v0  ;;  %3746 = vmatprep.subr.mxu0 %v4282_v0 }
  0x63   :  { %3481 = vmatmul.mubr.f32.gmra.mxu1 %v2677_v18  ;;  %3579 = vmatmul.mubr.f32.gmra.mxu0 %v4679_v19  ;;  %v2694_v18 = vld [vmem:[%s6307_s0 + $0x168] sm:$0xff] }
  0x64   :  { %3483 = vmatprep.mubr.msk.f32.mxu1 %vm4283_vm0, %v4282_v0  ;;  %3581 = vmatprep.mubr.msk.f32.mxu0 %vm4283_vm0, %v4282_v0 }
  0x65   :  { %3646 = vmatpush3.msra.mxu1 %v2788_v20  ;;  %3747 = vmatpush3.msra.mxu0 %v2827_v21  ;;  %v2732_v20 = vld [vmem:[%s6307_s0 + $0x99] sm:$0xff]  ;;  %v2695_v21 = vld [vmem:[%s6307_s0 + $0x170] sm:$0xff] }
  0x66   :  { %3647 = vmatprep.subr.mxu1 %v4282_v0  ;;  %3748 = vmatprep.subr.mxu0 %v4282_v0 }
  0x67   :  { %3484 = vmatmul.mubr.f32.gmra.mxu1 %v2678_v22  ;;  %3582 = vmatmul.mubr.f32.gmra.mxu0 %v2716_v23  ;;  %v2733_v22 = vld [vmem:[%s6307_s0 + $0xa1] sm:$0xff]  ;;  %v2696_v23 = vld [vmem:[%s6307_s0 + $0x178] sm:$0xff] }
  0x68   :  { %3486 = vmatprep.mubr.msk.f32.mxu1 %vm4283_vm0, %v4282_v0  ;;  %3584 = vmatprep.mubr.msk.f32.mxu0 %vm4283_vm0, %v4282_v0 }
  0x69   :  { %3648 = vmatpush3.msra.mxu1 %v2787_v24  ;;  %3749 = vmatpush3.msra.mxu0 %v2826_v25  ;;  %v2734_v24 = vld [vmem:[%s6307_s0 + $0xa9] sm:$0xff]  ;;  %v2735_v25 = vld [vmem:[%s6307_s0 + $0xb1] sm:$0xff] }
  0x6a   :  { %3649 = vmatprep.subr.mxu1 %v4282_v0  ;;  %3750 = vmatprep.subr.mxu0 %v4282_v0 }
  0x6b   :  { %3487 = vmatmul.mubr.f32.gmra.mxu1 %v2679_v26  ;;  %3585 = vmatmul.mubr.f32.gmra.mxu0 %v2717_v27  ;;  %v2752_v26 = vld [vmem:[%s6307_s0 + $0x190] sm:$0xff]  ;;  %v2868_v27 = vld [vmem:[%s6306_s1 + $0x2f8] sm:$0xff] }
  0x6c   :  { %3489 = vmatprep.mubr.msk.f32.mxu1 %vm4283_vm0, %v4282_v0  ;;  %3587 = vmatprep.mubr.msk.f32.mxu0 %vm4283_vm0, %v4282_v0 }
  0x6d   :  { %3650 = vmatpush3.msra.mxu1 %v2786_v28  ;;  %3751 = vmatpush3.msra.mxu0 %v2825_v29  ;;  %v2753_v28 = vld [vmem:[%s6307_s0 + $0x198] sm:$0xff] }
  0x6e   :  { %3651 = vmatprep.subr.mxu1 %v4282_v0  ;;  %3752 = vmatprep.subr.mxu0 %v4282_v0  ;;  %v2791_v29 = vld [vmem:[%s6307_s0 + $0x258] sm:$0xff] }
  0x6f   :  { %3490 = vmatmul.mubr.f32.gmra.mxu1 %v2680_v30  ;;  %3588 = vmatmul.mubr.f32.gmra.mxu0 %v2718_v31  ;;  %v2907_v30 = vld [vmem:[%s6306_s1 + $0x378] sm:$0xff]  ;;  %v2867_v31 = vld [vmem:[%s6306_s1 + $0x2f0] sm:$0xff] }
  0x70   :  { %3492 = vmatprep.mubr.msk.f32.mxu1 %vm4283_vm0, %v4282_v0  ;;  %3590 = vmatprep.mubr.msk.f32.mxu0 %vm4283_vm0, %v4282_v0 }
  0x71   :  { %3652 = vmatpush3.msra.mxu1 %v2785_v32  ;;  %3753 = vmatpush3.msra.mxu0 %v2824_v33  ;;  %v2754_v32 = vld [vmem:[%s6307_s0 + $0x1a0] sm:$0xff] }
  0x72   :  { %3653 = vmatprep.subr.mxu1 %v4282_v0  ;;  %3754 = vmatprep.subr.mxu0 %v4282_v0  ;;  %v2792_v33 = vld [vmem:[%s6307_s0 + $0x260] sm:$0xff] }
  0x73   :  { %3493 = vmatmul.mubr.f32.gmra.mxu1 %v2681_v34  ;;  %3591 = vmatmul.mubr.f32.gmra.mxu0 %v2719_v35  ;;  %v2906_v34 = vld [vmem:[%s6306_s1 + $0x370] sm:$0xff]  ;;  %v2866_v35 = vld [vmem:[%s6306_s1 + $0x2e8] sm:$0xff] }
  0x74   :  { %3495 = vmatprep.mubr.msk.f32.mxu1 %vm4283_vm0, %v4282_v0  ;;  %3593 = vmatprep.mubr.msk.f32.mxu0 %vm4283_vm0, %v4282_v0 }
  0x75   :  { %3654 = vmatpush3.msra.mxu1 %v2784_v36  ;;  %3755 = vmatpush3.msra.mxu0 %v2823_v37  ;;  %v2755_v36 = vld [vmem:[%s6307_s0 + $0x1a8] sm:$0xff] }
  0x76   :  { %3655 = vmatprep.subr.mxu1 %v4282_v0  ;;  %3756 = vmatprep.subr.mxu0 %v4282_v0  ;;  %v2793_v37 = vld [vmem:[%s6307_s0 + $0x268] sm:$0xff] }
  0x77   :  { %3496 = vmatmul.mubr.f32.gmra.mxu1 %v2682_v38  ;;  %3594 = vmatmul.mubr.f32.gmra.mxu0 %v2720_v39  ;;  %v2905_v38 = vld [vmem:[%s6306_s1 + $0x368] sm:$0xff]  ;;  %v2865_v39 = vld [vmem:[%s6306_s1 + $0x2e0] sm:$0xff] }
  0x78   :  { %3498 = vmatprep.mubr.msk.f32.mxu1 %vm4283_vm0, %v4282_v0  ;;  %3596 = vmatprep.mubr.msk.f32.mxu0 %vm4283_vm0, %v4282_v0 }
  0x79   :  { %3656 = vmatpush3.msra.mxu1 %v2783_v40  ;;  %3757 = vmatpush3.msra.mxu0 %v2822_v41  ;;  %v2756_v40 = vld [vmem:[%s6307_s0 + $0x1b0] sm:$0xff] }
  0x7a   :  { %3657 = vmatprep.subr.mxu1 %v4282_v0  ;;  %3758 = vmatprep.subr.mxu0 %v4282_v0  ;;  %v2794_v41 = vld [vmem:[%s6307_s0 + $0x270] sm:$0xff] }
  0x7b   :  { %3499 = vmatmul.mubr.f32.gmra.mxu1 %v2683_v42  ;;  %3597 = vmatmul.mubr.f32.gmra.mxu0 %v2721_v43  ;;  %v2904_v42 = vld [vmem:[%s6306_s1 + $0x360] sm:$0xff]  ;;  %v2864_v43 = vld [vmem:[%s6306_s1 + $0x2d8] sm:$0xff] }
  0x7c   :  { %3501 = vmatprep.mubr.msk.f32.mxu1 %vm4283_vm0, %v4282_v0  ;;  %3599 = vmatprep.mubr.msk.f32.mxu0 %vm4283_vm0, %v4282_v0 }
  0x7d   :  { %3658 = vmatpush3.msra.mxu1 %v2782_v44  ;;  %3759 = vmatpush3.msra.mxu0 %v2821_v45  ;;  %v2757_v44 = vld [vmem:[%s6307_s0 + $0x1b8] sm:$0xff] }
  0x7e   :  { %3659 = vmatprep.subr.mxu1 %v4282_v0  ;;  %3760 = vmatprep.subr.mxu0 %v4282_v0  ;;  %v2795_v45 = vld [vmem:[%s6307_s0 + $0x278] sm:$0xff] }
  0x7f   :  { %3502 = vmatmul.mubr.f32.gmra.mxu1 %v2684_v46  ;;  %3600 = vmatmul.mubr.f32.gmra.mxu0 %v2722_v47  ;;  %v2903_v46 = vld [vmem:[%s6306_s1 + $0x358] sm:$0xff]  ;;  %v2863_v47 = vld [vmem:[%s6306_s1 + $0x2d0] sm:$0xff] }
  0x80   :  { %3504 = vmatprep.mubr.msk.f32.mxu1 %vm4283_vm0, %v4282_v0  ;;  %3602 = vmatprep.mubr.msk.f32.mxu0 %vm4283_vm0, %v4282_v0 }
  0x81   :  { %3660 = vmatpush3.msra.mxu1 %v2781_v48  ;;  %3761 = vmatpush3.msra.mxu0 %v2820_v49  ;;  %v2758_v48 = vld [vmem:[%s6307_s0 + $0x1c0] sm:$0xff] }
  0x82   :  { %3661 = vmatprep.subr.mxu1 %v4282_v0  ;;  %3762 = vmatprep.subr.mxu0 %v4282_v0  ;;  %v2796_v49 = vld [vmem:[%s6307_s0 + $0x280] sm:$0xff] }
  0x83   :  { %3505 = vmatmul.mubr.f32.gmra.mxu1 %v2685_v50  ;;  %3603 = vmatmul.mubr.f32.gmra.mxu0 %v2723_v51  ;;  %v2902_v50 = vld [vmem:[%s6306_s1 + $0x350] sm:$0xff]  ;;  %v2862_v51 = vld [vmem:[%s6306_s1 + $0x2c8] sm:$0xff] }
  0x84   :  { %3507 = vmatprep.mubr.msk.f32.mxu1 %vm4283_vm0, %v4282_v0  ;;  %3605 = vmatprep.mubr.msk.f32.mxu0 %vm4283_vm0, %v4282_v0 }
  0x85   :  { %3662 = vmatpush3.msra.mxu1 %v2780_v52  ;;  %3763 = vmatpush3.msra.mxu0 %v2819_v53  ;;  %v2759_v52 = vld [vmem:[%s6307_s0 + $0x1c8] sm:$0xff] }
  0x86   :  { %3663 = vmatprep.subr.mxu1 %v4282_v0  ;;  %3764 = vmatprep.subr.mxu0 %v4282_v0  ;;  %v2797_v53 = vld [vmem:[%s6307_s0 + $0x288] sm:$0xff] }
  0x87   :  { %3508 = vmatmul.mubr.f32.gmra.mxu1 %v2686_v54  ;;  %3606 = vmatmul.mubr.f32.gmra.mxu0 %v2724_v55  ;;  %v2901_v54 = vld [vmem:[%s6306_s1 + $0x348] sm:$0xff]  ;;  %v2861_v55 = vld [vmem:[%s6306_s1 + $0x2c0] sm:$0xff] }
  0x88   :  { %3510 = vmatprep.mubr.msk.f32.mxu1 %vm4283_vm0, %v4282_v0  ;;  %3608 = vmatprep.mubr.msk.f32.mxu0 %vm4283_vm0, %v4282_v0 }
  0x89   :  { %3664 = vmatpush3.msra.mxu1 %v2779_v56  ;;  %3765 = vmatpush3.msra.mxu0 %v2818_v57  ;;  %v2760_v56 = vld [vmem:[%s6307_s0 + $0x1d0] sm:$0xff] }
  0x8a   :  { %3665 = vmatprep.subr.mxu1 %v4282_v0  ;;  %3766 = vmatprep.subr.mxu0 %v4282_v0  ;;  %v2798_v57 = vld [vmem:[%s6307_s0 + $0x290] sm:$0xff] }
  0x8b   :  { %3511 = vmatmul.mubr.f32.gmra.mxu1 %v2687_v58  ;;  %3609 = vmatmul.mubr.f32.gmra.mxu0 %v2725_v59  ;;  %v2900_v58 = vld [vmem:[%s6306_s1 + $0x340] sm:$0xff]  ;;  %v2860_v59 = vld [vmem:[%s6306_s1 + $0x2b8] sm:$0xff] }
  0x8c   :  { %3513 = vmatprep.mubr.msk.f32.mxu1 %vm4283_vm0, %v4282_v0  ;;  %3611 = vmatprep.mubr.msk.f32.mxu0 %vm4283_vm0, %v4282_v0 }
  0x8d   :  { %3666 = vmatpush3.msra.mxu1 %v2778_v60  ;;  %3767 = vmatpush3.msra.mxu0 %v2817_v61  ;;  %v2761_v60 = vld [vmem:[%s6307_s0 + $0x1d8] sm:$0xff] }
  0x8e   :  { %3667 = vmatprep.subr.mxu1 %v4282_v0  ;;  %3768 = vmatprep.subr.mxu0 %v4282_v0  ;;  %v2799_v61 = vld [vmem:[%s6307_s0 + $0x298] sm:$0xff] }
  0x8f   :  { %3514 = vmatmul.mubr.f32.gmra.mxu1 %v2688_v62  ;;  %3612 = vmatmul.mubr.f32.gmra.mxu0 %v2726_v63  ;;  %v2899_v62 = vld [vmem:[%s6306_s1 + $0x338] sm:$0xff]  ;;  %v2859_v63 = vld [vmem:[%s6306_s1 + $0x2b0] sm:$0xff] }
  0x90   :  { %3516 = vmatprep.mubr.msk.f32.mxu1 %vm4283_vm0, %v4282_v0  ;;  %3614 = vmatprep.mubr.msk.f32.mxu0 %vm4283_vm0, %v4282_v0 }
  0x91   :  { %3668 = vmatpush3.msra.mxu1 %v2777_v1  ;;  %3769 = vmatpush3.msra.mxu0 %v2816_v2  ;;  %v2762_v1 = vld [vmem:[%s6307_s0 + $0x1e0] sm:$0xff] }
  0x92   :  { %3669 = vmatprep.subr.mxu1 %v4282_v0  ;;  %3770 = vmatprep.subr.mxu0 %v4282_v0  ;;  %v2800_v2 = vld [vmem:[%s6307_s0 + $0x2a0] sm:$0xff] }
  0x93   :  { %3517 = vmatmul.mubr.f32.gmra.mxu1 %v2689_v3  ;;  %3615 = vmatmul.mubr.f32.gmra.mxu0 %v2727_v4  ;;  %v2898_v3 = vld [vmem:[%s6306_s1 + $0x330] sm:$0xff]  ;;  %v2858_v4 = vld [vmem:[%s6306_s1 + $0x2a8] sm:$0xff] }
  0x94   :  { %3519 = vmatprep.mubr.msk.f32.mxu1 %vm4283_vm0, %v4282_v0  ;;  %3617 = vmatprep.mubr.msk.f32.mxu0 %vm4283_vm0, %v4282_v0 }
  0x95   :  { %3670 = vmatpush3.msra.mxu1 %v2776_v5  ;;  %3771 = vmatpush3.msra.mxu0 %v2815_v6  ;;  %v2763_v5 = vld [vmem:[%s6307_s0 + $0x1e8] sm:$0xff] }
  0x96   :  { %3671 = vmatprep.subr.mxu1 %v4282_v0  ;;  %3772 = vmatprep.subr.mxu0 %v4282_v0  ;;  %v2801_v6 = vld [vmem:[%s6307_s0 + $0x2a8] sm:$0xff] }
  0x97   :  { %3520 = vmatmul.mubr.f32.gmra.mxu1 %v2690_v7  ;;  %3618 = vmatmul.mubr.f32.gmra.mxu0 %v2728_v8  ;;  %v2897_v7 = vld [vmem:[%s6306_s1 + $0x328] sm:$0xff]  ;;  %v2857_v8 = vld [vmem:[%s6306_s1 + $0x2a0] sm:$0xff] }
  0x98   :  { %3522 = vmatprep.mubr.msk.f32.mxu1 %vm4283_vm0, %v4282_v0  ;;  %3620 = vmatprep.mubr.msk.f32.mxu0 %vm4283_vm0, %v4282_v0 }
  0x99   :  { %3672 = vmatpush3.msra.mxu1 %v2775_v9  ;;  %3773 = vmatpush3.msra.mxu0 %v2814_v10  ;;  %v2764_v9 = vld [vmem:[%s6307_s0 + $0x1f0] sm:$0xff] }
  0x9a   :  { %3843 = vmatprep.subr.mxu1 %v4282_v0  ;;  %3944 = vmatprep.subr.mxu0 %v4282_v0  ;;  %v2802_v10 = vld [vmem:[%s6307_s0 + $0x2b0] sm:$0xff] }
  0x9b   :  { %3523 = vmatmul.mubr.f32.gmra.mxu1 %v2691_v11  ;;  %3621 = vmatmul.mubr.f32.gmra.mxu0 %v2729_v12 }
  0x9c   :  { %3525 = vmatprep.mubr.msk.f32.mxu1 %vm4283_vm0, %v4282_v0  ;;  %3623 = vmatprep.mubr.msk.f32.mxu0 %vm4283_vm0, %v4282_v0 }
  0x9f   :  { %3526 = vmatmul.mubr.f32.gmra.mxu1 %v2692_v13  ;;  %3624 = vmatmul.mubr.f32.gmra.mxu0 %v2730_v14  ;;  %v2896_v13 = vld [vmem:[%s6306_s1 + $0x320] sm:$0xff]  ;;  %v2856_v14 = vld [vmem:[%s6306_s1 + $0x298] sm:$0xff] }
  0xa0   :  { %3528 = vmatprep.mubr.msk.f32.mxu1 %vm4283_vm0, %v4282_v0  ;;  %3626 = vmatprep.mubr.msk.f32.mxu0 %vm4283_vm0, %v4282_v0 }
  0xa3   :  { %3529 = vmatmul.mubr.f32.gmra.mxu1 %v2693_v16  ;;  %3627 = vmatmul.mubr.f32.gmra.mxu0 %v2731_v17  ;;  %v2765_v16 = vld [vmem:[%s6307_s0 + $0x1f8] sm:$0xff] }
  0xa4   :  { %3531 = vmatprep.mubr.msk.f32.mxu1 %vm4283_vm0, %v4282_v0  ;;  %3629 = vmatprep.mubr.msk.f32.mxu0 %vm4283_vm0, %v4282_v0  ;;  %v2803_v17 = vld [vmem:[%s6307_s0 + $0x2b8] sm:$0xff] }
  0xa7   :  { %3532 = vmatmul.mubr.f32.gmra.mxu1 %v2694_v18  ;;  %3630 = vmatmul.mubr.f32.gmra.mxu0 %v2732_v20 }
  0xa8   :  { %3534 = vmatprep.mubr.msk.f32.mxu1 %vm4283_vm0, %v4282_v0  ;;  %3632 = vmatprep.mubr.msk.f32.mxu0 %vm4283_vm0, %v4282_v0 }
  0xab   :  { %3535 = vmatmul.mubr.f32.gmra.mxu1 %v2695_v21  ;;  %3633 = vmatmul.mubr.f32.gmra.mxu0 %v2733_v22  ;;  %v2895_v22 = vld [vmem:[%s6306_s1 + $0x318] sm:$0xff] }
  0xac   :  { %3537 = vmatprep.mubr.msk.f32.mxu1 %vm4283_vm0, %v4282_v0  ;;  %3635 = vmatprep.mubr.msk.f32.mxu0 %vm4283_vm0, %v4282_v0 }
  0xaf   :  { %3538 = vmatmul.mubr.f32.gmra.mxu1 %v2696_v23  ;;  %3636 = vmatmul.mubr.f32.gmra.mxu0 %v2734_v24  ;;  %v2855_v23 = vld [vmem:[%s6306_s1 + $0x290] sm:$0xff] }
  0xb0   :  { %3638 = vmatprep.mubr.msk.f32.mxu0 %vm4283_vm0, %v4282_v0  ;;  %3673 = vmatprep.mubr.msk.f32.mxu1 %vm4283_vm0, %v4282_v0 }
  0xb3   :  { %3639 = vmatmul.mubr.f32.gmra.mxu0 %v2735_v25  ;;  %3674 = vmatmul.mubr.f32.vlgmr.msra.gmra.mxu1 %v2752_v26  ;;  %v2766_v25 = vld [vmem:[%s6307_s0 + $0x200] sm:$0xff] }
  0xb4   :  { %3676 = vmatprep.mubr.msk.f32.mxu1 %vm4283_vm0, %v4282_v0  ;;  %3774 = vmatprep.mubr.msk.f32.mxu0 %vm4283_vm0, %v4282_v0  ;;  %v2804_v26 = vld [vmem:[%s6307_s0 + $0x2c0] sm:$0xff] }
  0xb5   :  { %3844 = vmatpush3.msra.mxu1 %v2868_v27 }
  0xb6   :  { %3845 = vmatprep.subr.mxu1 %v4282_v0 }
  0xb7   :  { %3677 = vmatmul.mubr.f32.gmra.mxu1 %v2753_v28  ;;  %3775 = vmatmul.mubr.f32.vlgmr.msra.gmra.mxu0 %v2791_v29  ;;  %v2894_v29 = vld [vmem:[%s6306_s1 + $0x310] sm:$0xff] }
  0xb8   :  { %3945 = vmatpush3.msra.mxu0 %v2907_v30  ;;  %3679 = vmatprep.mubr.msk.f32.mxu1 %vm4283_vm0, %v4282_v0  ;;  %v2854_v30 = vld [vmem:[%s6306_s1 + $0x288] sm:$0xff] }
  0xb9   :  { %3777 = vmatprep.mubr.msk.f32.mxu0 %vm4283_vm0, %v4282_v0  ;;  %3846 = vmatpush3.msra.mxu1 %v2867_v31 }
  0xba   :  { %3946 = vmatprep.subr.mxu0 %v4282_v0  ;;  %3847 = vmatprep.subr.mxu1 %v4282_v0 }
  0xbb   :  { %3680 = vmatmul.mubr.f32.gmra.mxu1 %v2754_v32  ;;  %3778 = vmatmul.mubr.f32.gmra.mxu0 %v2792_v33  ;;  %v2767_v33 = vld [vmem:[%s6307_s0 + $0x208] sm:$0xff] }
  0xbc   :  { %3682 = vmatprep.mubr.msk.f32.mxu1 %vm4283_vm0, %v4282_v0  ;;  %3780 = vmatprep.mubr.msk.f32.mxu0 %vm4283_vm0, %v4282_v0 }
  0xbd   :  { %3947 = vmatpush3.msra.mxu0 %v2906_v34  ;;  %3848 = vmatpush3.msra.mxu1 %v2866_v35  ;;  %v2805_v34 = vld [vmem:[%s6307_s0 + $0x2c8] sm:$0xff] }
  0xbe   :  { %3948 = vmatprep.subr.mxu0 %v4282_v0  ;;  %3849 = vmatprep.subr.mxu1 %v4282_v0 }
  0xbf   :  { %3683 = vmatmul.mubr.f32.gmra.mxu1 %v2755_v36  ;;  %3781 = vmatmul.mubr.f32.gmra.mxu0 %v2793_v37  ;;  %v2893_v37 = vld [vmem:[%s6306_s1 + $0x308] sm:$0xff] }
  0xc0   :  { %3685 = vmatprep.mubr.msk.f32.mxu1 %vm4283_vm0, %v4282_v0  ;;  %3783 = vmatprep.mubr.msk.f32.mxu0 %vm4283_vm0, %v4282_v0 }
  0xc1   :  { %3949 = vmatpush3.msra.mxu0 %v2905_v38  ;;  %3850 = vmatpush3.msra.mxu1 %v2865_v39  ;;  %v2853_v38 = vld [vmem:[%s6306_s1 + $0x280] sm:$0xff] }
  0xc2   :  { %3950 = vmatprep.subr.mxu0 %v4282_v0  ;;  %3851 = vmatprep.subr.mxu1 %v4282_v0 }
  0xc3   :  { %3686 = vmatmul.mubr.f32.gmra.mxu1 %v2756_v40  ;;  %3784 = vmatmul.mubr.f32.gmra.mxu0 %v2794_v41  ;;  %v2768_v40 = vld [vmem:[%s6307_s0 + $0x210] sm:$0xff] }
  0xc4   :  { %3688 = vmatprep.mubr.msk.f32.mxu1 %vm4283_vm0, %v4282_v0  ;;  %3786 = vmatprep.mubr.msk.f32.mxu0 %vm4283_vm0, %v4282_v0  ;;  %v2806_v41 = vld [vmem:[%s6307_s0 + $0x2d0] sm:$0xff] }
  0xc5   :  { %3951 = vmatpush3.msra.mxu0 %v2904_v42  ;;  %3852 = vmatpush3.msra.mxu1 %v2864_v43 }
  0xc6   :  { %3952 = vmatprep.subr.mxu0 %v4282_v0  ;;  %3853 = vmatprep.subr.mxu1 %v4282_v0 }
  0xc7   :  { %3689 = vmatmul.mubr.f32.gmra.mxu1 %v2757_v44  ;;  %3787 = vmatmul.mubr.f32.gmra.mxu0 %v2795_v45  ;;  %v2892_v45 = vld [vmem:[%s6306_s1 + $0x300] sm:$0xff] }
  0xc8   :  { %3691 = vmatprep.mubr.msk.f32.mxu1 %vm4283_vm0, %v4282_v0  ;;  %3789 = vmatprep.mubr.msk.f32.mxu0 %vm4283_vm0, %v4282_v0 }
  0xc9   :  { %3953 = vmatpush3.msra.mxu0 %v2903_v46  ;;  %3854 = vmatpush3.msra.mxu1 %v2863_v47  ;;  %v2769_v46 = vld [vmem:[%s6307_s0 + $0x218] sm:$0xff] }
  0xca   :  { %3954 = vmatprep.subr.mxu0 %v4282_v0  ;;  %3855 = vmatprep.subr.mxu1 %v4282_v0  ;;  %v2807_v47 = vld [vmem:[%s6307_s0 + $0x2d8] sm:$0xff] }
  0xcb   :  { %3692 = vmatmul.mubr.f32.gmra.mxu1 %v2758_v48  ;;  %3790 = vmatmul.mubr.f32.gmra.mxu0 %v2796_v49 }
  0xcc   :  { %3694 = vmatprep.mubr.msk.f32.mxu1 %vm4283_vm0, %v4282_v0  ;;  %3792 = vmatprep.mubr.msk.f32.mxu0 %vm4283_vm0, %v4282_v0 }
  0xcd   :  { %3955 = vmatpush3.msra.mxu0 %v2902_v50  ;;  %3856 = vmatpush3.msra.mxu1 %v2862_v51 }
  0xce   :  { %3956 = vmatprep.subr.mxu0 %v4282_v0  ;;  %3857 = vmatprep.subr.mxu1 %v4282_v0 }
  0xcf   :  { %3695 = vmatmul.mubr.f32.gmra.mxu1 %v2759_v52  ;;  %3793 = vmatmul.mubr.f32.gmra.mxu0 %v2797_v53  ;;  %v2770_v52 = vld [vmem:[%s6307_s0 + $0x220] sm:$0xff] }
  0xd0   :  { %3697 = vmatprep.mubr.msk.f32.mxu1 %vm4283_vm0, %v4282_v0  ;;  %3795 = vmatprep.mubr.msk.f32.mxu0 %vm4283_vm0, %v4282_v0  ;;  %v2808_v53 = vld [vmem:[%s6307_s0 + $0x2e0] sm:$0xff] }
  0xd1   :  { %3957 = vmatpush3.msra.mxu0 %v2901_v54  ;;  %3858 = vmatpush3.msra.mxu1 %v2861_v55 }
  0xd2   :  { %3958 = vmatprep.subr.mxu0 %v4282_v0  ;;  %3859 = vmatprep.subr.mxu1 %v4282_v0 }
  0xd3   :  { %3698 = vmatmul.mubr.f32.gmra.mxu1 %v2760_v56  ;;  %3796 = vmatmul.mubr.f32.gmra.mxu0 %v2798_v57  ;;  %v2771_v57 = vld [vmem:[%s6307_s0 + $0x228] sm:$0xff] }
  0xd4   :  { %3700 = vmatprep.mubr.msk.f32.mxu1 %vm4283_vm0, %v4282_v0  ;;  %3798 = vmatprep.mubr.msk.f32.mxu0 %vm4283_vm0, %v4282_v0 }
  0xd5   :  { %3959 = vmatpush3.msra.mxu0 %v2900_v58  ;;  %3860 = vmatpush3.msra.mxu1 %v2860_v59  ;;  %v2809_v58 = vld [vmem:[%s6307_s0 + $0x2e8] sm:$0xff] }
  0xd6   :  { %3960 = vmatprep.subr.mxu0 %v4282_v0  ;;  %3861 = vmatprep.subr.mxu1 %v4282_v0 }
  0xd7   :  { %3701 = vmatmul.mubr.f32.gmra.mxu1 %v2761_v60  ;;  %3799 = vmatmul.mubr.f32.gmra.mxu0 %v2799_v61 }
  0xd8   :  { %3703 = vmatprep.mubr.msk.f32.mxu1 %vm4283_vm0, %v4282_v0  ;;  %3801 = vmatprep.mubr.msk.f32.mxu0 %vm4283_vm0, %v4282_v0 }
  0xd9   :  { %3961 = vmatpush3.msra.mxu0 %v2899_v62  ;;  %3862 = vmatpush3.msra.mxu1 %v2859_v63  ;;  %v2772_v62 = vld [vmem:[%s6307_s0 + $0x230] sm:$0xff] }
  0xda   :  { %3962 = vmatprep.subr.mxu0 %v4282_v0  ;;  %3863 = vmatprep.subr.mxu1 %v4282_v0  ;;  %v2810_v63 = vld [vmem:[%s6307_s0 + $0x2f0] sm:$0xff] }
  0xdb   :  { %3704 = vmatmul.mubr.f32.gmra.mxu1 %v2762_v1  ;;  %3802 = vmatmul.mubr.f32.gmra.mxu0 %v2800_v2 }
  0xdc   :  { %3706 = vmatprep.mubr.msk.f32.mxu1 %vm4283_vm0, %v4282_v0  ;;  %3804 = vmatprep.mubr.msk.f32.mxu0 %vm4283_vm0, %v4282_v0 }
  0xdd   :  { %3963 = vmatpush3.msra.mxu0 %v2898_v3  ;;  %3864 = vmatpush3.msra.mxu1 %v2858_v4 }
  0xde   :  { %3964 = vmatprep.subr.mxu0 %v4282_v0  ;;  %3865 = vmatprep.subr.mxu1 %v4282_v0 }
  0xdf   :  { %3707 = vmatmul.mubr.f32.gmra.mxu1 %v2763_v5  ;;  %3805 = vmatmul.mubr.f32.gmra.mxu0 %v2801_v6  ;;  %v2773_v5 = vld [vmem:[%s6307_s0 + $0x238] sm:$0xff] }
  0xe0   :  { %3709 = vmatprep.mubr.msk.f32.mxu1 %vm4283_vm0, %v4282_v0  ;;  %3807 = vmatprep.mubr.msk.f32.mxu0 %vm4283_vm0, %v4282_v0  ;;  %v2811_v6 = vld [vmem:[%s6307_s0 + $0x2f8] sm:$0xff] }
  0xe1   :  { %3965 = vmatpush3.msra.mxu0 %v2897_v7  ;;  %3866 = vmatpush3.msra.mxu1 %v2857_v8 }
  0xe2   :  { %v5208_v11 = vpop.f32.mrf.mxu0  ;;  %v5210_v12 = vpop.f32.mrf.mxu1  ;;  %3966 = vmatprep.subr.mxu0 %v4282_v0  ;;  %3867 = vmatprep.subr.mxu1 %v4282_v0 }
  0xe3   :  { %3710 = vmatmul.mubr.f32.gmra.mxu1 %v2764_v9  ;;  %3808 = vmatmul.mubr.f32.gmra.mxu0 %v2802_v10 }
  0xe4   :  { %3712 = vmatprep.mubr.msk.f32.mxu1 %vm4283_vm0, %v4282_v0  ;;  %3810 = vmatprep.mubr.msk.f32.mxu0 %vm4283_vm0, %v4282_v0  ;;  %v3372_v18 = vpop.f32.mrf.mxu0  ;;  %v3408_v20 = vpop.f32.mrf.mxu1 }
  0xe5   :  { %3967 = vmatpush3.msra.mxu0 %v2896_v13  ;;  %3868 = vmatpush3.msra.mxu1 %v2856_v14  ;;  %v2774_v13 = vld [vmem:[%s6307_s0 + $0x240] sm:$0xff]  ;;  %v2813_v20 = vld [vmem:[%s6307_s0 + $0x308] sm:$0xff] }
  0xe6   :  { %v5230_v21 = vpop.f32.mrf.mxu0  ;;  %3968 = vmatprep.subr.mxu0 %v4282_v0  ;;  %3869 = vmatprep.subr.mxu1 %v4282_v0  ;;  %v2812_v14 = vld [vmem:[%s6307_s0 + $0x300] sm:$0xff] }
  0xe7   :  { %3713 = vmatmul.mubr.f32.gmra.mxu1 %v2765_v16  ;;  %3811 = vmatmul.mubr.f32.gmra.mxu0 %v2803_v17  ;;  %v5240_v24 = vpop.f32.mrf.mxu1 }
  0xe8   :  { %3715 = vmatprep.mubr.msk.f32.mxu1 %vm4283_vm0, %v4282_v0  ;;  %3813 = vmatprep.mubr.msk.f32.mxu0 %vm4283_vm0, %v4282_v0  ;;  %v3375_v27 = vpop.f32.mrf.mxu0 }
  0xe9   :  { %v3411_v28 = vpop.f32.mrf.mxu1  ;;  %3969 = vmatpush3.msra.mxu0 %v2895_v22  ;;  %3870 = vmatpush3.msra.mxu1 %v2855_v23  ;;  %v2830_v22 = vld [vmem:[%s6307_s0 + $0x191] sm:$0xff] }
  0xea   :  { %3970 = vmatprep.subr.mxu0 %v4282_v0  ;;  %3871 = vmatprep.subr.mxu1 %v4282_v0  ;;  %v2831_v28 = vld [vmem:[%s6307_s0 + $0x199] sm:$0xff] }
  0xeb   :  { %3716 = vmatmul.mubr.f32.gmra.mxu1 %v2766_v25  ;;  %3814 = vmatmul.mubr.f32.gmra.mxu0 %v2804_v26  ;;  %v5260_v31 = vpop.f32.mrf.mxu0  ;;  %v5262_v32 = vpop.f32.mrf.mxu1  ;;  %v2946_v26 = vld [vmem:[%s6306_s1 + $0x3f8] sm:$0xff] }
  0xec   :  { %3718 = vmatprep.mubr.msk.f32.mxu1 %vm4283_vm0, %v4282_v0  ;;  %3816 = vmatprep.mubr.msk.f32.mxu0 %vm4283_vm0, %v4282_v0 }
  0xed   :  { %v3378_v35 = vpop.f32.mrf.mxu0  ;;  %v3414_v36 = vpop.f32.mrf.mxu1  ;;  %3971 = vmatpush3.msra.mxu0 %v2894_v29  ;;  %3872 = vmatpush3.msra.mxu1 %v2854_v30  ;;  %v2985_v30 = vld [vmem:[%s6306_s1 + $0x478] sm:$0xff] }
  0xee   :  { %3972 = vmatprep.subr.mxu0 %v4282_v0  ;;  %3873 = vmatprep.subr.mxu1 %v4282_v0 }
  0xef   :  { %3719 = vmatmul.mubr.f32.gmra.mxu1 %v2767_v33  ;;  %3817 = vmatmul.mubr.f32.gmra.mxu0 %v2805_v34  ;;  %v5282_v39 = vpop.f32.mrf.mxu0  ;;  %v2945_v34 = vld [vmem:[%s6306_s1 + $0x3f0] sm:$0xff] }
  0xf0   :  { %3721 = vmatprep.mubr.msk.f32.mxu1 %vm4283_vm0, %v4282_v0  ;;  %3819 = vmatprep.mubr.msk.f32.mxu0 %vm4283_vm0, %v4282_v0  ;;  %v5294_v42 = vpop.f32.mrf.mxu1 }
  0xf1   :  { %v3381_v43 = vpop.f32.mrf.mxu0  ;;  %3973 = vmatpush3.msra.mxu0 %v2893_v37  ;;  %3874 = vmatpush3.msra.mxu1 %v2853_v38  ;;  %v2832_v37 = vld [vmem:[%s6307_s0 + $0x1a1] sm:$0xff] }
  0xf2   :  { %v3417_v44 = vpop.f32.mrf.mxu1  ;;  %3974 = vmatprep.subr.mxu0 %v4282_v0  ;;  %4045 = vmatprep.subr.mxu1 %v4282_v0  ;;  %v2944_v38 = vld [vmem:[%s6306_s1 + $0x3e8] sm:$0xff] }
  0xf3   :  { %3722 = vmatmul.mubr.f32.gmra.mxu1 %v2768_v40  ;;  %3820 = vmatmul.mubr.f32.gmra.mxu0 %v2806_v41  ;;  %v2833_v44 = vld [vmem:[%s6307_s0 + $0x1a9] sm:$0xff] }
  0xf4   :  { %3724 = vmatprep.mubr.msk.f32.mxu1 %vm4283_vm0, %v4282_v0  ;;  %3822 = vmatprep.mubr.msk.f32.mxu0 %vm4283_vm0, %v4282_v0  ;;  %v5311_v48 = vpop.f32.mrf.mxu0 }
  0xf5   :  { %v5313_v49 = vpop.f32.mrf.mxu1  ;;  %3975 = vmatpush3.msra.mxu0 %v2892_v45 }
  0xf6   :  { %v3384_v50 = vpop.f32.mrf.mxu0  ;;  %4146 = vmatprep.subr.mxu0 %v4282_v0 }
  0xf7   :  { %3725 = vmatmul.mubr.f32.gmra.mxu1 %v2769_v46  ;;  %3823 = vmatmul.mubr.f32.gmra.mxu0 %v2807_v47  ;;  %v3420_v51 = vpop.f32.mrf.mxu1 }
  0xf8   :  { %3727 = vmatprep.mubr.msk.f32.mxu1 %vm4283_vm0, %v4282_v0  ;;  %3825 = vmatprep.mubr.msk.f32.mxu0 %vm4283_vm0, %v4282_v0  ;;  %v4281_v51 = vld [vmem:[%s6307_s0 + $0x19] sm:$0xff] }
  0xf9   :  { %v5326_v54 = vpop.f32.mrf.mxu1 }
  0xfa   :  { %v5328_v55 = vpop.f32.mrf.mxu0 }
  0xfb   :  { %3728 = vmatmul.mubr.f32.gmra.mxu1 %v2770_v52  ;;  %3826 = vmatmul.mubr.f32.gmra.mxu0 %v2808_v53  ;;  %v3423_v56 = vpop.f32.mrf.mxu1 }
  0xfc   :  { %3730 = vmatprep.mubr.msk.f32.mxu1 %vm4283_vm0, %v4282_v0  ;;  %3828 = vmatprep.mubr.msk.f32.mxu0 %vm4283_vm0, %v4282_v0  ;;  %v3387_v59 = vpop.f32.mrf.mxu0  ;;  %v2834_v56 = vld [vmem:[%s6307_s0 + $0x1b1] sm:$0xff] }
  0xfe   :  { %v5340_v60 = vpop.f32.mrf.mxu0  ;;  %v5342_v61 = vpop.f32.mrf.mxu1 }
  0xff   :  { %3731 = vmatmul.mubr.f32.gmra.mxu1 %v2771_v57  ;;  %3829 = vmatmul.mubr.f32.gmra.mxu0 %v2809_v58  ;;  %v2872_v57 = vld [vmem:[%s6307_s0 + $0x21] sm:$0xff] }
 0x100   :  { %3733 = vmatprep.mubr.msk.f32.mxu1 %vm4283_vm0, %v4282_v0  ;;  %3831 = vmatprep.mubr.msk.f32.mxu0 %vm4283_vm0, %v4282_v0  ;;  %v3390_v1 = vpop.f32.mrf.mxu0  ;;  %v3426_v2 = vpop.f32.mrf.mxu1 }
 0x103   :  { %3734 = vmatmul.mubr.f32.gmra.mxu1 %v2772_v62  ;;  %3832 = vmatmul.mubr.f32.gmra.mxu0 %v2810_v63  ;;  %v5354_v3 = vpop.f32.mrf.mxu0  ;;  %v5356_v4 = vpop.f32.mrf.mxu1  ;;  %v2942_v62 = vld [vmem:[%s6306_s1 + $0x3d8] sm:$0xff] }
 0x104   :  { %3736 = vmatprep.mubr.msk.f32.mxu1 %vm4283_vm0, %v4282_v0  ;;  %3834 = vmatprep.mubr.msk.f32.mxu0 %vm4283_vm0, %v4282_v0 }
 0x105   :  { %v3393_v7 = vpop.f32.mrf.mxu0  ;;  %v3429_v8 = vpop.f32.mrf.mxu1 }
 0x106   :  { %v2873_v7 = vld [vmem:[%s6307_s0 + $0x29] sm:$0xff] }
 0x107   :  { %3737 = vmatmul.mubr.f32.gmra.mxu1 %v2773_v5  ;;  %3835 = vmatmul.mubr.f32.gmra.mxu0 %v2811_v6  ;;  %v2835_v6 = vld [vmem:[%s6307_s0 + $0x1b9] sm:$0xff] }
 0x108   :  { %3739 = vmatprep.mubr.msk.f32.mxu1 %vm4283_vm0, %v4282_v0  ;;  %3837 = vmatprep.mubr.msk.f32.mxu0 %vm4283_vm0, %v4282_v0  ;;  %v5372_v9 = vpop.f32.mrf.mxu0  ;;  %v5374_v10 = vpop.f32.mrf.mxu1 }
 0x10a   :  { %v3396_v16 = vpop.f32.mrf.mxu0  ;;  %v3432_v17 = vpop.f32.mrf.mxu1 }
 0x10b   :  { %3740 = vmatmul.mubr.f32.gmra.mxu1 %v2774_v13  ;;  %3838 = vmatmul.mubr.f32.gmra.mxu0 %v2812_v14  ;;  %v2941_v14 = vld [vmem:[%s6306_s1 + $0x3d0] sm:$0xff] }
 0x10c   :  { %3840 = vmatprep.mubr.msk.f32.mxu0 %vm4283_vm0, %v4282_v0  ;;  %3875 = vmatprep.mubr.msk.f32.mxu1 %vm4283_vm0, %v4282_v0  ;;  %v5386_v18 = vpop.f32.mrf.mxu0 }
 0x10d   :  { %v5394_v23 = vpop.f32.mrf.mxu1 }
 0x10e   :  { %v3399_v25 = vpop.f32.mrf.mxu0 }
 0x10f   :  { %3841 = vmatmul.mubr.f32.gmra.mxu0 %v2813_v20  ;;  %3876 = vmatmul.mubr.f32.vlgmr.msra.gmra.mxu1 %v2830_v22  ;;  %v3435_v27 = vpop.f32.mrf.mxu1  ;;  %v2836_v25 = vld [vmem:[%s6307_s0 + $0x1c1] sm:$0xff] }
 0x110   :  { %3878 = vmatprep.mubr.msk.f32.mxu1 %vm4283_vm0, %v4282_v0  ;;  %3976 = vmatprep.mubr.msk.f32.mxu0 %vm4283_vm0, %v4282_v0 }
 0x111   :  { %4046 = vmatpush3.msra.mxu1 %v2946_v26  ;;  %v5406_v29 = vpop.f32.mrf.mxu0  ;;  %v2874_v26 = vld [vmem:[%s6307_s0 + $0x31] sm:$0xff] }
 0x112   :  { %v5411_v33 = vpop.f32.mrf.mxu1  ;;  %4047 = vmatprep.subr.mxu1 %v4282_v0 }
 0x113   :  { %3879 = vmatmul.mubr.f32.gmra.mxu1 %v2831_v28  ;;  %3977 = vmatmul.mubr.f32.vlgmr.msra.gmra.mxu0 %v4658_v15  ;;  %v3402_v35 = vpop.f32.mrf.mxu0  ;;  %v2984_v15 = vld [vmem:[%s6306_s1 + $0x470] sm:$0xff] }
 0x114   :  { %4147 = vmatpush3.msra.mxu0 %v2985_v30  ;;  %v3438_v36 = vpop.f32.mrf.mxu1  ;;  %3881 = vmatprep.mubr.msk.f32.mxu1 %vm4283_vm0, %v4282_v0  ;;  %v2940_v30 = vld [vmem:[%s6306_s1 + $0x3c8] sm:$0xff] }
 0x115   :  { %3979 = vmatprep.mubr.msk.f32.mxu0 %vm4283_vm0, %v4282_v0  ;;  %4048 = vmatpush3.msra.mxu1 %v2945_v34 }
 0x116   :  { %4148 = vmatprep.subr.mxu0 %v4282_v0  ;;  %4049 = vmatprep.subr.mxu1 %v4282_v0 }
 0x117   :  { %v5433_v40 = vpop.f32.mrf.mxu0  ;;  %v366_v41 = vpop.f32.mrf.mxu1  ;;  %3882 = vmatmul.mubr.f32.gmra.mxu1 %v2832_v37  ;;  %3980 = vmatmul.mubr.f32.gmra.mxu0 %v4679_v19  ;;  %v2983_v19 = vld [vmem:[%s6306_s1 + $0x468] sm:$0xff] }
 0x118   :  { %v503_v43 = vadd.f32 %v366_v41, %v5208_v11  ;;  %3884 = vmatprep.mubr.msk.f32.mxu1 %vm4283_vm0, %v4282_v0  ;;  %3982 = vmatprep.mubr.msk.f32.mxu0 %vm4283_vm0, %v4282_v0  ;;  %v2943_v11 = vld [vmem:[%s6306_s1 + $0x3e0] sm:$0xff] }
 0x119   :  { %v3405_v45 = vpop.f32.mrf.mxu0  ;;  %v3473_v46 = vpop.f32.mrf.mxu1  ;;  %4149 = vmatpush3.msra.mxu0 %v2984_v15  ;;  %4050 = vmatpush3.msra.mxu1 %v2944_v38  ;;  %v2837_v15 = vld [vmem:[%s6307_s0 + $0x1c9] sm:$0xff]  ;;  %v2875_v38 = vld [vmem:[%s6307_s0 + $0x39] sm:$0xff] }
 0x11a   :  { %4150 = vmatprep.subr.mxu0 %v4282_v0  ;;  %4051 = vmatprep.subr.mxu1 %v4282_v0 }
 0x11b   :  { %v371_v47 = vpop.f32.mrf.mxu1  ;;  %v657_v50 = vpop.f32.mrf.mxu0  ;;  %3885 = vmatmul.mubr.f32.gmra.mxu1 %v2833_v44  ;;  %3983 = vmatmul.mubr.f32.gmra.mxu0 %v4281_v51  ;;  %v2939_v44 = vld [vmem:[%s6306_s1 + $0x3c0] sm:$0xff] }
 0x11c   :  { %v504_v52 = vadd.f32 %v371_v47, %v5230_v21  ;;  %v5456_v53 = vadd.f32 %v657_v50, %v503_v43  ;;  %3887 = vmatprep.mubr.msk.f32.mxu1 %vm4283_vm0, %v4282_v0  ;;  %3985 = vmatprep.mubr.msk.f32.mxu0 %vm4283_vm0, %v4282_v0  ;;  %v2982_v21 = vld [vmem:[%s6306_s1 + $0x460] sm:$0xff]  ;;  %v2838_v47 = vld [vmem:[%s6307_s0 + $0x1d1] sm:$0xff] }
 0x11d   :  { %v3476_v58 = vpop.f32.mrf.mxu1  ;;  %v3574_v59 = vpop.f32.mrf.mxu0  ;;  %4151 = vmatpush3.msra.mxu0 %v2983_v19  ;;  %4052 = vmatpush3.msra.mxu1 %v2943_v11  ;;  %v2876_v50 = vld [vmem:[%s6307_s0 + $0x41] sm:$0xff] }
 0x11e   :  { %4152 = vmatprep.subr.mxu0 %v4282_v0  ;;  %4053 = vmatprep.subr.mxu1 %v4282_v0 }
 0x11f   :  { %v376_v63 = vpop.f32.mrf.mxu1  ;;  %v662_v1 = vpop.f32.mrf.mxu0  ;;  %3888 = vmatmul.mubr.f32.gmra.mxu1 %v2834_v56  ;;  %3986 = vmatmul.mubr.f32.gmra.mxu0 %v2872_v57  ;;  %v2938_v56 = vld [vmem:[%s6306_s1 + $0x3b8] sm:$0xff] }
 0x120   :  { %v505_v2 = vadd.f32 %v376_v63, %v5260_v31  ;;  %v5477_v5 = vadd.f32 %v662_v1, %v504_v52  ;;  %3890 = vmatprep.mubr.msk.f32.mxu1 %vm4283_vm0, %v4282_v0  ;;  %3988 = vmatprep.mubr.msk.f32.mxu0 %vm4283_vm0, %v4282_v0  ;;  %v2981_v31 = vld [vmem:[%s6306_s1 + $0x458] sm:$0xff]  ;;  %v2877_v63 = vld [vmem:[%s6307_s0 + $0x49] sm:$0xff] }
 0x121   :  { %v3479_v8 = vpop.f32.mrf.mxu1  ;;  %v3577_v13 = vpop.f32.mrf.mxu0  ;;  %4153 = vmatpush3.msra.mxu0 %v2982_v21  ;;  %4054 = vmatpush3.msra.mxu1 %v2942_v62  ;;  %v2839_v62 = vld [vmem:[%s6307_s0 + $0x1d9] sm:$0xff] }
 0x122   :  { %4154 = vmatprep.subr.mxu0 %v4282_v0  ;;  %4055 = vmatprep.subr.mxu1 %v4282_v0 }
 0x123   :  { %v381_v16 = vpop.f32.mrf.mxu1  ;;  %v667_v17 = vpop.f32.mrf.mxu0  ;;  %3891 = vmatmul.mubr.f32.gmra.mxu1 %v2835_v6  ;;  %3989 = vmatmul.mubr.f32.gmra.mxu0 %v2873_v7  ;;  %v2937_v6 = vld [vmem:[%s6306_s1 + $0x3b0] sm:$0xff] }
 0x124   :  { %v506_v20 = vadd.f32 %v381_v16, %v5282_v39  ;;  %v5498_v22 = vadd.f32 %v667_v17, %v505_v2  ;;  %3893 = vmatprep.mubr.msk.f32.mxu1 %vm4283_vm0, %v4282_v0  ;;  %3991 = vmatprep.mubr.msk.f32.mxu0 %vm4283_vm0, %v4282_v0  ;;  %v2980_v39 = vld [vmem:[%s6306_s1 + $0x450] sm:$0xff] }
 0x125   :  { %v3482_v27 = vpop.f32.mrf.mxu1  ;;  %v3580_v28 = vpop.f32.mrf.mxu0  ;;  %4155 = vmatpush3.msra.mxu0 %v2981_v31  ;;  %4056 = vmatpush3.msra.mxu1 %v2941_v14  ;;  %v2840_v14 = vld [vmem:[%s6307_s0 + $0x1e1] sm:$0xff]  ;;  %v2878_v16 = vld [vmem:[%s6307_s0 + $0x51] sm:$0xff] }
 0x126   :  { %4156 = vmatprep.subr.mxu0 %v4282_v0  ;;  %4057 = vmatprep.subr.mxu1 %v4282_v0 }
 0x127   :  { %v386_v34 = vpop.f32.mrf.mxu1  ;;  %v672_v35 = vpop.f32.mrf.mxu0  ;;  %3894 = vmatmul.mubr.f32.gmra.mxu1 %v2836_v25  ;;  %3992 = vmatmul.mubr.f32.gmra.mxu0 %v2874_v26  ;;  %v2936_v25 = vld [vmem:[%s6306_s1 + $0x3a8] sm:$0xff] }
 0x128   :  { %v507_v36 = vadd.f32 %v386_v34, %v5311_v48  ;;  %v5519_v37 = vadd.f32 %v672_v35, %v506_v20  ;;  %3896 = vmatprep.mubr.msk.f32.mxu1 %vm4283_vm0, %v4282_v0  ;;  %3994 = vmatprep.mubr.msk.f32.mxu0 %vm4283_vm0, %v4282_v0  ;;  %v2979_v48 = vld [vmem:[%s6306_s1 + $0x448] sm:$0xff]  ;;  %v2879_v34 = vld [vmem:[%s6307_s0 + $0x59] sm:$0xff] }
 0x129   :  { %v3485_v41 = vpop.f32.mrf.mxu1  ;;  %v3583_v43 = vpop.f32.mrf.mxu0  ;;  %4157 = vmatpush3.msra.mxu0 %v2980_v39  ;;  %4058 = vmatpush3.msra.mxu1 %v2940_v30  ;;  %v2841_v30 = vld [vmem:[%s6307_s0 + $0x1e9] sm:$0xff] }
 0x12a   :  { %4158 = vmatprep.subr.mxu0 %v4282_v0  ;;  %4059 = vmatprep.subr.mxu1 %v4282_v0 }
 0x12b   :  { %v391_v45 = vpop.f32.mrf.mxu1  ;;  %v677_v46 = vpop.f32.mrf.mxu0  ;;  %3897 = vmatmul.mubr.f32.gmra.mxu1 %v2837_v15  ;;  %3995 = vmatmul.mubr.f32.gmra.mxu0 %v2875_v38  ;;  %v2935_v15 = vld [vmem:[%s6306_s1 + $0x3a0] sm:$0xff] }
 0x12c   :  { %v508_v19 = vadd.f32 %v391_v45, %v5328_v55  ;;  %v5540_v11 = vadd.f32 %v677_v46, %v507_v36  ;;  %3899 = vmatprep.mubr.msk.f32.mxu1 %vm4283_vm0, %v4282_v0  ;;  %3997 = vmatprep.mubr.msk.f32.mxu0 %vm4283_vm0, %v4282_v0  ;;  %v2978_v55 = vld [vmem:[%s6306_s1 + $0x440] sm:$0xff] }
 0x12d   :  { %v3488_v51 = vpop.f32.mrf.mxu1  ;;  %v3586_v52 = vpop.f32.mrf.mxu0  ;;  %4159 = vmatpush3.msra.mxu0 %v2979_v48  ;;  %4060 = vmatpush3.msra.mxu1 %v2939_v44  ;;  %v2842_v44 = vld [vmem:[%s6307_s0 + $0x1f1] sm:$0xff]  ;;  %v2880_v45 = vld [vmem:[%s6307_s0 + $0x61] sm:$0xff] }
 0x12e   :  { %4160 = vmatprep.subr.mxu0 %v4282_v0  ;;  %4061 = vmatprep.subr.mxu1 %v4282_v0 }
 0x12f   :  { %v396_v57 = vpop.f32.mrf.mxu1  ;;  %v682_v58 = vpop.f32.mrf.mxu0  ;;  %3900 = vmatmul.mubr.f32.gmra.mxu1 %v2838_v47  ;;  %3998 = vmatmul.mubr.f32.gmra.mxu0 %v2876_v50  ;;  %v2934_v47 = vld [vmem:[%s6306_s1 + $0x398] sm:$0xff] }
 0x130   :  { %v509_v59 = vadd.f32 %v396_v57, %v5340_v60  ;;  %v5561_v21 = vadd.f32 %v682_v58, %v508_v19  ;;  %3902 = vmatprep.mubr.msk.f32.mxu1 %vm4283_vm0, %v4282_v0  ;;  %4000 = vmatprep.mubr.msk.f32.mxu0 %vm4283_vm0, %v4282_v0  ;;  %v2977_v60 = vld [vmem:[%s6306_s1 + $0x438] sm:$0xff]  ;;  %v2881_v57 = vld [vmem:[%s6307_s0 + $0x69] sm:$0xff] }
 0x131   :  { %v3491_v1 = vpop.f32.mrf.mxu1  ;;  %v3589_v2 = vpop.f32.mrf.mxu0  ;;  %4161 = vmatpush3.msra.mxu0 %v2978_v55  ;;  %4062 = vmatpush3.msra.mxu1 %v2938_v56  ;;  %v2843_v56 = vld [vmem:[%s6307_s0 + $0x1f9] sm:$0xff] }
 0x132   :  { %4162 = vmatprep.subr.mxu0 %v4282_v0  ;;  %4063 = vmatprep.subr.mxu1 %v4282_v0 }
 0x133   :  { %v401_v7 = vpop.f32.mrf.mxu1  ;;  %v687_v8 = vpop.f32.mrf.mxu0  ;;  %3903 = vmatmul.mubr.f32.gmra.mxu1 %v2839_v62  ;;  %4001 = vmatmul.mubr.f32.gmra.mxu0 %v2877_v63  ;;  %v2933_v62 = vld [vmem:[%s6306_s1 + $0x390] sm:$0xff] }
 0x134   :  { %v510_v13 = vadd.f32 %v401_v7, %v5354_v3  ;;  %v5582_v31 = vadd.f32 %v687_v8, %v509_v59  ;;  %3905 = vmatprep.mubr.msk.f32.mxu1 %vm4283_vm0, %v4282_v0  ;;  %4003 = vmatprep.mubr.msk.f32.mxu0 %vm4283_vm0, %v4282_v0  ;;  %v2976_v3 = vld [vmem:[%s6306_s1 + $0x430] sm:$0xff] }
 0x135   :  { %v3494_v17 = vpop.f32.mrf.mxu1  ;;  %v3592_v20 = vpop.f32.mrf.mxu0  ;;  %4163 = vmatpush3.msra.mxu0 %v2977_v60  ;;  %4064 = vmatpush3.msra.mxu1 %v2937_v6  ;;  %v2844_v6 = vld [vmem:[%s6307_s0 + $0x201] sm:$0xff]  ;;  %v2882_v7 = vld [vmem:[%s6307_s0 + $0x71] sm:$0xff] }
 0x136   :  { %4164 = vmatprep.subr.mxu0 %v4282_v0  ;;  %4065 = vmatprep.subr.mxu1 %v4282_v0 }
 0x137   :  { %v406_v26 = vpop.f32.mrf.mxu1  ;;  %v692_v27 = vpop.f32.mrf.mxu0  ;;  %3906 = vmatmul.mubr.f32.gmra.mxu1 %v2840_v14  ;;  %4004 = vmatmul.mubr.f32.gmra.mxu0 %v2878_v16  ;;  %v2932_v14 = vld [vmem:[%s6306_s1 + $0x388] sm:$0xff] }
 0x138   :  { %v511_v28 = vadd.f32 %v406_v26, %v5372_v9  ;;  %v5603_v39 = vadd.f32 %v692_v27, %v510_v13  ;;  %3908 = vmatprep.mubr.msk.f32.mxu1 %vm4283_vm0, %v4282_v0  ;;  %4006 = vmatprep.mubr.msk.f32.mxu0 %vm4283_vm0, %v4282_v0  ;;  %v2975_v9 = vld [vmem:[%s6306_s1 + $0x428] sm:$0xff] }
 0x139   :  { %v3497_v35 = vpop.f32.mrf.mxu1  ;;  %v3595_v36 = vpop.f32.mrf.mxu0  ;;  %4165 = vmatpush3.msra.mxu0 %v2976_v3  ;;  %4066 = vmatpush3.msra.mxu1 %v2936_v25  ;;  %v2845_v3 = vld [vmem:[%s6307_s0 + $0x209] sm:$0xff]  ;;  %v2883_v25 = vld [vmem:[%s6307_s0 + $0x79] sm:$0xff] }
 0x13a   :  { %4166 = vmatprep.subr.mxu0 %v4282_v0  ;;  %4067 = vmatprep.subr.mxu1 %v4282_v0 }
 0x13b   :  { %v411_v38 = vpop.f32.mrf.mxu1  ;;  %v697_v41 = vpop.f32.mrf.mxu0  ;;  %3909 = vmatmul.mubr.f32.gmra.mxu1 %v2841_v30  ;;  %4007 = vmatmul.mubr.f32.gmra.mxu0 %v2879_v34  ;;  %v2971_v30 = vld [vmem:[%s6306_s1 + $0x408] sm:$0xff]  ;;  %v2931_v34 = vld [vmem:[%s6306_s1 + $0x380] sm:$0xff] }
 0x13c   :  { %v512_v43 = vadd.f32 %v411_v38, %v5386_v18  ;;  %v5624_v48 = vadd.f32 %v697_v41, %v511_v28  ;;  %3911 = vmatprep.mubr.msk.f32.mxu1 %vm4283_vm0, %v4282_v0  ;;  %4009 = vmatprep.mubr.msk.f32.mxu0 %vm4283_vm0, %v4282_v0  ;;  %v2974_v18 = vld [vmem:[%s6306_s1 + $0x420] sm:$0xff] }
 0x13d   :  { %v3500_v46 = vpop.f32.mrf.mxu1  ;;  %v3598_v19 = vpop.f32.mrf.mxu0  ;;  %4167 = vmatpush3.msra.mxu0 %v2975_v9  ;;  %4068 = vmatpush3.msra.mxu1 %v2935_v15  ;;  %v2884_v15 = vld [vmem:[%s6307_s0 + $0x81] sm:$0xff] }
 0x13e   :  { %4168 = vmatprep.subr.mxu0 %v4282_v0  ;;  %4069 = vmatprep.subr.mxu1 %v4282_v0 }
 0x13f   :  { %v416_v50 = vpop.f32.mrf.mxu1  ;;  %v702_v51 = vpop.f32.mrf.mxu0  ;;  %3912 = vmatmul.mubr.f32.gmra.mxu1 %v2842_v44  ;;  %4010 = vmatmul.mubr.f32.gmra.mxu0 %v2880_v45  ;;  %v2970_v44 = vld [vmem:[%s6306_s1 + $0x400] sm:$0xff] }
 0x140   :  { %v513_v52 = vadd.f32 %v416_v50, %v5406_v29  ;;  %v5645_v55 = vadd.f32 %v702_v51, %v512_v43  ;;  %3914 = vmatprep.mubr.msk.f32.mxu1 %vm4283_vm0, %v4282_v0  ;;  %4012 = vmatprep.mubr.msk.f32.mxu0 %vm4283_vm0, %v4282_v0  ;;  %v2973_v29 = vld [vmem:[%s6306_s1 + $0x418] sm:$0xff] }
 0x141   :  { %v3503_v58 = vpop.f32.mrf.mxu1  ;;  %v3601_v59 = vpop.f32.mrf.mxu0  ;;  %4169 = vmatpush3.msra.mxu0 %v2974_v18  ;;  %4070 = vmatpush3.msra.mxu1 %v2934_v47  ;;  %v2885_v18 = vld [vmem:[%s6307_s0 + $0x89] sm:$0xff] }
 0x142   :  { %4170 = vmatprep.subr.mxu0 %v4282_v0  ;;  %4071 = vmatprep.subr.mxu1 %v4282_v0  ;;  %v2848_v58 = vld [vmem:[%s6307_s0 + $0x221] sm:$0xff] }
 0x143   :  { %v421_v63 = vpop.f32.mrf.mxu1  ;;  %v707_v1 = vpop.f32.mrf.mxu0  ;;  %3915 = vmatmul.mubr.f32.gmra.mxu1 %v2843_v56  ;;  %4013 = vmatmul.mubr.f32.gmra.mxu0 %v2881_v57 }
 0x144   :  { %v514_v2 = vadd.f32 %v421_v63, %v5433_v40  ;;  %v5666_v60 = vadd.f32 %v707_v1, %v513_v52  ;;  %3917 = vmatprep.mubr.msk.f32.mxu1 %vm4283_vm0, %v4282_v0  ;;  %4015 = vmatprep.mubr.msk.f32.mxu0 %vm4283_vm0, %v4282_v0  ;;  %v2972_v40 = vld [vmem:[%s6306_s1 + $0x410] sm:$0xff] }
 0x145   :  { %v3506_v8 = vpop.f32.mrf.mxu1  ;;  %v3604_v13 = vpop.f32.mrf.mxu0  ;;  %4171 = vmatpush3.msra.mxu0 %v2973_v29  ;;  %4072 = vmatpush3.msra.mxu1 %v2933_v62 }
 0x146   :  { %4172 = vmatprep.subr.mxu0 %v4282_v0  ;;  %4073 = vmatprep.subr.mxu1 %v4282_v0 }
 0x147   :  { %v426_v16 = vpop.f32.mrf.mxu1  ;;  %v712_v17 = vpop.f32.mrf.mxu0  ;;  %3918 = vmatmul.mubr.f32.gmra.mxu1 %v2844_v6  ;;  %4016 = vmatmul.mubr.f32.gmra.mxu0 %v2882_v7  ;;  %v2849_v6 = vld [vmem:[%s6307_s0 + $0x229] sm:$0xff] }
 0x148   :  { %v5686_v20 = vadd.f32 %v712_v17, %v514_v2  ;;  %3920 = vmatprep.mubr.msk.f32.mxu1 %vm4283_vm0, %v4282_v0  ;;  %4018 = vmatprep.mubr.msk.f32.mxu0 %vm4283_vm0, %v4282_v0  ;;  %v515_v28 = vadd.f32 %v426_v16, %v5210_v12  ;;  %v2846_v12 = vld [vmem:[%s6307_s0 + $0x211] sm:$0xff] }
 0x149   :  { %v3509_v26 = vpop.f32.mrf.mxu1  ;;  %v3607_v27 = vpop.f32.mrf.mxu0  ;;  %4173 = vmatpush3.msra.mxu0 %v2972_v40  ;;  %4074 = vmatpush3.msra.mxu1 %v2932_v14  ;;  %v2850_v17 = vld [vmem:[%s6307_s0 + $0x231] sm:$0xff] }
 0x14a   :  { %4174 = vmatprep.subr.mxu0 %v4282_v0  ;;  %4075 = vmatprep.subr.mxu1 %v4282_v0 }
 0x14b   :  { %v431_v35 = vpop.f32.mrf.mxu1  ;;  %v717_v36 = vpop.f32.mrf.mxu0  ;;  %3921 = vmatmul.mubr.f32.gmra.mxu1 %v2845_v3  ;;  %4019 = vmatmul.mubr.f32.gmra.mxu0 %v2883_v25 }
 0x14c   :  { %v5707_v9 = vadd.f32 %v717_v36, %v515_v28  ;;  %3923 = vmatprep.mubr.msk.f32.mxu1 %vm4283_vm0, %v4282_v0  ;;  %4021 = vmatprep.mubr.msk.f32.mxu0 %vm4283_vm0, %v4282_v0  ;;  %v516_v43 = vadd.f32 %v431_v35, %v5240_v24  ;;  %v2847_v24 = vld [vmem:[%s6307_s0 + $0x219] sm:$0xff] }
 0x14d   :  { %v3512_v38 = vpop.f32.mrf.mxu1  ;;  %v3610_v41 = vpop.f32.mrf.mxu0  ;;  %4175 = vmatpush3.msra.mxu0 %v2971_v30  ;;  %4076 = vmatpush3.msra.mxu1 %v2931_v34  ;;  %v2851_v34 = vld [vmem:[%s6307_s0 + $0x239] sm:$0xff] }
 0x14e   :  { %4176 = vmatprep.subr.mxu0 %v4282_v0 }
 0x14f   :  { %v436_v45 = vpop.f32.mrf.mxu1  ;;  %v722_v46 = vpop.f32.mrf.mxu0  ;;  %3924 = vmatmul.mubr.f32.gmra.mxu1 %v2846_v12  ;;  %4022 = vmatmul.mubr.f32.gmra.mxu0 %v2884_v15 }
 0x150   :  { %v5724_v19 = vadd.f32 %v722_v46, %v516_v43  ;;  %3926 = vmatprep.mubr.msk.f32.mxu1 %vm4283_vm0, %v4282_v0  ;;  %4024 = vmatprep.mubr.msk.f32.mxu0 %vm4283_vm0, %v4282_v0  ;;  %v517_v51 = vadd.f32 %v436_v45, %v5262_v32  ;;  %v2886_v32 = vld [vmem:[%s6307_s0 + $0x91] sm:$0xff]  ;;  %v2852_v43 = vld [vmem:[%s6307_s0 + $0x241] sm:$0xff] }
 0x151   :  { %v3515_v47 = vpop.f32.mrf.mxu1  ;;  %v3613_v50 = vpop.f32.mrf.mxu0  ;;  %4177 = vmatpush3.msra.mxu0 %v2970_v44 }
 0x152   :  { %v2891_v50 = vld [vmem:[%s6307_s0 + $0xb9] sm:$0xff] }
 0x153   :  { %v441_v52 = vpop.f32.mrf.mxu1  ;;  %v727_v56 = vpop.f32.mrf.mxu0  ;;  %3927 = vmatmul.mubr.f32.gmra.mxu1 %v2847_v24  ;;  %4025 = vmatmul.mubr.f32.gmra.mxu0 %v2885_v18 }
 0x154   :  { %v5737_v57 = vadd.f32 %v727_v56, %v517_v51  ;;  %3929 = vmatprep.mubr.msk.f32.mxu1 %vm4283_vm0, %v4282_v0  ;;  %4027 = vmatprep.mubr.msk.f32.mxu0 %vm4283_vm0, %v4282_v0  ;;  %v518_v62 = vadd.f32 %v441_v52, %v5294_v42  ;;  %v2887_v42 = vld [vmem:[%s6307_s0 + $0x99] sm:$0xff] }
 0x155   :  { %v3518_v59 = vpop.f32.mrf.mxu1  ;;  %v3616_v29 = vpop.f32.mrf.mxu0 }
 0x156   :  { %v2909_v29 = vld [vmem:[%s6307_s0 + $0xd9] sm:$0xff] }
 0x157   :  { %v446_v63 = vpop.f32.mrf.mxu1  ;;  %v732_v1 = vpop.f32.mrf.mxu0  ;;  %3930 = vmatmul.mubr.f32.gmra.mxu1 %v2848_v58  ;;  %4028 = vmatmul.mubr.f32.gmra.mxu0 %v2886_v32 }
 0x158   :  { %v5750_v2 = vadd.f32 %v732_v1, %v518_v62  ;;  %3932 = vmatprep.mubr.msk.f32.mxu1 %vm4283_vm0, %v4282_v0  ;;  %4030 = vmatprep.mubr.msk.f32.mxu0 %vm4283_vm0, %v4282_v0  ;;  %v519_v13 = vadd.f32 %v446_v63, %v5313_v49  ;;  %v2888_v49 = vld [vmem:[%s6307_s0 + $0xa1] sm:$0xff] }
 0x159   :  { %v3521_v7 = vpop.f32.mrf.mxu1  ;;  %v3619_v8 = vpop.f32.mrf.mxu0 }
 0x15a   :  { %v2910_v8 = vld [vmem:[%s6307_s0 + $0xe1] sm:$0xff] }
 0x15b   :  { %v451_v40 = vpop.f32.mrf.mxu1  ;;  %v737_v14 = vpop.f32.mrf.mxu0  ;;  %3933 = vmatmul.mubr.f32.gmra.mxu1 %v2849_v6  ;;  %4031 = vmatmul.mubr.f32.gmra.mxu0 %v2887_v42 }
 0x15c   :  { %v5763_v16 = vadd.f32 %v737_v14, %v519_v13  ;;  %3935 = vmatprep.mubr.msk.f32.mxu1 %vm4283_vm0, %v4282_v0  ;;  %4033 = vmatprep.mubr.msk.f32.mxu0 %vm4283_vm0, %v4282_v0  ;;  %v520_v26 = vadd.f32 %v451_v40, %v5326_v54  ;;  %v2889_v54 = vld [vmem:[%s6307_s0 + $0xa9] sm:$0xff] }
 0x15d   :  { %v3524_v3 = vpop.f32.mrf.mxu1  ;;  %v3622_v25 = vpop.f32.mrf.mxu0 }
 0x15f   :  { %v456_v27 = vpop.f32.mrf.mxu1  ;;  %v742_v28 = vpop.f32.mrf.mxu0  ;;  %3936 = vmatmul.mubr.f32.gmra.mxu1 %v2850_v17  ;;  %4034 = vmatmul.mubr.f32.gmra.mxu0 %v2888_v49 }
 0x160   :  { %v5776_v30 = vadd.f32 %v742_v28, %v520_v26  ;;  %3938 = vmatprep.mubr.msk.f32.mxu1 %vm4283_vm0, %v4282_v0  ;;  %4036 = vmatprep.mubr.msk.f32.mxu0 %vm4283_vm0, %v4282_v0  ;;  %v521_v12 = vadd.f32 %v456_v27, %v5342_v61  ;;  %v2890_v61 = vld [vmem:[%s6307_s0 + $0xb1] sm:$0xff]  ;;  %v2911_v26 = vld [vmem:[%s6307_s0 + $0xe9] sm:$0xff] }
 0x161   :  { %v3527_v35 = vpop.f32.mrf.mxu1  ;;  %v3625_v36 = vpop.f32.mrf.mxu0 }
 0x162   :  { %v2912_v36 = vld [vmem:[%s6307_s0 + $0xf1] sm:$0xff] }
 0x163   :  { %v461_v15 = vpop.f32.mrf.mxu1  ;;  %v747_v38 = vpop.f32.mrf.mxu0  ;;  %3939 = vmatmul.mubr.f32.gmra.mxu1 %v2851_v34  ;;  %4037 = vmatmul.mubr.f32.gmra.mxu0 %v2889_v54 }
 0x164   :  { %v5789_v41 = vadd.f32 %v747_v38, %v521_v12  ;;  %3941 = vmatprep.mubr.msk.f32.mxu1 %vm4283_vm0, %v4282_v0  ;;  %4039 = vmatprep.mubr.msk.f32.mxu0 %vm4283_vm0, %v4282_v0  ;;  %v522_v46 = vadd.f32 %v461_v15, %v5356_v4  ;;  %v2908_v4 = vld [vmem:[%s6307_s0 + $0xd1] sm:$0xff]  ;;  %v2950_v12 = vld [vmem:[%s6307_s0 + $0x22] sm:$0xff] }
 0x165   :  { %v3530_v44 = vpop.f32.mrf.mxu1  ;;  %v3628_v45 = vpop.f32.mrf.mxu0 }
 0x166   :  { %v2913_v45 = vld [vmem:[%s6307_s0 + $0xf9] sm:$0xff] }
 0x167   :  { %v466_v24 = vpop.f32.mrf.mxu1  ;;  %v752_v18 = vpop.f32.mrf.mxu0  ;;  %3942 = vmatmul.mubr.f32.gmra.mxu1 %v2852_v43  ;;  %4040 = vmatmul.mubr.f32.gmra.mxu0 %v2890_v61 }
 0x168   :  { %v5802_v47 = vadd.f32 %v752_v18, %v522_v46  ;;  %4042 = vmatprep.mubr.msk.f32.mxu0 %vm4283_vm0, %v4282_v0  ;;  %4077 = vmatprep.mubr.msk.f32.mxu1 %vm4283_vm0, %v4282_v0  ;;  %v523_v56 = vadd.f32 %v466_v24, %v5374_v10  ;;  %v2947_v10 = vld [vmem:[%s6307_s0 + $0xa] sm:$0xff] }
 0x169   :  { %v3533_v51 = vpop.f32.mrf.mxu1  ;;  %v3631_v52 = vpop.f32.mrf.mxu0  ;;  %v2951_v46 = vld [vmem:[%s6307_s0 + $0x2a] sm:$0xff] }
 0x16a   :  { %v2914_v52 = vld [vmem:[%s6307_s0 + $0x101] sm:$0xff] }
 0x16b   :  { %v471_v58 = vpop.f32.mrf.mxu1  ;;  %v757_v32 = vpop.f32.mrf.mxu0  ;;  %4043 = vmatmul.mubr.f32.gmra.mxu0 %v2891_v50  ;;  %4078 = vmatmul.mubr.f32.vlgmr.msra.gmra.mxu1 %v2908_v4 }
 0x16c   :  { %v5815_v59 = vadd.f32 %v757_v32, %v523_v56  ;;  %4080 = vmatprep.mubr.msk.f32.mxu1 %vm4283_vm0, %v4282_v0  ;;  %4178 = vmatprep.mubr.msk.f32.mxu0 %vm4283_vm0, %v4282_v0  ;;  %v524_v1 = vadd.f32 %v471_v58, %v5394_v23  ;;  %v2948_v23 = vld [vmem:[%s6307_s0 + $0x12] sm:$0xff] }
 0x16d   :  { %v3536_v62 = vpop.f32.mrf.mxu1  ;;  %v3634_v63 = vpop.f32.mrf.mxu0  ;;  %v2952_v56 = vld [vmem:[%s6307_s0 + $0x32] sm:$0xff] }
 0x16e   :  { %v2915_v63 = vld [vmem:[%s6307_s0 + $0x109] sm:$0xff] }
 0x16f   :  { %v476_v6 = vpop.f32.mrf.mxu1  ;;  %v762_v42 = vpop.f32.mrf.mxu0  ;;  %4081 = vmatmul.mubr.f32.gmra.mxu1 %v2909_v29  ;;  %4179 = vmatmul.mubr.f32.vlgmr.msra.gmra.mxu0 %v2947_v10 }
 0x170   :  { %v5828_v7 = vadd.f32 %v762_v42, %v524_v1  ;;  %4083 = vmatprep.mubr.msk.f32.mxu1 %vm4283_vm0, %v4282_v0  ;;  %4181 = vmatprep.mubr.msk.f32.mxu0 %vm4283_vm0, %v4282_v0  ;;  %v525_v14 = vadd.f32 %v476_v6, %v5411_v33  ;;  %v2949_v33 = vld [vmem:[%s6307_s0 + $0x1a] sm:$0xff] }
 0x171   :  { %v3539_v13 = vpop.f32.mrf.mxu1  ;;  %v3637_v40 = vpop.f32.mrf.mxu0  ;;  %v2953_v1 = vld [vmem:[%s6307_s0 + $0x3a] sm:$0xff] }
 0x172   :  { %v2916_v40 = vld [vmem:[%s6307_s0 + $0x111] sm:$0xff] }
 0x173   :  { %v767_v17 = vpop.f32.mrf.mxu0  ;;  %v948_v49 = vpop.f32.mrf.mxu1  ;;  %4084 = vmatmul.mubr.f32.gmra.mxu1 %v2910_v8  ;;  %4182 = vmatmul.mubr.f32.gmra.mxu0 %v2948_v23 }
 0x174   :  { %v5841_v3 = vadd.f32 %v767_v17, %v525_v14  ;;  %v1085_v25 = vadd.f32 %v948_v49, %v5456_v53  ;;  %4086 = vmatprep.mubr.msk.f32.mxu1 %vm4283_vm0, %v4282_v0  ;;  %4184 = vmatprep.mubr.msk.f32.mxu0 %vm4283_vm0, %v4282_v0  ;;  %v2954_v14 = vld [vmem:[%s6307_s0 + $0x42] sm:$0xff] }
 0x175   :  { %v3640_v27 = vpop.f32.mrf.mxu0  ;;  %v3675_v28 = vpop.f32.mrf.mxu1 }
 0x176   :  { %v2917_v27 = vld [vmem:[%s6307_s0 + $0x119] sm:$0xff]  ;;  %v2955_v28 = vld [vmem:[%s6307_s0 + $0x4a] sm:$0xff] }
 0x177   :  { %v953_v34 = vpop.f32.mrf.mxu1  ;;  %v1239_v54 = vpop.f32.mrf.mxu0  ;;  %4087 = vmatmul.mubr.f32.gmra.mxu1 %v2911_v26  ;;  %4185 = vmatmul.mubr.f32.gmra.mxu0 %v2949_v33 }
 0x178   :  { %v1086_v53 = vadd.f32 %v953_v34, %v5477_v5  ;;  %v5855_v35 = vadd.f32 %v1239_v54, %v1085_v25  ;;  %4089 = vmatprep.mubr.msk.f32.mxu1 %vm4283_vm0, %v4282_v0  ;;  %4187 = vmatprep.mubr.msk.f32.mxu0 %vm4283_vm0, %v4282_v0 }
 0x179   :  { %v3678_v15 = vpop.f32.mrf.mxu1  ;;  %v3776_v38 = vpop.f32.mrf.mxu0 }
 0x17a   :  { %v2918_v15 = vld [vmem:[%s6307_s0 + $0x121] sm:$0xff]  ;;  %v2956_v38 = vld [vmem:[%s6307_s0 + $0x52] sm:$0xff] }
 0x17b   :  { %v958_v43 = vpop.f32.mrf.mxu1  ;;  %v1244_v5 = vpop.f32.mrf.mxu0  ;;  %4090 = vmatmul.mubr.f32.gmra.mxu1 %v2912_v36  ;;  %4188 = vmatmul.mubr.f32.gmra.mxu0 %v2950_v12 }
 0x17c   :  { %v1087_v61 = vadd.f32 %v958_v43, %v5498_v22  ;;  %v5868_v44 = vadd.f32 %v1244_v5, %v1086_v53  ;;  %4092 = vmatprep.mubr.msk.f32.mxu1 %vm4283_vm0, %v4282_v0  ;;  %4190 = vmatprep.mubr.msk.f32.mxu0 %vm4283_vm0, %v4282_v0 }
 0x17d   :  { %v3681_v24 = vpop.f32.mrf.mxu1  ;;  %v3779_v18 = vpop.f32.mrf.mxu0 }
 0x17e   :  { %v2919_v24 = vld [vmem:[%s6307_s0 + $0x129] sm:$0xff]  ;;  %v2957_v18 = vld [vmem:[%s6307_s0 + $0x5a] sm:$0xff] }
 0x17f   :  { %v963_v50 = vpop.f32.mrf.mxu1  ;;  %v1249_v22 = vpop.f32.mrf.mxu0  ;;  %4093 = vmatmul.mubr.f32.gmra.mxu1 %v2913_v45  ;;  %4191 = vmatmul.mubr.f32.gmra.mxu0 %v2951_v46 }
 0x180   :  { %v1088_v4 = vadd.f32 %v963_v50, %v5519_v37  ;;  %v5881_v51 = vadd.f32 %v1249_v22, %v1087_v61  ;;  %4095 = vmatprep.mubr.msk.f32.mxu1 %vm4283_vm0, %v4282_v0  ;;  %4193 = vmatprep.mubr.msk.f32.mxu0 %vm4283_vm0, %v4282_v0 }
 0x181   :  { %v3684_v58 = vpop.f32.mrf.mxu1  ;;  %v3782_v32 = vpop.f32.mrf.mxu0 }
 0x182   :  { %v2920_v58 = vld [vmem:[%s6307_s0 + $0x131] sm:$0xff]  ;;  %v2958_v32 = vld [vmem:[%s6307_s0 + $0x62] sm:$0xff] }
 0x183   :  { %v968_v29 = vpop.f32.mrf.mxu1  ;;  %v1254_v37 = vpop.f32.mrf.mxu0  ;;  %4096 = vmatmul.mubr.f32.gmra.mxu1 %v2914_v52  ;;  %4194 = vmatmul.mubr.f32.gmra.mxu0 %v2952_v56 }
 0x184   :  { %v1089_v10 = vadd.f32 %v968_v29, %v5540_v11  ;;  %v5894_v62 = vadd.f32 %v1254_v37, %v1088_v4  ;;  %4098 = vmatprep.mubr.msk.f32.mxu1 %vm4283_vm0, %v4282_v0  ;;  %4196 = vmatprep.mubr.msk.f32.mxu0 %vm4283_vm0, %v4282_v0 }
 0x185   :  { %v3687_v6 = vpop.f32.mrf.mxu1  ;;  %v3785_v42 = vpop.f32.mrf.mxu0 }
 0x186   :  { %v2921_v6 = vld [vmem:[%s6307_s0 + $0x139] sm:$0xff]  ;;  %v2959_v42 = vld [vmem:[%s6307_s0 + $0x6a] sm:$0xff] }
 0x187   :  { %v973_v8 = vpop.f32.mrf.mxu1  ;;  %v1259_v11 = vpop.f32.mrf.mxu0  ;;  %4099 = vmatmul.mubr.f32.gmra.mxu1 %v2915_v63  ;;  %4197 = vmatmul.mubr.f32.gmra.mxu0 %v2953_v1 }
 0x188   :  { %v1090_v23 = vadd.f32 %v973_v8, %v5561_v21  ;;  %v5907_v13 = vadd.f32 %v1259_v11, %v1089_v10  ;;  %4101 = vmatprep.mubr.msk.f32.mxu1 %vm4283_vm0, %v4282_v0  ;;  %4199 = vmatprep.mubr.msk.f32.mxu0 %vm4283_vm0, %v4282_v0 }
 0x189   :  { %v3690_v17 = vpop.f32.mrf.mxu1  ;;  %v3788_v49 = vpop.f32.mrf.mxu0 }
 0x18a   :  { %v2922_v17 = vld [vmem:[%s6307_s0 + $0x141] sm:$0xff]  ;;  %v2960_v49 = vld [vmem:[%s6307_s0 + $0x72] sm:$0xff] }
 0x18b   :  { %v978_v25 = vpop.f32.mrf.mxu1  ;;  %v1264_v21 = vpop.f32.mrf.mxu0  ;;  %4102 = vmatmul.mubr.f32.gmra.mxu1 %v2916_v40  ;;  %4200 = vmatmul.mubr.f32.gmra.mxu0 %v2954_v14 }
 0x18c   :  { %v1091_v26 = vadd.f32 %v978_v25, %v5582_v31  ;;  %v5920_v33 = vadd.f32 %v1264_v21, %v1090_v23  ;;  %4104 = vmatprep.mubr.msk.f32.mxu1 %vm4283_vm0, %v4282_v0  ;;  %4202 = vmatprep.mubr.msk.f32.mxu0 %vm4283_vm0, %v4282_v0 }
 0x18d   :  { %v3693_v34 = vpop.f32.mrf.mxu1  ;;  %v3791_v54 = vpop.f32.mrf.mxu0 }
 0x18e   :  { %v2923_v34 = vld [vmem:[%s6307_s0 + $0x149] sm:$0xff]  ;;  %v2961_v54 = vld [vmem:[%s6307_s0 + $0x7a] sm:$0xff] }
 0x18f   :  { %v983_v53 = vpop.f32.mrf.mxu1  ;;  %v1269_v31 = vpop.f32.mrf.mxu0  ;;  %4105 = vmatmul.mubr.f32.gmra.mxu1 %v2917_v27  ;;  %4203 = vmatmul.mubr.f32.gmra.mxu0 %v2955_v28 }
 0x190   :  { %v1092_v36 = vadd.f32 %v983_v53, %v5603_v39  ;;  %v5933_v12 = vadd.f32 %v1269_v31, %v1091_v26  ;;  %4107 = vmatprep.mubr.msk.f32.mxu1 %vm4283_vm0, %v4282_v0  ;;  %4205 = vmatprep.mubr.msk.f32.mxu0 %vm4283_vm0, %v4282_v0 }
 0x191   :  { %v3696_v43 = vpop.f32.mrf.mxu1  ;;  %v3794_v5 = vpop.f32.mrf.mxu0 }
 0x192   :  { %v2924_v43 = vld [vmem:[%s6307_s0 + $0x151] sm:$0xff]  ;;  %v2962_v5 = vld [vmem:[%s6307_s0 + $0x82] sm:$0xff] }
 0x193   :  { %v988_v61 = vpop.f32.mrf.mxu1  ;;  %v1274_v39 = vpop.f32.mrf.mxu0  ;;  %4108 = vmatmul.mubr.f32.gmra.mxu1 %v2918_v15  ;;  %4206 = vmatmul.mubr.f32.gmra.mxu0 %v2956_v38 }
 0x194   :  { %v1093_v45 = vadd.f32 %v988_v61, %v5624_v48  ;;  %v5946_v46 = vadd.f32 %v1274_v39, %v1092_v36  ;;  %4110 = vmatprep.mubr.msk.f32.mxu1 %vm4283_vm0, %v4282_v0  ;;  %4208 = vmatprep.mubr.msk.f32.mxu0 %vm4283_vm0, %v4282_v0 }
 0x195   :  { %v3699_v50 = vpop.f32.mrf.mxu1  ;;  %v3797_v22 = vpop.f32.mrf.mxu0 }
 0x196   :  { %v2925_v50 = vld [vmem:[%s6307_s0 + $0x159] sm:$0xff]  ;;  %v2963_v22 = vld [vmem:[%s6307_s0 + $0x8a] sm:$0xff] }
 0x197   :  { %v993_v4 = vpop.f32.mrf.mxu1  ;;  %v1279_v48 = vpop.f32.mrf.mxu0  ;;  %4111 = vmatmul.mubr.f32.gmra.mxu1 %v2919_v24  ;;  %4209 = vmatmul.mubr.f32.gmra.mxu0 %v2957_v18 }
 0x198   :  { %v1094_v52 = vadd.f32 %v993_v4, %v5645_v55  ;;  %v5959_v56 = vadd.f32 %v1279_v48, %v1093_v45  ;;  %4113 = vmatprep.mubr.msk.f32.mxu1 %vm4283_vm0, %v4282_v0  ;;  %4211 = vmatprep.mubr.msk.f32.mxu0 %vm4283_vm0, %v4282_v0 }
 0x199   :  { %v3702_v29 = vpop.f32.mrf.mxu1  ;;  %v3800_v37 = vpop.f32.mrf.mxu0 }
 0x19a   :  { %v2926_v29 = vld [vmem:[%s6307_s0 + $0x161] sm:$0xff]  ;;  %v2964_v37 = vld [vmem:[%s6307_s0 + $0x92] sm:$0xff] }
 0x19b   :  { %v998_v10 = vpop.f32.mrf.mxu1  ;;  %v1284_v55 = vpop.f32.mrf.mxu0  ;;  %4114 = vmatmul.mubr.f32.gmra.mxu1 %v2920_v58  ;;  %4212 = vmatmul.mubr.f32.gmra.mxu0 %v2958_v32 }
 0x19c   :  { %v1095_v63 = vadd.f32 %v998_v10, %v5666_v60  ;;  %v5972_v1 = vadd.f32 %v1284_v55, %v1094_v52  ;;  %4116 = vmatprep.mubr.msk.f32.mxu1 %vm4283_vm0, %v4282_v0  ;;  %4214 = vmatprep.mubr.msk.f32.mxu0 %vm4283_vm0, %v4282_v0 }
 0x19d   :  { %v3705_v8 = vpop.f32.mrf.mxu1  ;;  %v3803_v11 = vpop.f32.mrf.mxu0 }
 0x19e   :  { %v2927_v8 = vld [vmem:[%s6307_s0 + $0x169] sm:$0xff]  ;;  %v2965_v11 = vld [vmem:[%s6307_s0 + $0x9a] sm:$0xff] }
 0x19f   :  { %v1003_v23 = vpop.f32.mrf.mxu1  ;;  %v1289_v60 = vpop.f32.mrf.mxu0  ;;  %4117 = vmatmul.mubr.f32.gmra.mxu1 %v2921_v6  ;;  %4215 = vmatmul.mubr.f32.gmra.mxu0 %v2959_v42 }
 0x1a0   :  { %v1096_v40 = vadd.f32 %v1003_v23, %v5686_v20  ;;  %v5985_v14 = vadd.f32 %v1289_v60, %v1095_v63  ;;  %4119 = vmatprep.mubr.msk.f32.mxu1 %vm4283_vm0, %v4282_v0  ;;  %4217 = vmatprep.mubr.msk.f32.mxu0 %vm4283_vm0, %v4282_v0 }
 0x1a1   :  { %v3708_v25 = vpop.f32.mrf.mxu1  ;;  %v3806_v21 = vpop.f32.mrf.mxu0 }
 0x1a2   :  { %v2928_v25 = vld [vmem:[%s6307_s0 + $0x171] sm:$0xff]  ;;  %v2966_v21 = vld [vmem:[%s6307_s0 + $0xa2] sm:$0xff] }
 0x1a3   :  { %v1008_v26 = vpop.f32.mrf.mxu1  ;;  %v1294_v20 = vpop.f32.mrf.mxu0  ;;  %4120 = vmatmul.mubr.f32.gmra.mxu1 %v2922_v17  ;;  %4218 = vmatmul.mubr.f32.gmra.mxu0 %v2960_v49 }
 0x1a4   :  { %v1097_v27 = vadd.f32 %v1008_v26, %v5707_v9  ;;  %v5998_v28 = vadd.f32 %v1294_v20, %v1096_v40  ;;  %4122 = vmatprep.mubr.msk.f32.mxu1 %vm4283_vm0, %v4282_v0  ;;  %4220 = vmatprep.mubr.msk.f32.mxu0 %vm4283_vm0, %v4282_v0 }
 0x1a5   :  { %v3711_v53 = vpop.f32.mrf.mxu1  ;;  %v3809_v31 = vpop.f32.mrf.mxu0 }
 0x1a6   :  { %v2929_v53 = vld [vmem:[%s6307_s0 + $0x179] sm:$0xff]  ;;  %v2967_v31 = vld [vmem:[%s6307_s0 + $0xaa] sm:$0xff] }
 0x1a7   :  { %v1013_v36 = vpop.f32.mrf.mxu1  ;;  %v1299_v9 = vpop.f32.mrf.mxu0  ;;  %4123 = vmatmul.mubr.f32.gmra.mxu1 %v2923_v34  ;;  %4221 = vmatmul.mubr.f32.gmra.mxu0 %v2961_v54 }
 0x1a8   :  { %v1098_v15 = vadd.f32 %v1013_v36, %v5724_v19  ;;  %v6011_v38 = vadd.f32 %v1299_v9, %v1097_v27  ;;  %4125 = vmatprep.mubr.msk.f32.mxu1 %vm4283_vm0, %v4282_v0  ;;  %4223 = vmatprep.mubr.msk.f32.mxu0 %vm4283_vm0, %v4282_v0 }
 0x1a9   :  { %v3714_v61 = vpop.f32.mrf.mxu1  ;;  %v3812_v39 = vpop.f32.mrf.mxu0 }
 0x1aa   :  { %v2930_v61 = vld [vmem:[%s6307_s0 + $0x181] sm:$0xff]  ;;  %v2968_v39 = vld [vmem:[%s6307_s0 + $0xb2] sm:$0xff] }
 0x1ab   :  { %v1018_v45 = vpop.f32.mrf.mxu1  ;;  %v1304_v19 = vpop.f32.mrf.mxu0  ;;  %4126 = vmatmul.mubr.f32.gmra.mxu1 %v2924_v43  ;;  %4224 = vmatmul.mubr.f32.gmra.mxu0 %v2962_v5 }
 0x1ac   :  { %v1099_v24 = vadd.f32 %v1018_v45, %v5737_v57  ;;  %v6024_v18 = vadd.f32 %v1304_v19, %v1098_v15  ;;  %4128 = vmatprep.mubr.msk.f32.mxu1 %vm4283_vm0, %v4282_v0  ;;  %4226 = vmatprep.mubr.msk.f32.mxu0 %vm4283_vm0, %v4282_v0 }
 0x1ad   :  { %v3717_v4 = vpop.f32.mrf.mxu1  ;;  %v3815_v48 = vpop.f32.mrf.mxu0 }
 0x1ae   :  { %v2969_v4 = vld [vmem:[%s6307_s0 + $0xba] sm:$0xff] }
 0x1af   :  { %v1023_v52 = vpop.f32.mrf.mxu1  ;;  %v1309_v57 = vpop.f32.mrf.mxu0  ;;  %4129 = vmatmul.mubr.f32.gmra.mxu1 %v2925_v50  ;;  %4227 = vmatmul.mubr.f32.gmra.mxu0 %v2963_v22 }
 0x1b0   :  { %v1100_v58 = vadd.f32 %v1023_v52, %v5750_v2  ;;  %v6037_v32 = vadd.f32 %v1309_v57, %v1099_v24  ;;  %4131 = vmatprep.mubr.msk.f32.mxu1 %vm4283_vm0, %v4282_v0  ;;  %4229 = vmatprep.mubr.msk.f32.mxu0 %vm4283_vm0, %v4282_v0 }
 0x1b1   :  { %v3720_v10 = vpop.f32.mrf.mxu1  ;;  %v3818_v55 = vpop.f32.mrf.mxu0 }
 0x1b3   :  { %v1028_v63 = vpop.f32.mrf.mxu1  ;;  %v1314_v2 = vpop.f32.mrf.mxu0  ;;  %4132 = vmatmul.mubr.f32.gmra.mxu1 %v2926_v29  ;;  %4230 = vmatmul.mubr.f32.gmra.mxu0 %v2964_v37 }
 0x1b4   :  { %v1101_v6 = vadd.f32 %v1028_v63, %v5763_v16  ;;  %v6050_v42 = vadd.f32 %v1314_v2, %v1100_v58  ;;  %4134 = vmatprep.mubr.msk.f32.mxu1 %vm4283_vm0, %v4282_v0  ;;  %4232 = vmatprep.mubr.msk.f32.mxu0 %vm4283_vm0, %v4282_v0 }
 0x1b5   :  { %v3723_v23 = vpop.f32.mrf.mxu1  ;;  %v3821_v60 = vpop.f32.mrf.mxu0 }
 0x1b7   :  { %v1033_v40 = vpop.f32.mrf.mxu1  ;;  %v1319_v16 = vpop.f32.mrf.mxu0  ;;  %4135 = vmatmul.mubr.f32.gmra.mxu1 %v2927_v8  ;;  %4233 = vmatmul.mubr.f32.gmra.mxu0 %v2965_v11 }
 0x1b8   :  { %v1102_v17 = vadd.f32 %v1033_v40, %v5776_v30  ;;  %v6063_v49 = vadd.f32 %v1319_v16, %v1101_v6  ;;  %4137 = vmatprep.mubr.msk.f32.mxu1 %vm4283_vm0, %v4282_v0  ;;  %4235 = vmatprep.mubr.msk.f32.mxu0 %vm4283_vm0, %v4282_v0 }
 0x1b9   :  { %v3726_v26 = vpop.f32.mrf.mxu1  ;;  %v3824_v20 = vpop.f32.mrf.mxu0 }
 0x1bb   :  { %v1038_v27 = vpop.f32.mrf.mxu1  ;;  %v1324_v30 = vpop.f32.mrf.mxu0  ;;  %4138 = vmatmul.mubr.f32.gmra.mxu1 %v2928_v25  ;;  %4236 = vmatmul.mubr.f32.gmra.mxu0 %v2966_v21 }
 0x1bc   :  { %v1103_v34 = vadd.f32 %v1038_v27, %v5789_v41  ;;  %v6076_v54 = vadd.f32 %v1324_v30, %v1102_v17  ;;  %4140 = vmatprep.mubr.msk.f32.mxu1 %vm4283_vm0, %v4282_v0  ;;  %4238 = vmatprep.mubr.msk.f32.mxu0 %vm4283_vm0, %v4282_v0 }
 0x1bd   :  { %v3729_v36 = vpop.f32.mrf.mxu1  ;;  %v3827_v9 = vpop.f32.mrf.mxu0 }
 0x1bf   :  { %v1043_v15 = vpop.f32.mrf.mxu1  ;;  %v1329_v41 = vpop.f32.mrf.mxu0  ;;  %4141 = vmatmul.mubr.f32.gmra.mxu1 %v2929_v53  ;;  %4239 = vmatmul.mubr.f32.gmra.mxu0 %v2967_v31 }
 0x1c0   :  { %v1104_v43 = vadd.f32 %v1043_v15, %v5802_v47  ;;  %v6089_v5 = vadd.f32 %v1329_v41, %v1103_v34  ;;  %4143 = vmatprep.mubr.msk.f32.mxu1 %vm4283_vm0, %v4282_v0  ;;  %4241 = vmatprep.mubr.msk.f32.mxu0 %vm4283_vm0, %v4282_v0 }
 0x1c1   :  { %v3732_v45 = vpop.f32.mrf.mxu1  ;;  %v3830_v19 = vpop.f32.mrf.mxu0 }
 0x1c3   :  { %v1048_v24 = vpop.f32.mrf.mxu1  ;;  %v1334_v47 = vpop.f32.mrf.mxu0  ;;  %4144 = vmatmul.mubr.f32.gmra.mxu1 %v2930_v61  ;;  %4242 = vmatmul.mubr.f32.gmra.mxu0 %v2968_v39 }
 0x1c4   :  { %v1105_v50 = vadd.f32 %v1048_v24, %v5815_v59  ;;  %v6102_v22 = vadd.f32 %v1334_v47, %v1104_v43  ;;  %4244 = vmatprep.mubr.msk.f32.mxu0 %vm4283_vm0, %v4282_v0 }
 0x1c5   :  { %v3735_v48 = vpop.f32.mrf.mxu1  ;;  %v3833_v52 = vpop.f32.mrf.mxu0 }
 0x1c7   :  { %v1053_v57 = vpop.f32.mrf.mxu1  ;;  %v1339_v58 = vpop.f32.mrf.mxu0  ;;  %4245 = vmatmul.mubr.f32.gmra.mxu0 %v2969_v4 }
 0x1c8   :  { %v1106_v29 = vadd.f32 %v1053_v57, %v5828_v7  ;;  %v6110_v37 = vadd.f32 %v1339_v58, %v1105_v50 }
 0x1c9   :  { %v3738_v10 = vpop.f32.mrf.mxu1  ;;  %v3836_v59 = vpop.f32.mrf.mxu0 }
 0x1cb   :  { %v1058_v55 = vpop.f32.mrf.mxu1  ;;  %v1344_v63 = vpop.f32.mrf.mxu0 }
 0x1cc   :  { %v1107_v2 = vadd.f32 %v1058_v55, %v5841_v3  ;;  %v6113_v0 = vadd.f32 %v1344_v63, %v1106_v29 }
 0x1cd   :  { %v3741_v6 = vpop.f32.mrf.mxu1  ;;  %v3839_v8 = vpop.f32.mrf.mxu0 }
 0x1cf   :  { %v1349_v11 = vpop.f32.mrf.mxu0  ;;  %v1530_v23 = vpop.f32.mrf.mxu1 }
 0x1d0   :  { %v6115_v60 = vadd.f32 %v1349_v11, %v1107_v2  ;;  %v1667_v40 = vadd.f32 %v1530_v23, %v5855_v35 }
 0x1d1   :  { %v3842_v16 = vpop.f32.mrf.mxu0  ;;  %v3877_v7 = vpop.f32.mrf.mxu1 }
 0x1d3   :  { %v1535_v17 = vpop.f32.mrf.mxu1  ;;  %v1821_v25 = vpop.f32.mrf.mxu0 }
 0x1d4   :  { %v1668_v21 = vadd.f32 %v1535_v17, %v5868_v44  ;;  %v6119_v26 = vadd.f32 %v1821_v25, %v1667_v40 }
 0x1d5   :  { %v3880_v20 = vpop.f32.mrf.mxu1  ;;  %v3978_v3 = vpop.f32.mrf.mxu0 }
 0x1d7   :  { %v1540_v27 = vpop.f32.mrf.mxu1  ;;  %v1826_v30 = vpop.f32.mrf.mxu0 }
 0x1d8   :  { %v1669_v34 = vadd.f32 %v1540_v27, %v5881_v51  ;;  %v6122_v53 = vadd.f32 %v1826_v30, %v1668_v21 }
 0x1d9   :  { %v3883_v31 = vpop.f32.mrf.mxu1  ;;  %v3981_v36 = vpop.f32.mrf.mxu0 }
 0x1db   :  { %v1545_v9 = vpop.f32.mrf.mxu1  ;;  %v1831_v35 = vpop.f32.mrf.mxu0 }
 0x1dc   :  { %v1670_v15 = vadd.f32 %v1545_v9, %v5894_v62  ;;  %v6125_v41 = vadd.f32 %v1831_v35, %v1669_v34 }
 0x1dd   :  { %v3886_v43 = vpop.f32.mrf.mxu1  ;;  %v3984_v44 = vpop.f32.mrf.mxu0 }
 0x1df   :  { %v1550_v61 = vpop.f32.mrf.mxu1  ;;  %v1836_v39 = vpop.f32.mrf.mxu0 }
 0x1e0   :  { %v1671_v45 = vadd.f32 %v1550_v61, %v5907_v13  ;;  %v6128_v19 = vadd.f32 %v1836_v39, %v1670_v15 }
 0x1e1   :  { %v3889_v24 = vpop.f32.mrf.mxu1  ;;  %v3987_v51 = vpop.f32.mrf.mxu0 }
 0x1e3   :  { %v1555_v47 = vpop.f32.mrf.mxu1  ;;  %v1841_v50 = vpop.f32.mrf.mxu0 }
 0x1e4   :  { %v1672_v4 = vadd.f32 %v1555_v47, %v5920_v33  ;;  %v6131_v48 = vadd.f32 %v1841_v50, %v1671_v45 }
 0x1e5   :  { %v3892_v52 = vpop.f32.mrf.mxu1  ;;  %v3990_v62 = vpop.f32.mrf.mxu0 }
 0x1e7   :  { %v1560_v57 = vpop.f32.mrf.mxu1  ;;  %v1846_v58 = vpop.f32.mrf.mxu0 }
 0x1e8   :  { %v1673_v29 = vadd.f32 %v1560_v57, %v5933_v12  ;;  %v6134_v10 = vadd.f32 %v1846_v58, %v1672_v4 }
 0x1e9   :  { %v3895_v59 = vpop.f32.mrf.mxu1  ;;  %v3993_v13 = vpop.f32.mrf.mxu0 }
 0x1eb   :  { %v1565_v55 = vpop.f32.mrf.mxu1  ;;  %v1851_v63 = vpop.f32.mrf.mxu0 }
 0x1ec   :  { %v1674_v2 = vadd.f32 %v1565_v55, %v5946_v46  ;;  %v6137_v6 = vadd.f32 %v1851_v63, %v1673_v29 }
 0x1ed   :  { %v3898_v8 = vpop.f32.mrf.mxu1  ;;  %v3996_v33 = vpop.f32.mrf.mxu0 }
 0x1ef   :  { %v1570_v11 = vpop.f32.mrf.mxu1  ;;  %v1856_v23 = vpop.f32.mrf.mxu0 }
 0x1f0   :  { %v1675_v40 = vadd.f32 %v1570_v11, %v5959_v56  ;;  %v6140_v16 = vadd.f32 %v1856_v23, %v1674_v2 }
 0x1f1   :  { %v3901_v7 = vpop.f32.mrf.mxu1  ;;  %v3999_v12 = vpop.f32.mrf.mxu0 }
 0x1f3   :  { %v1575_v17 = vpop.f32.mrf.mxu1  ;;  %v1861_v25 = vpop.f32.mrf.mxu0 }
 0x1f4   :  { %v1676_v21 = vadd.f32 %v1575_v17, %v5972_v1  ;;  %v6143_v20 = vadd.f32 %v1861_v25, %v1675_v40 }
 0x1f5   :  { %v3904_v3 = vpop.f32.mrf.mxu1  ;;  %v4002_v46 = vpop.f32.mrf.mxu0 }
 0x1f7   :  { %v1580_v27 = vpop.f32.mrf.mxu1  ;;  %v1866_v30 = vpop.f32.mrf.mxu0 }
 0x1f8   :  { %v1677_v34 = vadd.f32 %v1580_v27, %v5985_v14  ;;  %v6146_v31 = vadd.f32 %v1866_v30, %v1676_v21 }
 0x1f9   :  { %v3907_v36 = vpop.f32.mrf.mxu1  ;;  %v4005_v56 = vpop.f32.mrf.mxu0 }
 0x1fb   :  { %v1585_v9 = vpop.f32.mrf.mxu1  ;;  %v1871_v35 = vpop.f32.mrf.mxu0 }
 0x1fc   :  { %v1678_v15 = vadd.f32 %v1585_v9, %v5998_v28  ;;  %v6149_v43 = vadd.f32 %v1871_v35, %v1677_v34 }
 0x1fd   :  { %v3910_v44 = vpop.f32.mrf.mxu1  ;;  %v4008_v1 = vpop.f32.mrf.mxu0 }
 0x1ff   :  { %v1590_v61 = vpop.f32.mrf.mxu1  ;;  %v1876_v39 = vpop.f32.mrf.mxu0 }
 0x200   :  { %v1679_v45 = vadd.f32 %v1590_v61, %v6011_v38  ;;  %v6152_v24 = vadd.f32 %v1876_v39, %v1678_v15 }
 0x201   :  { %v3913_v51 = vpop.f32.mrf.mxu1  ;;  %v4011_v14 = vpop.f32.mrf.mxu0 }
 0x203   :  { %v1595_v47 = vpop.f32.mrf.mxu1  ;;  %v1881_v50 = vpop.f32.mrf.mxu0 }
 0x204   :  { %v1680_v4 = vadd.f32 %v1595_v47, %v6024_v18  ;;  %v6155_v52 = vadd.f32 %v1881_v50, %v1679_v45 }
 0x205   :  { %v3916_v62 = vpop.f32.mrf.mxu1  ;;  %v4014_v28 = vpop.f32.mrf.mxu0 }
 0x207   :  { %v1600_v57 = vpop.f32.mrf.mxu1  ;;  %v1886_v58 = vpop.f32.mrf.mxu0 }
 0x208   :  { %v1681_v29 = vadd.f32 %v1600_v57, %v6037_v32  ;;  %v6158_v59 = vadd.f32 %v1886_v58, %v1680_v4 }
 0x209   :  { %v3919_v13 = vpop.f32.mrf.mxu1  ;;  %v4017_v38 = vpop.f32.mrf.mxu0 }
 0x20b   :  { %v1605_v55 = vpop.f32.mrf.mxu1  ;;  %v1891_v63 = vpop.f32.mrf.mxu0 }
 0x20c   :  { %v1682_v2 = vadd.f32 %v1605_v55, %v6050_v42  ;;  %v6161_v8 = vadd.f32 %v1891_v63, %v1681_v29 }
 0x20d   :  { %v3922_v33 = vpop.f32.mrf.mxu1  ;;  %v4020_v18 = vpop.f32.mrf.mxu0 }
 0x20f   :  { %v1610_v11 = vpop.f32.mrf.mxu1  ;;  %v1896_v23 = vpop.f32.mrf.mxu0 }
 0x210   :  { %v1683_v40 = vadd.f32 %v1610_v11, %v6063_v49  ;;  %v6164_v7 = vadd.f32 %v1896_v23, %v1682_v2 }
 0x211   :  { %v3925_v12 = vpop.f32.mrf.mxu1  ;;  %v4023_v32 = vpop.f32.mrf.mxu0 }
 0x213   :  { %v1615_v17 = vpop.f32.mrf.mxu1  ;;  %v1901_v25 = vpop.f32.mrf.mxu0 }
 0x214   :  { %v1684_v21 = vadd.f32 %v1615_v17, %v6076_v54  ;;  %v6167_v3 = vadd.f32 %v1901_v25, %v1683_v40  ;;  %v6190_v40 = vld [vmem:[%s6308_s2] ss:$0 sm:$0xff] }
 0x215   :  { %v3928_v46 = vpop.f32.mrf.mxu1  ;;  %v4026_v42 = vpop.f32.mrf.mxu0 }
 0x217   :  { %v1620_v27 = vpop.f32.mrf.mxu1  ;;  %v1906_v30 = vpop.f32.mrf.mxu0 }
 0x218   :  { %v1685_v34 = vadd.f32 %v1620_v27, %v6089_v5  ;;  %v6170_v36 = vadd.f32 %v1906_v30, %v1684_v21 }
 0x219   :  { %v3931_v56 = vpop.f32.mrf.mxu1  ;;  %v4029_v49 = vpop.f32.mrf.mxu0 }
 0x21b   :  { %v1625_v9 = vpop.f32.mrf.mxu1  ;;  %v1911_v35 = vpop.f32.mrf.mxu0 }
 0x21c   :  { %v1686_v15 = vadd.f32 %v1625_v9, %v6102_v22  ;;  %v6173_v44 = vadd.f32 %v1911_v35, %v1685_v34 }
 0x21d   :  { %v3934_v1 = vpop.f32.mrf.mxu1  ;;  %v4032_v54 = vpop.f32.mrf.mxu0 }
 0x21f   :  { %v1630_v61 = vpop.f32.mrf.mxu1  ;;  %v1916_v39 = vpop.f32.mrf.mxu0 }
 0x220   :  { %v1687_v45 = vadd.f32 %v1630_v61, %v6110_v37  ;;  %v6176_v51 = vadd.f32 %v1916_v39, %v1686_v15 }
 0x221   :  { %v3937_v14 = vpop.f32.mrf.mxu1  ;;  %v4035_v5 = vpop.f32.mrf.mxu0 }
 0x223   :  { %v1635_v47 = vpop.f32.mrf.mxu1  ;;  %v1921_v50 = vpop.f32.mrf.mxu0 }
 0x224   :  { %v1688_v4 = vadd.f32 %v1635_v47, %v6113_v0  ;;  %v6179_v62 = vadd.f32 %v1921_v50, %v1687_v45 }
 0x225   :  { %v3940_v28 = vpop.f32.mrf.mxu1  ;;  %v4038_v22 = vpop.f32.mrf.mxu0 }
 0x227   :  { %v1640_v57 = vpop.f32.mrf.mxu1  ;;  %v1926_v58 = vpop.f32.mrf.mxu0 }
 0x228   :  { %v1689_v29 = vadd.f32 %v1640_v57, %v6115_v60  ;;  %v6182_v13 = vadd.f32 %v1926_v58, %v1688_v4 }
 0x229   :  { %v3943_v38 = vpop.f32.mrf.mxu1  ;;  %v4041_v37 = vpop.f32.mrf.mxu0 }
 0x22b   :  { %v1931_v55 = vpop.f32.mrf.mxu0  ;;  %v2112_v63 = vpop.f32.mrf.mxu1 }
 0x22c   :  { %v6184_v2 = vadd.f32 %v1931_v55, %v1689_v29  ;;  %v2249_v0 = vadd.f32 %v2112_v63, %v6119_v26 }
 0x22d   :  { %v4044_v33 = vpop.f32.mrf.mxu0  ;;  %v4079_v18 = vpop.f32.mrf.mxu1 }
 0x22f   :  { %v2117_v11 = vpop.f32.mrf.mxu1  ;;  %v2403_v23 = vpop.f32.mrf.mxu0 }
 0x230   :  { %v2540_v60 = vadd.f32 %v2403_v23, %v2249_v0  ;;  %v2250_v17 = vadd.f32 %v2117_v11, %v6122_v53 }
 0x231   :  { %v4082_v12 = vpop.f32.mrf.mxu1  ;;  %v4180_v32 = vpop.f32.mrf.mxu0 }
 0x232   :  { %v2616_v25 = vadd.f32 %v6190_v40, %v2540_v60 }
 0x233   :  { %v2122_v21 = vpop.f32.mrf.mxu1  ;;  %v2408_v46 = vpop.f32.mrf.mxu0 }
 0x234   :  { %2639 = vst [vmem:[%s6309_s3] sm:$0xff] %v2616_v25  ;;  %v2541_v26 = vadd.f32 %v2408_v46, %v2250_v17  ;;  %v2251_v30 = vadd.f32 %v2122_v21, %v6125_v41 }
 0x235   :  { %v4085_v42 = vpop.f32.mrf.mxu1  ;;  %v4183_v27 = vpop.f32.mrf.mxu0 }
 0x236   :  { %v2617_v34 = vadd.f32 %v6190_v40, %v2541_v26 }
 0x237   :  { %v2127_v56 = vpop.f32.mrf.mxu1  ;;  %v2413_v49 = vpop.f32.mrf.mxu0 }
 0x238   :  { %2640 = vst [vmem:[%s6309_s3 + $0x8] sm:$0xff] %v2617_v34  ;;  %v2542_v53 = vadd.f32 %v2413_v49, %v2251_v30  ;;  %v2252_v15 = vadd.f32 %v2127_v56, %v6128_v19 }
 0x239   :  { %v4088_v9 = vpop.f32.mrf.mxu1  ;;  %v4186_v35 = vpop.f32.mrf.mxu0 }
 0x23a   :  { %v2618_v1 = vadd.f32 %v6190_v40, %v2542_v53 }
 0x23b   :  { %v2132_v54 = vpop.f32.mrf.mxu1  ;;  %v2418_v61 = vpop.f32.mrf.mxu0 }
 0x23c   :  { %2641 = vst [vmem:[%s6309_s3 + $0x10] sm:$0xff] %v2618_v1  ;;  %v2543_v41 = vadd.f32 %v2418_v61, %v2252_v15  ;;  %v2253_v14 = vadd.f32 %v2132_v54, %v6131_v48 }
 0x23d   :  { %v4091_v39 = vpop.f32.mrf.mxu1  ;;  %v4189_v45 = vpop.f32.mrf.mxu0 }
 0x23e   :  { %v2619_v5 = vadd.f32 %v6190_v40, %v2543_v41 }
 0x23f   :  { %v2137_v47 = vpop.f32.mrf.mxu1  ;;  %v2423_v50 = vpop.f32.mrf.mxu0 }
 0x240   :  { %2642 = vst [vmem:[%s6309_s3 + $0x18] sm:$0xff] %v2619_v5  ;;  %v2544_v19 = vadd.f32 %v2423_v50, %v2253_v14  ;;  %v2254_v22 = vadd.f32 %v2137_v47, %v6134_v10 }
 0x241   :  { %v4094_v4 = vpop.f32.mrf.mxu1  ;;  %v4192_v28 = vpop.f32.mrf.mxu0 }
 0x242   :  { %v2620_v57 = vadd.f32 %v6190_v40, %v2544_v19 }
 0x243   :  { %v2142_v58 = vpop.f32.mrf.mxu1  ;;  %v2428_v29 = vpop.f32.mrf.mxu0 }
 0x244   :  { %2643 = vst [vmem:[%s6309_s3 + $0x20] sm:$0xff] %v2620_v57  ;;  %v2545_v48 = vadd.f32 %v2428_v29, %v2254_v22  ;;  %v2255_v55 = vadd.f32 %v2142_v58, %v6137_v6 }
 0x245   :  { %v4097_v38 = vpop.f32.mrf.mxu1  ;;  %v4195_v37 = vpop.f32.mrf.mxu0 }
 0x246   :  { %v2621_v63 = vadd.f32 %v6190_v40, %v2545_v48 }
 0x247   :  { %v2147_v33 = vpop.f32.mrf.mxu1  ;;  %v2433_v18 = vpop.f32.mrf.mxu0 }
 0x248   :  { %2644 = vst [vmem:[%s6309_s3 + $0x28] sm:$0xff] %v2621_v63  ;;  %v2546_v10 = vadd.f32 %v2433_v18, %v2255_v55  ;;  %v2256_v23 = vadd.f32 %v2147_v33, %v6140_v16 }
 0x249   :  { %v4100_v0 = vpop.f32.mrf.mxu1  ;;  %v4198_v11 = vpop.f32.mrf.mxu0 }
 0x24a   :  { %v2622_v60 = vadd.f32 %v6190_v40, %v2546_v10 }
 0x24b   :  { %v2152_v12 = vpop.f32.mrf.mxu1  ;;  %v2438_v32 = vpop.f32.mrf.mxu0 }
 0x24c   :  { %2645 = vst [vmem:[%s6309_s3 + $0x30] sm:$0xff] %v2622_v60  ;;  %v2547_v6 = vadd.f32 %v2438_v32, %v2256_v23  ;;  %v2257_v21 = vadd.f32 %v2152_v12, %v6143_v20 }
 0x24d   :  { %v4103_v17 = vpop.f32.mrf.mxu1  ;;  %v4201_v25 = vpop.f32.mrf.mxu0 }
 0x24e   :  { %v2623_v46 = vadd.f32 %v6190_v40, %v2547_v6 }
 0x24f   :  { %v2157_v26 = vpop.f32.mrf.mxu1  ;;  %v2443_v42 = vpop.f32.mrf.mxu0 }
 0x250   :  { %2646 = vst [vmem:[%s6309_s3 + $0x38] sm:$0xff] %v2623_v46  ;;  %v2548_v16 = vadd.f32 %v2443_v42, %v2257_v21  ;;  %v2258_v34 = vadd.f32 %v2157_v26, %v6146_v31 }
 0x251   :  { %v4106_v27 = vpop.f32.mrf.mxu1  ;;  %v4204_v30 = vpop.f32.mrf.mxu0 }
 0x252   :  { %v2624_v56 = vadd.f32 %v6190_v40, %v2548_v16 }
 0x253   :  { %v2162_v49 = vpop.f32.mrf.mxu1  ;;  %v2448_v53 = vpop.f32.mrf.mxu0 }
 0x254   :  { %2647 = vst [vmem:[%s6309_s3 + $0x40] sm:$0xff] %v2624_v56  ;;  %v2549_v20 = vadd.f32 %v2448_v53, %v2258_v34  ;;  %v2259_v15 = vadd.f32 %v2162_v49, %v6149_v43 }
 0x255   :  { %v4109_v9 = vpop.f32.mrf.mxu1  ;;  %v4207_v35 = vpop.f32.mrf.mxu0 }
 0x256   :  { %v2625_v1 = vadd.f32 %v6190_v40, %v2549_v20 }
 0x257   :  { %v2167_v54 = vpop.f32.mrf.mxu1  ;;  %v2453_v61 = vpop.f32.mrf.mxu0 }
 0x258   :  { %2648 = vst [vmem:[%s6309_s3 + $0x48] sm:$0xff] %v2625_v1  ;;  %v2550_v31 = vadd.f32 %v2453_v61, %v2259_v15  ;;  %v2260_v45 = vadd.f32 %v2167_v54, %v6152_v24 }
 0x259   :  { %v4112_v41 = vpop.f32.mrf.mxu1  ;;  %v4210_v39 = vpop.f32.mrf.mxu0 }
 0x25a   :  { %v2626_v14 = vadd.f32 %v6190_v40, %v2550_v31 }
 0x25b   :  { %v2172_v5 = vpop.f32.mrf.mxu1  ;;  %v2458_v47 = vpop.f32.mrf.mxu0 }
 0x25c   :  { %2649 = vst [vmem:[%s6309_s3 + $0x50] sm:$0xff] %v2626_v14  ;;  %v2551_v43 = vadd.f32 %v2458_v47, %v2260_v45  ;;  %v2261_v4 = vadd.f32 %v2172_v5, %v6155_v52 }
 0x25d   :  { %v4115_v50 = vpop.f32.mrf.mxu1  ;;  %v4213_v19 = vpop.f32.mrf.mxu0 }
 0x25e   :  { %v2627_v28 = vadd.f32 %v6190_v40, %v2551_v43 }
 0x25f   :  { %v2177_v22 = vpop.f32.mrf.mxu1  ;;  %v2463_v57 = vpop.f32.mrf.mxu0 }
 0x260   :  { %2650 = vst [vmem:[%s6309_s3 + $0x58] sm:$0xff] %v2627_v28  ;;  %v2552_v24 = vadd.f32 %v2463_v57, %v2261_v4  ;;  %v2262_v48 = vadd.f32 %v2177_v22, %v6158_v59 }
 0x261   :  { %v4118_v58 = vpop.f32.mrf.mxu1  ;;  %v4216_v29 = vpop.f32.mrf.mxu0 }
 0x262   :  { %v2628_v38 = vadd.f32 %v6190_v40, %v2552_v24 }
 0x263   :  { %v2182_v37 = vpop.f32.mrf.mxu1  ;;  %v2468_v55 = vpop.f32.mrf.mxu0 }
 0x264   :  { %2651 = vst [vmem:[%s6309_s3 + $0x60] sm:$0xff] %v2628_v38  ;;  %v2553_v52 = vadd.f32 %v2468_v55, %v2262_v48  ;;  %v2263_v18 = vadd.f32 %v2182_v37, %v6161_v8 }
 0x265   :  { %v4121_v63 = vpop.f32.mrf.mxu1  ;;  %v4219_v33 = vpop.f32.mrf.mxu0 }
 0x266   :  { %v2629_v10 = vadd.f32 %v6190_v40, %v2553_v52 }
 0x267   :  { %v2187_v0 = vpop.f32.mrf.mxu1  ;;  %v2473_v11 = vpop.f32.mrf.mxu0 }
 0x268   :  { %2652 = vst [vmem:[%s6309_s3 + $0x68] sm:$0xff] %v2629_v10  ;;  %v2554_v59 = vadd.f32 %v2473_v11, %v2263_v18  ;;  %v2264_v12 = vadd.f32 %v2187_v0, %v6164_v7 }
 0x269   :  { %v4124_v23 = vpop.f32.mrf.mxu1  ;;  %v4222_v60 = vpop.f32.mrf.mxu0 }
 0x26a   :  { %v2630_v32 = vadd.f32 %v6190_v40, %v2554_v59 }
 0x26b   :  { %v2192_v6 = vpop.f32.mrf.mxu1  ;;  %v2478_v17 = vpop.f32.mrf.mxu0 }
 0x26c   :  { %2653 = vst [vmem:[%s6309_s3 + $0x70] sm:$0xff] %v2630_v32  ;;  %v2555_v8 = vadd.f32 %v2478_v17, %v2264_v12  ;;  %v2265_v46 = vadd.f32 %v2192_v6, %v6167_v3 }
 0x26d   :  { %v4127_v25 = vpop.f32.mrf.mxu1  ;;  %v4225_v21 = vpop.f32.mrf.mxu0 }
 0x26e   :  { %v2631_v26 = vadd.f32 %v6190_v40, %v2555_v8 }
 0x26f   :  { %v2197_v42 = vpop.f32.mrf.mxu1  ;;  %v2483_v16 = vpop.f32.mrf.mxu0 }
 0x270   :  { %2654 = vst [vmem:[%s6309_s3 + $0x78] sm:$0xff] %v2631_v26  ;;  %v2556_v7 = vadd.f32 %v2483_v16, %v2265_v46  ;;  %v2266_v34 = vadd.f32 %v2197_v42, %v6170_v36 }
 0x271   :  { %v4130_v27 = vpop.f32.mrf.mxu1  ;;  %v4228_v30 = vpop.f32.mrf.mxu0 }
 0x272   :  { %v2632_v56 = vadd.f32 %v6190_v40, %v2556_v7 }
 0x273   :  { %v2202_v49 = vpop.f32.mrf.mxu1  ;;  %v2488_v53 = vpop.f32.mrf.mxu0 }
 0x274   :  { %2655 = vst [vmem:[%s6309_s3 + $0x80] sm:$0xff] %v2632_v56  ;;  %v2557_v3 = vadd.f32 %v2488_v53, %v2266_v34  ;;  %v2267_v35 = vadd.f32 %v2202_v49, %v6173_v44 }
 0x275   :  { %v4133_v20 = vpop.f32.mrf.mxu1  ;;  %v4231_v9 = vpop.f32.mrf.mxu0 }
 0x276   :  { %v2633_v15 = vadd.f32 %v6190_v40, %v2557_v3 }
 0x277   :  { %v2207_v1 = vpop.f32.mrf.mxu1  ;;  %v2493_v54 = vpop.f32.mrf.mxu0 }
 0x278   :  { %2656 = vst [vmem:[%s6309_s3 + $0x88] sm:$0xff] %v2633_v15  ;;  %v2558_v36 = vadd.f32 %v2493_v54, %v2267_v35  ;;  %v2268_v41 = vadd.f32 %v2207_v1, %v6176_v51 }
 0x279   :  { %v4136_v61 = vpop.f32.mrf.mxu1  ;;  %v4234_v31 = vpop.f32.mrf.mxu0 }
 0x27a   :  { %v2634_v39 = vadd.f32 %v6190_v40, %v2558_v36 }
 0x27b   :  { %v2212_v45 = vpop.f32.mrf.mxu1  ;;  %v2498_v14 = vpop.f32.mrf.mxu0 }
 0x27c   :  { %2657 = vst [vmem:[%s6309_s3 + $0x90] sm:$0xff] %v2634_v39  ;;  %v2559_v44 = vadd.f32 %v2498_v14, %v2268_v41  ;;  %v2269_v43 = vadd.f32 %v2212_v45, %v6179_v62 }
 0x27d   :  { %v4139_v5 = vpop.f32.mrf.mxu1  ;;  %v4237_v47 = vpop.f32.mrf.mxu0 }
 0x27e   :  { %v2635_v50 = vadd.f32 %v6190_v40, %v2559_v44 }
 0x27f   :  { %v2217_v19 = vpop.f32.mrf.mxu1  ;;  %v2503_v4 = vpop.f32.mrf.mxu0 }
 0x280   :  { %2658 = vst [vmem:[%s6309_s3 + $0x98] sm:$0xff] %v2635_v50  ;;  %v2560_v51 = vadd.f32 %v2503_v4, %v2269_v43  ;;  %v2270_v57 = vadd.f32 %v2217_v19, %v6182_v13 }
 0x281   :  { %v4142_v28 = vpop.f32.mrf.mxu1  ;;  %v4240_v22 = vpop.f32.mrf.mxu0 }
 0x282   :  { %v2636_v24 = vadd.f32 %v6190_v40, %v2560_v51 }
 0x283   :  { %v2222_v58 = vpop.f32.mrf.mxu1  ;;  %v2508_v29 = vpop.f32.mrf.mxu0 }
 0x284   :  { %2659 = vst [vmem:[%s6309_s3 + $0xa0] sm:$0xff] %v2636_v24  ;;  %v2561_v62 = vadd.f32 %v2508_v29, %v2270_v57  ;;  %v2271_v37 = vadd.f32 %v2222_v58, %v6184_v2 }
 0x285   :  { %v4243_v48 = vpop.f32.mrf.mxu0  ;;  %v4145_v38 = vpop.f32.mrf.mxu1 }
 0x286   :  { %v2637_v55 = vadd.f32 %v6190_v40, %v2561_v62 }
 0x287   :  { %v2513_v52 = vpop.f32.mrf.mxu0 }
 0x288   :  { %2660 = vst [vmem:[%s6309_s3 + $0xa8] sm:$0xff] %v2637_v55  ;;  %v2562_v13 = vadd.f32 %v2513_v52, %v2271_v37 }
 0x289   :  { %v4246_v63 = vpop.f32.mrf.mxu0 }
 0x28a   :  { %v2638_v33 = vadd.f32 %v6190_v40, %v2562_v13 }
 0x28c   :  { %2661 = vst [vmem:[%s6309_s3 + $0xb0] sm:$0xff] %v2638_v33 }

</bundles_post_ra>
